<compile_context>
chip_gen: v7x
topology: tpu7x:2x2x1
jax: 0.10.0
libtpu: 0.0.40
codegen_flags: <defaults>
</compile_context>

<pallas_src>
import jax
import jax.numpy as jnp
from jax.experimental import pallas as pl
from jax.experimental.pallas import tpu as pltpu

N_EMBED = 384
N_HEAD = 6
HEAD_SIZE = N_EMBED // N_HEAD        # 64
LN_EPS = 1e-5                        # torch.nn.LayerNorm default
NEG_INF = -1e30                      # finite mask value (safe under max-subtraction)


def _layernorm_f32(x, gamma, beta):
    """LayerNorm over last dim, f32 math. x: (rows, C); gamma/beta: (1, C)."""
    mu = jnp.mean(x, axis=-1, keepdims=True)
    var = jnp.mean(jnp.square(x - mu), axis=-1, keepdims=True)
    y = (x - mu) * jax.lax.rsqrt(var + LN_EPS)
    return y * gamma + beta


# ---------------------------------------------------------------------------
# Fused kernel (one batch element):
#   x = x + Proj(MultiHeadAttention(LN1(x)))
#   x = x + FFN(LN2(x))
# ---------------------------------------------------------------------------
def _block_kernel(x_ref,
                  g1_ref, b1_ref, wqkv_ref, wp_ref, bp_ref,
                  g2_ref, b2_ref, w1_ref, fb1_ref, w2_ref, fb2_ref,
                  o_ref):
    x = x_ref[0].astype(jnp.float32)                       # (T, C)
    T, C = x.shape

    # ---- attention sub-block ------------------------------------------------
    xln = _layernorm_f32(x, g1_ref[...], b1_ref[...])      # (T, C), f32

    # Fused Q/K/V projection for all heads in one lane-dense matmul.
    # (scale C**-0.5 is already folded into the Q columns of wqkv)
    qkv = jnp.dot(xln.astype(jnp.bfloat16), wqkv_ref[...],
                  preferred_element_type=jnp.float32)      # (T, 3C)

    row = jax.lax.broadcasted_iota(jnp.int32, (T, T), 0)
    col = jax.lax.broadcasted_iota(jnp.int32, (T, T), 1)
    causal = col <= row                                    # tril mask

    heads = []
    for h in range(N_HEAD):                                # static loop (6 heads)
        lo = h * HEAD_SIZE
        q = qkv[:, lo:lo + HEAD_SIZE].astype(jnp.bfloat16)
        k = qkv[:, C + lo:C + lo + HEAD_SIZE].astype(jnp.bfloat16)
        v = qkv[:, 2 * C + lo:2 * C + lo + HEAD_SIZE].astype(jnp.bfloat16)

        s = jnp.dot(q, k.T, preferred_element_type=jnp.float32)   # (T, T)
        s = jnp.where(causal, s, NEG_INF)
        s = s - jnp.max(s, axis=-1, keepdims=True)
        p = jnp.exp(s)
        p = p * pl.reciprocal(jnp.sum(p, axis=-1, keepdims=True), approx=True)
        heads.append(jnp.dot(p.astype(jnp.bfloat16), v,
                             preferred_element_type=jnp.float32))

    att = jnp.concatenate(heads, axis=-1)                  # (T, C), lane-dense

    y = jnp.dot(att.astype(jnp.bfloat16), wp_ref[...],
                preferred_element_type=jnp.float32) + bp_ref[...]
    x = x + y                                              # residual add 1

    # ---- feed-forward sub-block ---------------------------------------------
    xln2 = _layernorm_f32(x, g2_ref[...], b2_ref[...])
    hdn = jnp.dot(xln2.astype(jnp.bfloat16), w1_ref[...],
                  preferred_element_type=jnp.float32) + fb1_ref[...]  # (T, 4C)
    hdn = jnp.maximum(hdn, 0.0)                            # ReLU
    y2 = jnp.dot(hdn.astype(jnp.bfloat16), w2_ref[...],
                 preferred_element_type=jnp.float32) + fb2_ref[...]   # (T, C)

    o_ref[0] = (x + y2).astype(o_ref.dtype)                # residual add 2


# ---------------------------------------------------------------------------
# Block forward
# ---------------------------------------------------------------------------
def block_forward(x, params):
    B, T, C = x.shape

    # Weight prep (cheap, fused under jit): fold attention scale into Wq,
    # concat Q/K/V, cast matmul weights to bf16 (halves HBM weight traffic).
    scale = float(C) ** -0.5                               # reference uses n_embed
    wqkv = jnp.concatenate(
        [params["wq"] * scale, params["wk"], params["wv"]], axis=1
    ).astype(jnp.bfloat16)                                 # (C, 3C)
    wp = params["proj_w"].astype(jnp.bfloat16)             # (C, C)
    w1 = params["ffn_w1"].astype(jnp.bfloat16)             # (C, 4C)
    w2 = params["ffn_w2"].astype(jnp.bfloat16)             # (4C, C)

    rowvec = lambda p: p.reshape(1, -1)                    # 1D -> (1, n) for VMEM

    const = lambda shape: pl.BlockSpec(shape, lambda b: (0,) * len(shape))

    return pl.pallas_call(
        _block_kernel,
        out_shape=jax.ShapeDtypeStruct((B, T, C), x.dtype),
        grid=(B,),
        in_specs=[
            pl.BlockSpec((1, T, C), lambda b: (b, 0, 0)),  # x (one batch element)
            const((1, C)),                                 # ln1 gamma
            const((1, C)),                                 # ln1 beta
            const((C, 3 * C)),                             # W_qkv
            const((C, C)),                                 # W_proj
            const((1, C)),                                 # proj bias
            const((1, C)),                                 # ln2 gamma
            const((1, C)),                                 # ln2 beta
            const((C, 4 * C)),                             # FFN W1
            const((1, 4 * C)),                             # FFN b1
            const((4 * C, C)),                             # FFN W2
            const((1, C)),                                 # FFN b2
        ],
        out_specs=pl.BlockSpec((1, T, C), lambda b: (b, 0, 0)),
        compiler_params=pltpu.CompilerParams(
            dimension_semantics=("parallel",)),
    )(x,
      rowvec(params["ln1_g"]), rowvec(params["ln1_b"]),
      wqkv, wp, rowvec(params["proj_b"]),
      rowvec(params["ln2_g"]), rowvec(params["ln2_b"]),
      w1, rowvec(params["ffn_b1"]), w2, rowvec(params["ffn_b2"]))


# ---------------------------------------------------------------------------
# Parameters (head-concatenated, pre-transposed layout)
# ---------------------------------------------------------------------------
def init_params(key):
    ks = jax.random.split(key, 6)
    s = 0.02
    return dict(
        ln1_g=jnp.ones((N_EMBED,), jnp.float32),
        ln1_b=jnp.zeros((N_EMBED,), jnp.float32),
        # columns h*HEAD_SIZE:(h+1)*HEAD_SIZE are head h's weights (== torch.cat)
        wq=jax.random.normal(ks[0], (N_EMBED, N_EMBED), jnp.float32) * s,
        wk=jax.random.normal(ks[1], (N_EMBED, N_EMBED), jnp.float32) * s,
        wv=jax.random.normal(ks[2], (N_EMBED, N_EMBED), jnp.float32) * s,
        proj_w=jax.random.normal(ks[3], (N_EMBED, N_EMBED), jnp.float32) * s,
        proj_b=jnp.zeros((N_EMBED,), jnp.float32),
        ln2_g=jnp.ones((N_EMBED,), jnp.float32),
        ln2_b=jnp.zeros((N_EMBED,), jnp.float32),
        ffn_w1=jax.random.normal(ks[4], (N_EMBED, 4 * N_EMBED), jnp.float32) * s,
        ffn_b1=jnp.zeros((4 * N_EMBED,), jnp.float32),
        ffn_w2=jax.random.normal(ks[5], (4 * N_EMBED, N_EMBED), jnp.float32) * s,
        ffn_b2=jnp.zeros((N_EMBED,), jnp.float32),
    )


if __name__ == "__main__":
    key = jax.random.PRNGKey(0)
    k_x, k_p = jax.random.split(key)
    B, T = 2, 8                       # T <= block_size (256)
    x = jax.random.normal(k_x, (B, T, N_EMBED), jnp.float32)
    params = init_params(k_p)

    # TODO(synk): Dropout(p=0.2) layers are identity at inference and are omitted.
    y = jax.jit(block_forward)(x, params)
    jax.block_until_ready(y)
    assert y.shape == (B, T, N_EMBED) and y.dtype == jnp.float32
    assert bool(jnp.all(jnp.isfinite(y)))
    print("KERNEL_OK")
</pallas_src>

<mosaic_0001>
module attributes {stable_mosaic.version = 11 : i64} {
  func.func @_block_kernel(%arg0: i32, %arg1: memref<1x8x384xf32, #tpu.memory_space<vmem>>, %arg2: memref<1x384xf32, #tpu.memory_space<vmem>>, %arg3: memref<1x384xf32, #tpu.memory_space<vmem>>, %arg4: memref<384x1152xbf16, #tpu.memory_space<vmem>>, %arg5: memref<384x384xbf16, #tpu.memory_space<vmem>>, %arg6: memref<1x384xf32, #tpu.memory_space<vmem>>, %arg7: memref<1x384xf32, #tpu.memory_space<vmem>>, %arg8: memref<1x384xf32, #tpu.memory_space<vmem>>, %arg9: memref<384x1536xbf16, #tpu.memory_space<vmem>>, %arg10: memref<1x1536xf32, #tpu.memory_space<vmem>>, %arg11: memref<1536x384xbf16, #tpu.memory_space<vmem>>, %arg12: memref<1x384xf32, #tpu.memory_space<vmem>>, %arg13: memref<1x8x384xf32, #tpu.memory_space<vmem>>) attributes {dimension_semantics = [#tpu.dimension_semantics<parallel>], iteration_bounds = array<i64: 2>, scalar_prefetch = 0 : i64, scratch_operands = 0 : i64, tpu.core_type = #tpu.core_type<tc>, window_params = [{transform_indices = @transform_0, window_bounds = array<i64: 1, 8, 384>}, {pipeline_mode = #tpu.pipeline_mode<synchronous>, transform_indices = @transform_1, window_bounds = array<i64: 1, 384>}, {pipeline_mode = #tpu.pipeline_mode<synchronous>, transform_indices = @transform_2, window_bounds = array<i64: 1, 384>}, {pipeline_mode = #tpu.pipeline_mode<synchronous>, transform_indices = @transform_3, window_bounds = array<i64: 384, 1152>}, {pipeline_mode = #tpu.pipeline_mode<synchronous>, transform_indices = @transform_4, window_bounds = array<i64: 384, 384>}, {pipeline_mode = #tpu.pipeline_mode<synchronous>, transform_indices = @transform_5, window_bounds = array<i64: 1, 384>}, {pipeline_mode = #tpu.pipeline_mode<synchronous>, transform_indices = @transform_6, window_bounds = array<i64: 1, 384>}, {pipeline_mode = #tpu.pipeline_mode<synchronous>, transform_indices = @transform_7, window_bounds = array<i64: 1, 384>}, {pipeline_mode = #tpu.pipeline_mode<synchronous>, transform_indices = @transform_8, window_bounds = array<i64: 384, 1536>}, {pipeline_mode = #tpu.pipeline_mode<synchronous>, transform_indices = @transform_9, window_bounds = array<i64: 1, 1536>}, {pipeline_mode = #tpu.pipeline_mode<synchronous>, transform_indices = @transform_10, window_bounds = array<i64: 1536, 384>}, {pipeline_mode = #tpu.pipeline_mode<synchronous>, transform_indices = @transform_11, window_bounds = array<i64: 1, 384>}, {transform_indices = @transform_12, window_bounds = array<i64: 1, 8, 384>}]} {
    %c0 = arith.constant 0 : index
    %c0_0 = arith.constant 0 : index
    %c0_1 = arith.constant 0 : index
    %0 = vector.load %arg1[%c0, %c0_0, %c0_1] : memref<1x8x384xf32, #tpu.memory_space<vmem>>, vector<1x8x384xf32>
    %1 = vector.shape_cast %0 : vector<1x8x384xf32> to vector<8x384xf32>
    %c0_2 = arith.constant 0 : index
    %c0_3 = arith.constant 0 : index
    %2 = vector.load %arg2[%c0_2, %c0_3] : memref<1x384xf32, #tpu.memory_space<vmem>>, vector<1x384xf32>
    %c0_4 = arith.constant 0 : index
    %c0_5 = arith.constant 0 : index
    %3 = vector.load %arg3[%c0_4, %c0_5] : memref<1x384xf32, #tpu.memory_space<vmem>>, vector<1x384xf32>
    %cst = arith.constant dense<0.000000e+00> : vector<8xf32>
    %4 = vector.multi_reduction <add>, %1, %cst [1] : vector<8x384xf32> to vector<8xf32>
    %5 = vector.shape_cast %4 : vector<8xf32> to vector<8x1xf32>
    %cst_6 = arith.constant 3.840000e+02 : f32
    %6 = vector.broadcast %cst_6 : f32 to vector<8x1xf32>
    %7 = arith.divf %5, %6 : vector<8x1xf32>
    %8 = vector.broadcast %7 : vector<8x1xf32> to vector<8x384xf32>
    %9 = arith.subf %1, %8 : vector<8x384xf32>
    %10 = arith.mulf %9, %9 : vector<8x384xf32>
    %cst_7 = arith.constant dense<0.000000e+00> : vector<8xf32>
    %11 = vector.multi_reduction <add>, %10, %cst_7 [1] : vector<8x384xf32> to vector<8xf32>
    %12 = vector.shape_cast %11 : vector<8xf32> to vector<8x1xf32>
    %cst_8 = arith.constant 3.840000e+02 : f32
    %13 = vector.broadcast %cst_8 : f32 to vector<8x1xf32>
    %14 = arith.divf %12, %13 : vector<8x1xf32>
    %15 = vector.broadcast %7 : vector<8x1xf32> to vector<8x384xf32>
    %16 = arith.subf %1, %15 : vector<8x384xf32>
    %cst_9 = arith.constant 9.99999974E-6 : f32
    %17 = vector.broadcast %cst_9 : f32 to vector<8x1xf32>
    %18 = arith.addf %14, %17 : vector<8x1xf32>
    %19 = math.rsqrt %18 : vector<8x1xf32>
    %20 = vector.broadcast %19 : vector<8x1xf32> to vector<8x384xf32>
    %21 = arith.mulf %16, %20 : vector<8x384xf32>
    %22 = vector.broadcast %2 : vector<1x384xf32> to vector<8x384xf32>
    %23 = arith.mulf %21, %22 : vector<8x384xf32>
    %24 = vector.broadcast %3 : vector<1x384xf32> to vector<8x384xf32>
    %25 = arith.addf %23, %24 : vector<8x384xf32>
    %26 = arith.truncf %25 : vector<8x384xf32> to vector<8x384xbf16>
    %c0_10 = arith.constant 0 : index
    %c0_11 = arith.constant 0 : index
    %27 = vector.load %arg4[%c0_10, %c0_11] : memref<384x1152xbf16, #tpu.memory_space<vmem>>, vector<384x1152xbf16>
    %cst_12 = arith.constant dense<0.000000e+00> : vector<8x1152xf32>
    %28 = tpu.matmul %26, %27, %cst_12 {dimension_numbers = #tpu.dot_dimension_numbers<[1], [0], [0], [1], [0, 0, 1, 1], [], []>} : vector<8x384xbf16>, vector<384x1152xbf16>, vector<8x1152xf32> -> vector<8x1152xf32>
    %29 = tpu.iota {dimensions = array<i32: 0>} : vector<8x8xi32>
    %30 = tpu.iota {dimensions = array<i32: 1>} : vector<8x8xi32>
    %31 = arith.cmpi sle, %30, %29 : vector<8x8xi32>
    %32 = vector.extract_strided_slice %28 {offsets = [0, 0], sizes = [8, 64], strides = [1, 1]} : vector<8x1152xf32> to vector<8x64xf32>
    %33 = arith.truncf %32 : vector<8x64xf32> to vector<8x64xbf16>
    %34 = vector.extract_strided_slice %28 {offsets = [0, 384], sizes = [8, 64], strides = [1, 1]} : vector<8x1152xf32> to vector<8x64xf32>
    %35 = arith.truncf %34 : vector<8x64xf32> to vector<8x64xbf16>
    %36 = vector.extract_strided_slice %28 {offsets = [0, 768], sizes = [8, 64], strides = [1, 1]} : vector<8x1152xf32> to vector<8x64xf32>
    %37 = arith.truncf %36 : vector<8x64xf32> to vector<8x64xbf16>
    %38 = tpu.transpose %35, [1, 0] : vector<8x64xbf16> -> vector<64x8xbf16>
    %cst_13 = arith.constant dense<0.000000e+00> : vector<8x8xf32>
    %39 = tpu.matmul %33, %38, %cst_13 {dimension_numbers = #tpu.dot_dimension_numbers<[1], [0], [0], [1], [0, 0, 1, 1], [], []>} : vector<8x64xbf16>, vector<64x8xbf16>, vector<8x8xf32> -> vector<8x8xf32>
    %cst_14 = arith.constant -1.000000e+30 : f32
    %40 = vector.broadcast %cst_14 : f32 to vector<8x8xf32>
    %41 = arith.select %31, %39, %40 : vector<8x8xi1>, vector<8x8xf32>
    %cst_15 = arith.constant dense<0xFF800000> : vector<8xf32>
    %42 = vector.multi_reduction <maximumf>, %41, %cst_15 [1] : vector<8x8xf32> to vector<8xf32>
    %43 = vector.shape_cast %42 : vector<8xf32> to vector<8x1xf32>
    %44 = vector.broadcast %43 : vector<8x1xf32> to vector<8x8xf32>
    %45 = arith.subf %41, %44 : vector<8x8xf32>
    %46 = math.exp %45 : vector<8x8xf32>
    %cst_16 = arith.constant dense<0.000000e+00> : vector<8xf32>
    %47 = vector.multi_reduction <add>, %46, %cst_16 [1] : vector<8x8xf32> to vector<8xf32>
    %48 = vector.shape_cast %47 : vector<8xf32> to vector<8x1xf32>
    %49 = tpu.reciprocal %48 {approx = true} : vector<8x1xf32> -> vector<8x1xf32>
    %50 = vector.broadcast %49 : vector<8x1xf32> to vector<8x8xf32>
    %51 = arith.mulf %46, %50 : vector<8x8xf32>
    %52 = arith.truncf %51 : vector<8x8xf32> to vector<8x8xbf16>
    %cst_17 = arith.constant dense<0.000000e+00> : vector<8x64xf32>
    %53 = tpu.matmul %52, %37, %cst_17 {dimension_numbers = #tpu.dot_dimension_numbers<[1], [0], [0], [1], [0, 0, 1, 1], [], []>} : vector<8x8xbf16>, vector<8x64xbf16>, vector<8x64xf32> -> vector<8x64xf32>
    %54 = vector.extract_strided_slice %28 {offsets = [0, 64], sizes = [8, 64], strides = [1, 1]} : vector<8x1152xf32> to vector<8x64xf32>
    %55 = arith.truncf %54 : vector<8x64xf32> to vector<8x64xbf16>
    %56 = vector.extract_strided_slice %28 {offsets = [0, 448], sizes = [8, 64], strides = [1, 1]} : vector<8x1152xf32> to vector<8x64xf32>
    %57 = arith.truncf %56 : vector<8x64xf32> to vector<8x64xbf16>
    %58 = vector.extract_strided_slice %28 {offsets = [0, 832], sizes = [8, 64], strides = [1, 1]} : vector<8x1152xf32> to vector<8x64xf32>
    %59 = arith.truncf %58 : vector<8x64xf32> to vector<8x64xbf16>
    %60 = tpu.transpose %57, [1, 0] : vector<8x64xbf16> -> vector<64x8xbf16>
    %cst_18 = arith.constant dense<0.000000e+00> : vector<8x8xf32>
    %61 = tpu.matmul %55, %60, %cst_18 {dimension_numbers = #tpu.dot_dimension_numbers<[1], [0], [0], [1], [0, 0, 1, 1], [], []>} : vector<8x64xbf16>, vector<64x8xbf16>, vector<8x8xf32> -> vector<8x8xf32>
    %cst_19 = arith.constant -1.000000e+30 : f32
    %62 = vector.broadcast %cst_19 : f32 to vector<8x8xf32>
    %63 = arith.select %31, %61, %62 : vector<8x8xi1>, vector<8x8xf32>
    %cst_20 = arith.constant dense<0xFF800000> : vector<8xf32>
    %64 = vector.multi_reduction <maximumf>, %63, %cst_20 [1] : vector<8x8xf32> to vector<8xf32>
    %65 = vector.shape_cast %64 : vector<8xf32> to vector<8x1xf32>
    %66 = vector.broadcast %65 : vector<8x1xf32> to vector<8x8xf32>
    %67 = arith.subf %63, %66 : vector<8x8xf32>
    %68 = math.exp %67 : vector<8x8xf32>
    %cst_21 = arith.constant dense<0.000000e+00> : vector<8xf32>
    %69 = vector.multi_reduction <add>, %68, %cst_21 [1] : vector<8x8xf32> to vector<8xf32>
    %70 = vector.shape_cast %69 : vector<8xf32> to vector<8x1xf32>
    %71 = tpu.reciprocal %70 {approx = true} : vector<8x1xf32> -> vector<8x1xf32>
    %72 = vector.broadcast %71 : vector<8x1xf32> to vector<8x8xf32>
    %73 = arith.mulf %68, %72 : vector<8x8xf32>
    %74 = arith.truncf %73 : vector<8x8xf32> to vector<8x8xbf16>
    %cst_22 = arith.constant dense<0.000000e+00> : vector<8x64xf32>
    %75 = tpu.matmul %74, %59, %cst_22 {dimension_numbers = #tpu.dot_dimension_numbers<[1], [0], [0], [1], [0, 0, 1, 1], [], []>} : vector<8x8xbf16>, vector<8x64xbf16>, vector<8x64xf32> -> vector<8x64xf32>
    %76 = vector.extract_strided_slice %28 {offsets = [0, 128], sizes = [8, 64], strides = [1, 1]} : vector<8x1152xf32> to vector<8x64xf32>
    %77 = arith.truncf %76 : vector<8x64xf32> to vector<8x64xbf16>
    %78 = vector.extract_strided_slice %28 {offsets = [0, 512], sizes = [8, 64], strides = [1, 1]} : vector<8x1152xf32> to vector<8x64xf32>
    %79 = arith.truncf %78 : vector<8x64xf32> to vector<8x64xbf16>
    %80 = vector.extract_strided_slice %28 {offsets = [0, 896], sizes = [8, 64], strides = [1, 1]} : vector<8x1152xf32> to vector<8x64xf32>
    %81 = arith.truncf %80 : vector<8x64xf32> to vector<8x64xbf16>
    %82 = tpu.transpose %79, [1, 0] : vector<8x64xbf16> -> vector<64x8xbf16>
    %cst_23 = arith.constant dense<0.000000e+00> : vector<8x8xf32>
    %83 = tpu.matmul %77, %82, %cst_23 {dimension_numbers = #tpu.dot_dimension_numbers<[1], [0], [0], [1], [0, 0, 1, 1], [], []>} : vector<8x64xbf16>, vector<64x8xbf16>, vector<8x8xf32> -> vector<8x8xf32>
    %cst_24 = arith.constant -1.000000e+30 : f32
    %84 = vector.broadcast %cst_24 : f32 to vector<8x8xf32>
    %85 = arith.select %31, %83, %84 : vector<8x8xi1>, vector<8x8xf32>
    %cst_25 = arith.constant dense<0xFF800000> : vector<8xf32>
    %86 = vector.multi_reduction <maximumf>, %85, %cst_25 [1] : vector<8x8xf32> to vector<8xf32>
    %87 = vector.shape_cast %86 : vector<8xf32> to vector<8x1xf32>
    %88 = vector.broadcast %87 : vector<8x1xf32> to vector<8x8xf32>
    %89 = arith.subf %85, %88 : vector<8x8xf32>
    %90 = math.exp %89 : vector<8x8xf32>
    %cst_26 = arith.constant dense<0.000000e+00> : vector<8xf32>
    %91 = vector.multi_reduction <add>, %90, %cst_26 [1] : vector<8x8xf32> to vector<8xf32>
    %92 = vector.shape_cast %91 : vector<8xf32> to vector<8x1xf32>
    %93 = tpu.reciprocal %92 {approx = true} : vector<8x1xf32> -> vector<8x1xf32>
    %94 = vector.broadcast %93 : vector<8x1xf32> to vector<8x8xf32>
    %95 = arith.mulf %90, %94 : vector<8x8xf32>
    %96 = arith.truncf %95 : vector<8x8xf32> to vector<8x8xbf16>
    %cst_27 = arith.constant dense<0.000000e+00> : vector<8x64xf32>
    %97 = tpu.matmul %96, %81, %cst_27 {dimension_numbers = #tpu.dot_dimension_numbers<[1], [0], [0], [1], [0, 0, 1, 1], [], []>} : vector<8x8xbf16>, vector<8x64xbf16>, vector<8x64xf32> -> vector<8x64xf32>
    %98 = vector.extract_strided_slice %28 {offsets = [0, 192], sizes = [8, 64], strides = [1, 1]} : vector<8x1152xf32> to vector<8x64xf32>
    %99 = arith.truncf %98 : vector<8x64xf32> to vector<8x64xbf16>
    %100 = vector.extract_strided_slice %28 {offsets = [0, 576], sizes = [8, 64], strides = [1, 1]} : vector<8x1152xf32> to vector<8x64xf32>
    %101 = arith.truncf %100 : vector<8x64xf32> to vector<8x64xbf16>
    %102 = vector.extract_strided_slice %28 {offsets = [0, 960], sizes = [8, 64], strides = [1, 1]} : vector<8x1152xf32> to vector<8x64xf32>
    %103 = arith.truncf %102 : vector<8x64xf32> to vector<8x64xbf16>
    %104 = tpu.transpose %101, [1, 0] : vector<8x64xbf16> -> vector<64x8xbf16>
    %cst_28 = arith.constant dense<0.000000e+00> : vector<8x8xf32>
    %105 = tpu.matmul %99, %104, %cst_28 {dimension_numbers = #tpu.dot_dimension_numbers<[1], [0], [0], [1], [0, 0, 1, 1], [], []>} : vector<8x64xbf16>, vector<64x8xbf16>, vector<8x8xf32> -> vector<8x8xf32>
    %cst_29 = arith.constant -1.000000e+30 : f32
    %106 = vector.broadcast %cst_29 : f32 to vector<8x8xf32>
    %107 = arith.select %31, %105, %106 : vector<8x8xi1>, vector<8x8xf32>
    %cst_30 = arith.constant dense<0xFF800000> : vector<8xf32>
    %108 = vector.multi_reduction <maximumf>, %107, %cst_30 [1] : vector<8x8xf32> to vector<8xf32>
    %109 = vector.shape_cast %108 : vector<8xf32> to vector<8x1xf32>
    %110 = vector.broadcast %109 : vector<8x1xf32> to vector<8x8xf32>
    %111 = arith.subf %107, %110 : vector<8x8xf32>
    %112 = math.exp %111 : vector<8x8xf32>
    %cst_31 = arith.constant dense<0.000000e+00> : vector<8xf32>
    %113 = vector.multi_reduction <add>, %112, %cst_31 [1] : vector<8x8xf32> to vector<8xf32>
    %114 = vector.shape_cast %113 : vector<8xf32> to vector<8x1xf32>
    %115 = tpu.reciprocal %114 {approx = true} : vector<8x1xf32> -> vector<8x1xf32>
    %116 = vector.broadcast %115 : vector<8x1xf32> to vector<8x8xf32>
    %117 = arith.mulf %112, %116 : vector<8x8xf32>
    %118 = arith.truncf %117 : vector<8x8xf32> to vector<8x8xbf16>
    %cst_32 = arith.constant dense<0.000000e+00> : vector<8x64xf32>
    %119 = tpu.matmul %118, %103, %cst_32 {dimension_numbers = #tpu.dot_dimension_numbers<[1], [0], [0], [1], [0, 0, 1, 1], [], []>} : vector<8x8xbf16>, vector<8x64xbf16>, vector<8x64xf32> -> vector<8x64xf32>
    %120 = vector.extract_strided_slice %28 {offsets = [0, 256], sizes = [8, 64], strides = [1, 1]} : vector<8x1152xf32> to vector<8x64xf32>
    %121 = arith.truncf %120 : vector<8x64xf32> to vector<8x64xbf16>
    %122 = vector.extract_strided_slice %28 {offsets = [0, 640], sizes = [8, 64], strides = [1, 1]} : vector<8x1152xf32> to vector<8x64xf32>
    %123 = arith.truncf %122 : vector<8x64xf32> to vector<8x64xbf16>
    %124 = vector.extract_strided_slice %28 {offsets = [0, 1024], sizes = [8, 64], strides = [1, 1]} : vector<8x1152xf32> to vector<8x64xf32>
    %125 = arith.truncf %124 : vector<8x64xf32> to vector<8x64xbf16>
    %126 = tpu.transpose %123, [1, 0] : vector<8x64xbf16> -> vector<64x8xbf16>
    %cst_33 = arith.constant dense<0.000000e+00> : vector<8x8xf32>
    %127 = tpu.matmul %121, %126, %cst_33 {dimension_numbers = #tpu.dot_dimension_numbers<[1], [0], [0], [1], [0, 0, 1, 1], [], []>} : vector<8x64xbf16>, vector<64x8xbf16>, vector<8x8xf32> -> vector<8x8xf32>
    %cst_34 = arith.constant -1.000000e+30 : f32
    %128 = vector.broadcast %cst_34 : f32 to vector<8x8xf32>
    %129 = arith.select %31, %127, %128 : vector<8x8xi1>, vector<8x8xf32>
    %cst_35 = arith.constant dense<0xFF800000> : vector<8xf32>
    %130 = vector.multi_reduction <maximumf>, %129, %cst_35 [1] : vector<8x8xf32> to vector<8xf32>
    %131 = vector.shape_cast %130 : vector<8xf32> to vector<8x1xf32>
    %132 = vector.broadcast %131 : vector<8x1xf32> to vector<8x8xf32>
    %133 = arith.subf %129, %132 : vector<8x8xf32>
    %134 = math.exp %133 : vector<8x8xf32>
    %cst_36 = arith.constant dense<0.000000e+00> : vector<8xf32>
    %135 = vector.multi_reduction <add>, %134, %cst_36 [1] : vector<8x8xf32> to vector<8xf32>
    %136 = vector.shape_cast %135 : vector<8xf32> to vector<8x1xf32>
    %137 = tpu.reciprocal %136 {approx = true} : vector<8x1xf32> -> vector<8x1xf32>
    %138 = vector.broadcast %137 : vector<8x1xf32> to vector<8x8xf32>
    %139 = arith.mulf %134, %138 : vector<8x8xf32>
    %140 = arith.truncf %139 : vector<8x8xf32> to vector<8x8xbf16>
    %cst_37 = arith.constant dense<0.000000e+00> : vector<8x64xf32>
    %141 = tpu.matmul %140, %125, %cst_37 {dimension_numbers = #tpu.dot_dimension_numbers<[1], [0], [0], [1], [0, 0, 1, 1], [], []>} : vector<8x8xbf16>, vector<8x64xbf16>, vector<8x64xf32> -> vector<8x64xf32>
    %142 = vector.extract_strided_slice %28 {offsets = [0, 320], sizes = [8, 64], strides = [1, 1]} : vector<8x1152xf32> to vector<8x64xf32>
    %143 = arith.truncf %142 : vector<8x64xf32> to vector<8x64xbf16>
    %144 = vector.extract_strided_slice %28 {offsets = [0, 704], sizes = [8, 64], strides = [1, 1]} : vector<8x1152xf32> to vector<8x64xf32>
    %145 = arith.truncf %144 : vector<8x64xf32> to vector<8x64xbf16>
    %146 = vector.extract_strided_slice %28 {offsets = [0, 1088], sizes = [8, 64], strides = [1, 1]} : vector<8x1152xf32> to vector<8x64xf32>
    %147 = arith.truncf %146 : vector<8x64xf32> to vector<8x64xbf16>
    %148 = tpu.transpose %145, [1, 0] : vector<8x64xbf16> -> vector<64x8xbf16>
    %cst_38 = arith.constant dense<0.000000e+00> : vector<8x8xf32>
    %149 = tpu.matmul %143, %148, %cst_38 {dimension_numbers = #tpu.dot_dimension_numbers<[1], [0], [0], [1], [0, 0, 1, 1], [], []>} : vector<8x64xbf16>, vector<64x8xbf16>, vector<8x8xf32> -> vector<8x8xf32>
    %cst_39 = arith.constant -1.000000e+30 : f32
    %150 = vector.broadcast %cst_39 : f32 to vector<8x8xf32>
    %151 = arith.select %31, %149, %150 : vector<8x8xi1>, vector<8x8xf32>
    %cst_40 = arith.constant dense<0xFF800000> : vector<8xf32>
    %152 = vector.multi_reduction <maximumf>, %151, %cst_40 [1] : vector<8x8xf32> to vector<8xf32>
    %153 = vector.shape_cast %152 : vector<8xf32> to vector<8x1xf32>
    %154 = vector.broadcast %153 : vector<8x1xf32> to vector<8x8xf32>
    %155 = arith.subf %151, %154 : vector<8x8xf32>
    %156 = math.exp %155 : vector<8x8xf32>
    %cst_41 = arith.constant dense<0.000000e+00> : vector<8xf32>
    %157 = vector.multi_reduction <add>, %156, %cst_41 [1] : vector<8x8xf32> to vector<8xf32>
    %158 = vector.shape_cast %157 : vector<8xf32> to vector<8x1xf32>
    %159 = tpu.reciprocal %158 {approx = true} : vector<8x1xf32> -> vector<8x1xf32>
    %160 = vector.broadcast %159 : vector<8x1xf32> to vector<8x8xf32>
    %161 = arith.mulf %156, %160 : vector<8x8xf32>
    %162 = arith.truncf %161 : vector<8x8xf32> to vector<8x8xbf16>
    %cst_42 = arith.constant dense<0.000000e+00> : vector<8x64xf32>
    %163 = tpu.matmul %162, %147, %cst_42 {dimension_numbers = #tpu.dot_dimension_numbers<[1], [0], [0], [1], [0, 0, 1, 1], [], []>} : vector<8x8xbf16>, vector<8x64xbf16>, vector<8x64xf32> -> vector<8x64xf32>
    %164 = tpu.concatenate %53, %75, %97, %119, %141, %163 in 1 : vector<8x64xf32>, vector<8x64xf32>, vector<8x64xf32>, vector<8x64xf32>, vector<8x64xf32>, vector<8x64xf32> -> vector<8x384xf32>
    %165 = arith.truncf %164 : vector<8x384xf32> to vector<8x384xbf16>
    %c0_43 = arith.constant 0 : index
    %c0_44 = arith.constant 0 : index
    %166 = vector.load %arg5[%c0_43, %c0_44] : memref<384x384xbf16, #tpu.memory_space<vmem>>, vector<384x384xbf16>
    %cst_45 = arith.constant dense<0.000000e+00> : vector<8x384xf32>
    %167 = tpu.matmul %165, %166, %cst_45 {dimension_numbers = #tpu.dot_dimension_numbers<[1], [0], [0], [1], [0, 0, 1, 1], [], []>} : vector<8x384xbf16>, vector<384x384xbf16>, vector<8x384xf32> -> vector<8x384xf32>
    %c0_46 = arith.constant 0 : index
    %c0_47 = arith.constant 0 : index
    %168 = vector.load %arg6[%c0_46, %c0_47] : memref<1x384xf32, #tpu.memory_space<vmem>>, vector<1x384xf32>
    %169 = vector.broadcast %168 : vector<1x384xf32> to vector<8x384xf32>
    %170 = arith.addf %167, %169 : vector<8x384xf32>
    %171 = arith.addf %1, %170 : vector<8x384xf32>
    %c0_48 = arith.constant 0 : index
    %c0_49 = arith.constant 0 : index
    %172 = vector.load %arg7[%c0_48, %c0_49] : memref<1x384xf32, #tpu.memory_space<vmem>>, vector<1x384xf32>
    %c0_50 = arith.constant 0 : index
    %c0_51 = arith.constant 0 : index
    %173 = vector.load %arg8[%c0_50, %c0_51] : memref<1x384xf32, #tpu.memory_space<vmem>>, vector<1x384xf32>
    %cst_52 = arith.constant dense<0.000000e+00> : vector<8xf32>
    %174 = vector.multi_reduction <add>, %171, %cst_52 [1] : vector<8x384xf32> to vector<8xf32>
    %175 = vector.shape_cast %174 : vector<8xf32> to vector<8x1xf32>
    %cst_53 = arith.constant 3.840000e+02 : f32
    %176 = vector.broadcast %cst_53 : f32 to vector<8x1xf32>
    %177 = arith.divf %175, %176 : vector<8x1xf32>
    %178 = vector.broadcast %177 : vector<8x1xf32> to vector<8x384xf32>
    %179 = arith.subf %171, %178 : vector<8x384xf32>
    %180 = arith.mulf %179, %179 : vector<8x384xf32>
    %cst_54 = arith.constant dense<0.000000e+00> : vector<8xf32>
    %181 = vector.multi_reduction <add>, %180, %cst_54 [1] : vector<8x384xf32> to vector<8xf32>
    %182 = vector.shape_cast %181 : vector<8xf32> to vector<8x1xf32>
    %cst_55 = arith.constant 3.840000e+02 : f32
    %183 = vector.broadcast %cst_55 : f32 to vector<8x1xf32>
    %184 = arith.divf %182, %183 : vector<8x1xf32>
    %185 = vector.broadcast %177 : vector<8x1xf32> to vector<8x384xf32>
    %186 = arith.subf %171, %185 : vector<8x384xf32>
    %cst_56 = arith.constant 9.99999974E-6 : f32
    %187 = vector.broadcast %cst_56 : f32 to vector<8x1xf32>
    %188 = arith.addf %184, %187 : vector<8x1xf32>
    %189 = math.rsqrt %188 : vector<8x1xf32>
    %190 = vector.broadcast %189 : vector<8x1xf32> to vector<8x384xf32>
    %191 = arith.mulf %186, %190 : vector<8x384xf32>
    %192 = vector.broadcast %172 : vector<1x384xf32> to vector<8x384xf32>
    %193 = arith.mulf %191, %192 : vector<8x384xf32>
    %194 = vector.broadcast %173 : vector<1x384xf32> to vector<8x384xf32>
    %195 = arith.addf %193, %194 : vector<8x384xf32>
    %196 = arith.truncf %195 : vector<8x384xf32> to vector<8x384xbf16>
    %c0_57 = arith.constant 0 : index
    %c0_58 = arith.constant 0 : index
    %197 = vector.load %arg9[%c0_57, %c0_58] : memref<384x1536xbf16, #tpu.memory_space<vmem>>, vector<384x1536xbf16>
    %cst_59 = arith.constant dense<0.000000e+00> : vector<8x1536xf32>
    %198 = tpu.matmul %196, %197, %cst_59 {dimension_numbers = #tpu.dot_dimension_numbers<[1], [0], [0], [1], [0, 0, 1, 1], [], []>} : vector<8x384xbf16>, vector<384x1536xbf16>, vector<8x1536xf32> -> vector<8x1536xf32>
    %c0_60 = arith.constant 0 : index
    %c0_61 = arith.constant 0 : index
    %199 = vector.load %arg10[%c0_60, %c0_61] : memref<1x1536xf32, #tpu.memory_space<vmem>>, vector<1x1536xf32>
    %200 = vector.broadcast %199 : vector<1x1536xf32> to vector<8x1536xf32>
    %201 = arith.addf %198, %200 : vector<8x1536xf32>
    %cst_62 = arith.constant 0.000000e+00 : f32
    %202 = vector.broadcast %cst_62 : f32 to vector<8x1536xf32>
    %203 = arith.maximumf %201, %202 : vector<8x1536xf32>
    %204 = arith.truncf %203 : vector<8x1536xf32> to vector<8x1536xbf16>
    %c0_63 = arith.constant 0 : index
    %c0_64 = arith.constant 0 : index
    %205 = vector.load %arg11[%c0_63, %c0_64] : memref<1536x384xbf16, #tpu.memory_space<vmem>>, vector<1536x384xbf16>
    %cst_65 = arith.constant dense<0.000000e+00> : vector<8x384xf32>
    %206 = tpu.matmul %204, %205, %cst_65 {dimension_numbers = #tpu.dot_dimension_numbers<[1], [0], [0], [1], [0, 0, 1, 1], [], []>} : vector<8x1536xbf16>, vector<1536x384xbf16>, vector<8x384xf32> -> vector<8x384xf32>
    %c0_66 = arith.constant 0 : index
    %c0_67 = arith.constant 0 : index
    %207 = vector.load %arg12[%c0_66, %c0_67] : memref<1x384xf32, #tpu.memory_space<vmem>>, vector<1x384xf32>
    %208 = vector.broadcast %207 : vector<1x384xf32> to vector<8x384xf32>
    %209 = arith.addf %206, %208 : vector<8x384xf32>
    %210 = arith.addf %171, %209 : vector<8x384xf32>
    %c0_68 = arith.constant 0 : index
    %c0_69 = arith.constant 0 : index
    %c0_70 = arith.constant 0 : index
    %211 = vector.load %arg13[%c0_68, %c0_69, %c0_70] : memref<1x8x384xf32, #tpu.memory_space<vmem>>, vector<1x8x384xf32>
    %212 = vector.shape_cast %211 : vector<1x8x384xf32> to vector<8x384xf32>
    %213 = vector.shape_cast %210 : vector<8x384xf32> to vector<1x8x384xf32>
    tpu.vector_store %arg13[%c0_68, %c0_69, %c0_70], %213 {strides = array<i32>} : memref<1x8x384xf32, #tpu.memory_space<vmem>>, vector<1x8x384xf32>,
    return
  }
  func.func @transform_0(%arg0: i32) -> (i32, i32, i32) {
    %c0_i32 = arith.constant 0 : i32
    %c0_i32_0 = arith.constant 0 : i32
    %c0_i32_1 = arith.constant 0 : i32
    return %arg0, %c0_i32, %c0_i32_0 : i32, i32, i32
  }
  func.func @transform_1(%arg0: i32) -> (i32, i32) {
    %c0_i32 = arith.constant 0 : i32
    %c0_i32_0 = arith.constant 0 : i32
    %c0_i32_1 = arith.constant 0 : i32
    return %c0_i32, %c0_i32_0 : i32, i32
  }
  func.func @transform_2(%arg0: i32) -> (i32, i32) {
    %c0_i32 = arith.constant 0 : i32
    %c0_i32_0 = arith.constant 0 : i32
    %c0_i32_1 = arith.constant 0 : i32
    return %c0_i32, %c0_i32_0 : i32, i32
  }
  func.func @transform_3(%arg0: i32) -> (i32, i32) {
    %c0_i32 = arith.constant 0 : i32
    %c0_i32_0 = arith.constant 0 : i32
    %c0_i32_1 = arith.constant 0 : i32
    return %c0_i32, %c0_i32_0 : i32, i32
  }
  func.func @transform_4(%arg0: i32) -> (i32, i32) {
    %c0_i32 = arith.constant 0 : i32
    %c0_i32_0 = arith.constant 0 : i32
    %c0_i32_1 = arith.constant 0 : i32
    return %c0_i32, %c0_i32_0 : i32, i32
  }
  func.func @transform_5(%arg0: i32) -> (i32, i32) {
    %c0_i32 = arith.constant 0 : i32
    %c0_i32_0 = arith.constant 0 : i32
    %c0_i32_1 = arith.constant 0 : i32
    return %c0_i32, %c0_i32_0 : i32, i32
  }
  func.func @transform_6(%arg0: i32) -> (i32, i32) {
    %c0_i32 = arith.constant 0 : i32
    %c0_i32_0 = arith.constant 0 : i32
    %c0_i32_1 = arith.constant 0 : i32
    return %c0_i32, %c0_i32_0 : i32, i32
  }
  func.func @transform_7(%arg0: i32) -> (i32, i32) {
    %c0_i32 = arith.constant 0 : i32
    %c0_i32_0 = arith.constant 0 : i32
    %c0_i32_1 = arith.constant 0 : i32
    return %c0_i32, %c0_i32_0 : i32, i32
  }
  func.func @transform_8(%arg0: i32) -> (i32, i32) {
    %c0_i32 = arith.constant 0 : i32
    %c0_i32_0 = arith.constant 0 : i32
    %c0_i32_1 = arith.constant 0 : i32
    return %c0_i32, %c0_i32_0 : i32, i32
  }
  func.func @transform_9(%arg0: i32) -> (i32, i32) {
    %c0_i32 = arith.constant 0 : i32
    %c0_i32_0 = arith.constant 0 : i32
    %c0_i32_1 = arith.constant 0 : i32
    return %c0_i32, %c0_i32_0 : i32, i32
  }
  func.func @transform_10(%arg0: i32) -> (i32, i32) {
    %c0_i32 = arith.constant 0 : i32
    %c0_i32_0 = arith.constant 0 : i32
    %c0_i32_1 = arith.constant 0 : i32
    return %c0_i32, %c0_i32_0 : i32, i32
  }
  func.func @transform_11(%arg0: i32) -> (i32, i32) {
    %c0_i32 = arith.constant 0 : i32
    %c0_i32_0 = arith.constant 0 : i32
    %c0_i32_1 = arith.constant 0 : i32
    return %c0_i32, %c0_i32_0 : i32, i32
  }
  func.func @transform_12(%arg0: i32) -> (i32, i32, i32) {
    %c0_i32 = arith.constant 0 : i32
    %c0_i32_0 = arith.constant 0 : i32
    %c0_i32_1 = arith.constant 0 : i32
    return %arg0, %c0_i32, %c0_i32_0 : i32, i32, i32
  }
}

</mosaic_0001>

<bundles_post_ra>
// kernel: block_forward.1
= control target key start
LH: loop header
LB: loop body
LE: loop exit
PB: predicated region body
PF: predicated region fallthrough
CT: control target
= control target key end

     0   :  { %s14306_s0 = inlined_call_operand.vmem [shape: f32[2,8,384], index: 0, kind: input, shape index: {}]   ;;  %s14307_s1 = inlined_call_operand.vmem [shape: f32[1,384], index: 1, kind: input, shape index: {}]   ;;  %s14308_s2 = inlined_call_operand.vmem [shape: f32[1,384], index: 2, kind: input, shape index: {}]   ;;  %s14309_s3 = inlined_call_operand.vmem [shape: bf16[384,1152], index: 3, kind: input, shape index: {}]   ;;  %s14310_s4 = inlined_call_operand.vmem [shape: bf16[384,384], index: 4, kind: input, shape index: {}]   ;;  %s14311_s5 = inlined_call_operand.vmem [shape: f32[1,384], index: 5, kind: input, shape index: {}]   ;;  %s14312_s6 = inlined_call_operand.vmem [shape: f32[1,384], index: 6, kind: input, shape index: {}]   ;;  %s14313_s7 = inlined_call_operand.vmem [shape: f32[1,384], index: 7, kind: input, shape index: {}]   ;;  %s14314_s8 = inlined_call_operand.vmem [shape: bf16[384,1536], index: 8, kind: input, shape index: {}]   ;;  %s14315_s9 = inlined_call_operand.vmem [shape: f32[1,1536], index: 9, kind: input, shape index: {}]   ;;  %s14316_s10 = inlined_call_operand.vmem [shape: bf16[1536,384], index: 10, kind: input, shape index: {}]   ;;  %s14317_s11 = inlined_call_operand.vmem [shape: f32[1,384], index: 11, kind: input, shape index: {}]   ;;  %s14318_s12 = inlined_call_operand.hbm [shape: f32[2,8,384], index: 12, kind: output, shape index: {}]  }
   0x1   :  { %14322 = sst [smem:[#allocation8_spill]] %s14306_s0 }
   0x2   :  { %17 = vsyncpa [#allocation3], 0 }
   0x3   :  { %19 = vsyncpa [#allocation3 + $0x1], 0  ;;  %s11168_s21 = smov 0   ;;  %s11170_s22 = smov 0  }
   0x4   :  { %s11172_s23 = smov 0   ;;  %s11174_s24 = smov 0  }
   0x5 LB: > { %14323 = sst [smem:[#allocation5_spill]] %s11092_s23  ;;  %s11189_s25 = sadd.s32 4294967295, %s11096_s24   ;;  %s11096_s24 = sphi %s11174_s24, %s14331_s24   ;;  %s11092_s23 = sphi %s11172_s23, %s14333_s23   ;;  %s11088_s22 = sphi %s11170_s22, %s14335_s22   ;;  %s11084_s21 = sphi %s11168_s21, %s14334_s21  }
   0x6   : > { %s8462_s26 = sadd.s32 4294967294, %s11096_s24   ;;  %s11193_s27 = sadd.s32 1, %s11096_s24  }
   0x7   : > { %14324 = sst [smem:[#allocation6_spill]] %s11193_s27  ;;  %s289_s28 = sadd.s32 1, %s11092_s23 }
   0x8   : > { %s286_s29 = ssub.s32 %s11096_s24, %s11193_s27  ;;  %p299_p0 = scmp.ne.s32.totalorder %s11092_s23, %s11088_s22 }
   0x9   : > { %p287_p1 = scmp.eq.s32.totalorder %s286_s29, 0  ;;  %p300_p2 = scmp.eq.s32.totalorder %s11189_s25, 1 }
   0xa   : > { %p305_p3 = scmp.ne.s32.totalorder %s11088_s22, %s11084_s21  ;;  %p306_p4 = scmp.eq.s32.totalorder %s8462_s26, 1 }
   0xb   : > { %s11204_s30 = scalar_select %p287_p1, %s11092_s23, %s289_s28  }
   0xc   : > { %p11206_p5 = por %p300_p2, %p299_p0  ;;  %p11210_p6 = por %p306_p4, %p305_p3 }
   0xd   : > { %14325 = sst [smem:[#allocation7_spill]] %s11204_s30  ;;  %p8465_p7 = scmp.ge.s32.totalorder %s11096_s24, 1 }
   0xe   : > { %p365_p8 = scmp.lt.s32.totalorder %s11096_s24, 3 }
  0x10   : > { %p366_p9 = pnand %p8465_p7, %p365_p8 }
  0x11   : > { %p407_p10 = scmp.lt.s32.totalorder (!%p366_p9), %s11189_s25, 1  ;;  %s14328_s0 = sld [smem:[#allocation8_spill]] (!%p366_p9)  ;;  %v9779_v5 = vld [vmem:[%s14309_s3 + $0x4] ss:$36 sps:$4 sm:$0xff] (!%p366_p9)   ;;  %v9781_v6 = vld [vmem:[%s14309_s3 + $0xc] ss:$36 sps:$4 sm:$0xff] (!%p366_p9)  }
  0x12   : > { %369 = sbr.rel (%p366_p9) target bundleno = 3394 (0xd42), region = 68  ;;  %v9783_v7 = vld [vmem:[%s14309_s3] ss:$36 sps:$4 sm:$0xff] (!%p366_p9)   ;;  %v9784_v8 = vld [vmem:[%s14309_s3 + $0x8] ss:$36 sps:$4 sm:$0xff] (!%p366_p9)   ;;  %1825 = vmatprep.subr.bf16.mxu0 (!%p366_p9), %v9779_v5  ;;  %1907 = vmatprep.subr.bf16.mxu1 (!%p366_p9), %v9781_v6  ;;  %vm11100_vm0 = vmmov (!%p366_p9), 0  }
  0x13   : > { %v9785_v9 = vld [vmem:[%s14309_s3 + $0x4c] ss:$36 sps:$4 sm:$0xff] (!%p366_p9)   ;;  %v9787_v10 = vld [vmem:[%s14309_s3 + $0x54] ss:$36 sps:$4 sm:$0xff] (!%p366_p9)   ;;  %1826 = vmatpush1.bf16.msra.mxu0 (!%p366_p9), %v9783_v7  ;;  %1908 = vmatpush1.bf16.msra.mxu1 (!%p366_p9), %v9784_v8  ;;  %v9793_v14 = vld [vmem:[%s14309_s3 + $0x9c] ss:$36 sps:$4 sm:$0xff] (!%p366_p9)  }
  0x14   : > { %v9789_v11 = vld [vmem:[%s14309_s3 + $0x48] ss:$36 sps:$4 sm:$0xff] (!%p366_p9)   ;;  %v9790_v12 = vld [vmem:[%s14309_s3 + $0x50] ss:$36 sps:$4 sm:$0xff] (!%p366_p9)   ;;  %1827 = vmatprep.subr.bf16.mxu0 (!%p366_p9), %v9785_v9  ;;  %1909 = vmatprep.subr.bf16.mxu1 (!%p366_p9), %v9787_v10  ;;  %v9796_v16 = vld [vmem:[%s14309_s3 + $0x98] ss:$36 sps:$4 sm:$0xff] (!%p366_p9)  }
  0x15   : > { %v9791_v13 = vld [vmem:[%s14309_s3 + $0x94] ss:$36 sps:$4 sm:$0xff] (!%p366_p9)   ;;  %v9797_v17 = vld [vmem:[%s14309_s3 + $0xdc] ss:$36 sps:$4 sm:$0xff] (!%p366_p9)   ;;  %v9799_v18 = vld [vmem:[%s14309_s3 + $0xe4] ss:$36 sps:$4 sm:$0xff] (!%p366_p9)  }
  0x16   : > { %v9795_v15 = vld [vmem:[%s14309_s3 + $0x90] ss:$36 sps:$4 sm:$0xff] (!%p366_p9)   ;;  %v9801_v19 = vld [vmem:[%s14309_s3 + $0xd8] ss:$36 sps:$4 sm:$0xff] (!%p366_p9)   ;;  %v9802_v20 = vld [vmem:[%s14309_s3 + $0xe0] ss:$36 sps:$4 sm:$0xff] (!%p366_p9)  }
  0x17   : > { %1828 = vmatpush1.bf16.msra.mxu0 (!%p366_p9), %v9789_v11  ;;  %1910 = vmatpush1.bf16.msra.mxu1 (!%p366_p9), %v9790_v12  ;;  %v9803_v21 = vld [vmem:[%s14309_s3 + $0x124] ss:$36 sps:$4 sm:$0xff] (!%p366_p9)   ;;  %v9805_v22 = vld [vmem:[%s14309_s3 + $0x12c] ss:$36 sps:$4 sm:$0xff] (!%p366_p9)   ;;  %v9811_v26 = vld [vmem:[%s14309_s3 + $0x174] ss:$36 sps:$4 sm:$0xff] (!%p366_p9)  }
  0x18   : > { %1829 = vmatprep.subr.bf16.mxu0 (!%p366_p9), %v9791_v13  ;;  %1911 = vmatprep.subr.bf16.mxu1 (!%p366_p9), %v9793_v14  ;;  %v9807_v23 = vld [vmem:[%s14309_s3 + $0x120] ss:$36 sps:$4 sm:$0xff] (!%p366_p9)   ;;  %v9808_v24 = vld [vmem:[%s14309_s3 + $0x128] ss:$36 sps:$4 sm:$0xff] (!%p366_p9)   ;;  %v9814_v28 = vld [vmem:[%s14309_s3 + $0x170] ss:$36 sps:$4 sm:$0xff] (!%p366_p9)  }
  0x19   : > { %s408_s15 = scalar_select %p407_p10, %s11189_s25, 1  ;;  %v9809_v25 = vld [vmem:[%s14309_s3 + $0x16c] ss:$36 sps:$4 sm:$0xff]   ;;  %v9815_v29 = vld [vmem:[%s14309_s3 + $0x1b4] ss:$36 sps:$4 sm:$0xff]   ;;  %vm2241_vm1 = vcmask 523264  }
  0x1a   : > { %v9813_v27 = vld [vmem:[%s14309_s3 + $0x168] ss:$36 sps:$4 sm:$0xff]   ;;  %v9817_v30 = vld [vmem:[%s14309_s3 + $0x1bc] ss:$36 sps:$4 sm:$0xff]   ;;  %v9819_v31 = vld [vmem:[%s14309_s3 + $0x1b0] ss:$36 sps:$4 sm:$0xff]  }
  0x1b   : > { %s9729_s16 = smul.u32 24, %s408_s15  ;;  %1830 = vmatpush1.bf16.msra.mxu0 %v9795_v15  ;;  %1912 = vmatpush1.bf16.msra.mxu1 %v9796_v16  ;;  %v9820_v32 = vld [vmem:[%s14309_s3 + $0x1b8] ss:$36 sps:$4 sm:$0xff]   ;;  %v9823_v34 = vld [vmem:[%s14309_s3 + $0x204] ss:$36 sps:$4 sm:$0xff]   ;;  %vm2305_vm2 = vcmask 1043456  }
  0x1c   : > { %1831 = vmatprep.subr.bf16.mxu0 %v9797_v17  ;;  %1913 = vmatprep.subr.bf16.mxu1 %v9799_v18  ;;  %v9821_v33 = vld [vmem:[%s14309_s3 + $0x1fc] ss:$36 sps:$4 sm:$0xff]   ;;  %v9827_v37 = vld [vmem:[%s14309_s3 + $0x244] ss:$36 sps:$4 sm:$0xff]   ;;  %v9829_v38 = vld [vmem:[%s14309_s3 + $0x24c] ss:$36 sps:$4 sm:$0xff]  }
  0x1d   : > { %s11221_s19 = scalar_lea.vmem %s14328_s0, %s9729_s16  ;;  %v9825_v35 = vld [vmem:[%s14309_s3 + $0x1f8] ss:$36 sps:$4 sm:$0xff]   ;;  %v9826_v36 = vld [vmem:[%s14309_s3 + $0x200] ss:$36 sps:$4 sm:$0xff]   ;;  %v9832_v40 = vld [vmem:[%s14309_s3 + $0x248] ss:$36 sps:$4 sm:$0xff]  }
  0x1e   : > { %v11224_v0 = vld [vmem:[%s11221_s19] sm:$0xff]  ;;  %v11227_v1 = vld [vmem:[%s11221_s19 + $0x8] sm:$0xff]  ;;  %v11230_v2 = vld [vmem:[%s11221_s19 + $0x10] sm:$0xff]  ;;  %s11101_s0 = smov 64   ;;  %vm2289_vm4 = vcmask 64512   ;;  %s404_s15 = sand.u32 1, %s11088_s22  }
  0x1f   : > { %v418_v3 = vadd.f32 %v11227_v1, %v11224_v0  ;;  %1832 = vmatpush1.bf16.msra.mxu0 %v9801_v19  ;;  %1914 = vmatpush1.bf16.msra.mxu1 %v9802_v20  ;;  %v9831_v39 = vld [vmem:[%s14309_s3 + $0x240] ss:$36 sps:$4 sm:$0xff]   ;;  %v9833_v41 = vld [vmem:[%s14309_s3 + $0x28c] ss:$36 sps:$4 sm:$0xff]   ;;  %v9835_v42 = vld [vmem:[%s14309_s3 + $0x294] ss:$36 sps:$4 sm:$0xff]   ;;  %v441_v19 = vlaneseq }
  0x20   : > { %1833 = vmatprep.subr.bf16.mxu0 %v9803_v21  ;;  %1915 = vmatprep.subr.bf16.mxu1 %v9805_v22  ;;  %v9837_v43 = vld [vmem:[%s14309_s3 + $0x288] ss:$36 sps:$4 sm:$0xff]   ;;  %v9838_v44 = vld [vmem:[%s14309_s3 + $0x290] ss:$36 sps:$4 sm:$0xff]   ;;  %v9841_v46 = vld [vmem:[%s14309_s3 + $0x2dc] ss:$36 sps:$4 sm:$0xff]  }
  0x21   : > { %v419_v4 = vadd.f32 %v418_v3, %v11230_v2  ;;  %v9839_v45 = vld [vmem:[%s14309_s3 + $0x2d4] ss:$36 sps:$4 sm:$0xff]   ;;  %v9845_v59 = vld [vmem:[%s14309_s3 + $0x31c] ss:$36 sps:$4 sm:$0xff]   ;;  %v9847_v60 = vld [vmem:[%s14309_s3 + $0x324] ss:$36 sps:$4 sm:$0xff]  }
  0x22   : > { %v9843_v57 = vld [vmem:[%s14309_s3 + $0x2d0] ss:$36 sps:$4 sm:$0xff]   ;;  %v9844_v58 = vld [vmem:[%s14309_s3 + $0x2d8] ss:$36 sps:$4 sm:$0xff]   ;;  %v9850_v62 = vld [vmem:[%s14309_s3 + $0x320] ss:$36 sps:$4 sm:$0xff]  }
  0x23   : > { %420 = vadd.xlane.f32.xlu0 %v419_v4  ;;  %1834 = vmatpush1.bf16.msra.mxu0 %v9807_v23  ;;  %v9849_v61 = vld [vmem:[%s14309_s3 + $0x318] ss:$36 sps:$4 sm:$0xff]   ;;  %v9851_v63 = vld [vmem:[%s14309_s3 + $0x364] ss:$36 sps:$4 sm:$0xff]   ;;  %v9857_v3 = vld [vmem:[%s14309_s3 + $0x3ac] ss:$36 sps:$4 sm:$0xff]  }
  0x24   : > { %1916 = vmatpush1.bf16.msra.mxu1 %v9808_v24  ;;  %1835 = vmatprep.subr.bf16.mxu0 %v9809_v25  ;;  %v9859_v4 = vld [vmem:[%s14309_s3 + $0x3b4] ss:$36 sps:$4 sm:$0xff]   ;;  %v9861_v5 = vld [vmem:[%s14309_s3 + $0x3a8] ss:$36 sps:$4 sm:$0xff]   ;;  %v9865_v8 = vld [vmem:[%s14309_s3 + $0x3fc] ss:$36 sps:$4 sm:$0xff]  }
  0x25   : > { %1917 = vmatprep.subr.bf16.mxu1 %v9811_v26  ;;  %v9862_v6 = vld [vmem:[%s14309_s3 + $0x3b0] ss:$36 sps:$4 sm:$0xff]   ;;  %v9868_v10 = vld [vmem:[%s14309_s3 + $0x3f8] ss:$36 sps:$4 sm:$0xff]   ;;  %v9871_v12 = vld [vmem:[%s14309_s3 + $0x444] ss:$36 sps:$4 sm:$0xff]  }
  0x26   : > { %v9863_v7 = vld [vmem:[%s14309_s3 + $0x3f4] ss:$36 sps:$4 sm:$0xff]   ;;  %v9869_v11 = vld [vmem:[%s14309_s3 + $0x43c] ss:$36 sps:$4 sm:$0xff]   ;;  %v9877_v15 = vld [vmem:[%s14309_s3 + $0x484] ss:$36 sps:$4 sm:$0xff]  }
  0x27   : > { %1836 = vmatpush1.bf16.msra.mxu0 %v9813_v27  ;;  %v9867_v9 = vld [vmem:[%s14309_s3 + $0x3f0] ss:$36 sps:$4 sm:$0xff]   ;;  %v9873_v13 = vld [vmem:[%s14309_s3 + $0x438] ss:$36 sps:$4 sm:$0xff]   ;;  %v9874_v14 = vld [vmem:[%s14309_s3 + $0x440] ss:$36 sps:$4 sm:$0xff]  }
  0x28   : > { %1918 = vmatpush1.bf16.msra.mxu1 %v9814_v28  ;;  %1837 = vmatprep.subr.bf16.mxu0 %v9815_v29  ;;  %v9880_v16 = vld [vmem:[%s14309_s3 + $0x48c] ss:$36 sps:$4 sm:$0xff]   ;;  %v11449_v21 = vshrl.u32 %v441_v19, 7  ;;  %v11460_v24 = vld [vmem:[%s14307_s1] sm:$0x7]  ;;  %s9730_s17 = smul.u32 384, %s11189_s25 }
  0x29   : > { %1919 = vmatprep.subr.bf16.mxu1 %v9817_v30  ;;  %v11465_v25 = vld [vmem:[%s14308_s2] sm:$0x7]  ;;  %s8389_s29 = scalar_lea.sflag [#allocation3], %s404_s15  ;;  %s11102_s25 = smov [#allocation2]  }
  0x2a   : > { %v11452_v22 = vsub.s32 1, %v11449_v21  ;;  %v11455_v23 = vsub.s32 0, %v11449_v21  ;;  %s14261_s28 = scalar_lea.hbm %s14318_s12, %s9730_s17  ;;  %s11038_s23 = sshll.u32 %s11102_s25, 4  ;;  %s11039_s23 = int_to_ptr.vmem [resolvable:$false] %s11038_s23 }
  0x2b   : > { %1838 = vmatpush1.bf16.msra.mxu0 %v9819_v31  ;;  %s11040_s27 = scalar_lea.vmem %s11039_s23, 768 }
  0x2c   : > { %1920 = vmatpush1.bf16.msra.mxu1 %v9820_v32  ;;  %1839 = vmatprep.subr.bf16.mxu0 %v9821_v33  ;;  %v448_v26 = vrot.slane %v11460_v24, %v11452_v22  ;;  %v444_v27 = vrot.slane %v11460_v24, %v11455_v23  ;;  %v467_v30 = vrot.slane %v11465_v25, %v11452_v22 }
  0x2d   : > { %1921 = vmatprep.subr.bf16.mxu1 %v9823_v34  ;;  %v463_v32 = vrot.slane %v11465_v25, %v11455_v23 }
  0x2f   : > { %1840 = vmatpush1.bf16.msra.mxu0 %v9825_v35 }
  0x30   : > { %1922 = vmatpush1.bf16.msra.mxu1 %v9826_v36  ;;  %1841 = vmatprep.subr.bf16.mxu0 %v9827_v37  ;;  %v9875_v36 = vld [vmem:[%s14309_s3 + $0x480] ss:$36 sps:$4 sm:$0xff]   ;;  %v9878_v37 = vld [vmem:[%s14309_s3 + $0x488] ss:$36 sps:$4 sm:$0xff]  }
  0x31   : > { %1923 = vmatprep.subr.bf16.mxu1 %v9829_v38 }
  0x33   : > { %1842 = vmatpush1.bf16.msra.mxu0 %v9831_v39  ;;  %v9883_v39 = vld [vmem:[%s14309_s3 + $0x4cc] ss:$36 sps:$4 sm:$0xff]  }
  0x34   : > { %1924 = vmatpush1.bf16.msra.mxu1 %v9832_v40  ;;  %1843 = vmatprep.subr.bf16.mxu0 %v9833_v41  ;;  %v9886_v40 = vld [vmem:[%s14309_s3 + $0x4d4] ss:$36 sps:$4 sm:$0xff]  }
  0x35   : > { %1925 = vmatprep.subr.bf16.mxu1 %v9835_v42 }
  0x37   : > { %1844 = vmatpush1.bf16.msra.mxu0 %v9837_v43  ;;  %v9881_v43 = vld [vmem:[%s14309_s3 + $0x4c8] ss:$36 sps:$4 sm:$0xff]  }
  0x38   : > { %1926 = vmatpush1.bf16.msra.mxu1 %v9838_v44  ;;  %1845 = vmatprep.subr.bf16.mxu0 %v9839_v45  ;;  %v9884_v44 = vld [vmem:[%s14309_s3 + $0x4d0] ss:$36 sps:$4 sm:$0xff]  }
  0x39   : > { %1927 = vmatprep.subr.bf16.mxu1 %v9841_v46  ;;  %v9889_v45 = vld [vmem:[%s14309_s3 + $0x514] ss:$36 sps:$4 sm:$0xff]   ;;  %v9892_v46 = vld [vmem:[%s14309_s3 + $0x51c] ss:$36 sps:$4 sm:$0xff]  }
  0x3b   : > { %1846 = vmatpush1.bf16.msra.mxu0 %v9843_v57  ;;  %v9899_v57 = vld [vmem:[%s14309_s3 + $0x5a0] ss:$36 sps:$4 sm:$0xff]  }
  0x3c   : > { %1928 = vmatpush1.bf16.msra.mxu1 %v9844_v58  ;;  %1847 = vmatprep.subr.bf16.mxu0 %v9845_v59  ;;  %v9902_v58 = vld [vmem:[%s14309_s3 + $0x5a8] ss:$36 sps:$4 sm:$0xff]   ;;  %v11546_v59 = vsub.s32 2, %v11449_v21 }
  0x3d   : > { %1929 = vmatprep.subr.bf16.mxu1 %v9847_v60  ;;  %v9907_v60 = vld [vmem:[%s14309_s3 + $0x5ec] ss:$36 sps:$4 sm:$0xff]  }
  0x3f   : > { %1848 = vmatpush1.bf16.msra.mxu0 %v9849_v61  ;;  %v9910_v61 = vld [vmem:[%s14309_s3 + $0x5f4] ss:$36 sps:$4 sm:$0xff]  }
  0x40   : > { %1930 = vmatpush1.bf16.msra.mxu1 %v9850_v62  ;;  %1849 = vmatprep.subr.bf16.mxu0 %v9851_v63  ;;  %v9905_v62 = vld [vmem:[%s14309_s3 + $0x5e8] ss:$36 sps:$4 sm:$0xff]   ;;  %v9908_v63 = vld [vmem:[%s14309_s3 + $0x5f0] ss:$36 sps:$4 sm:$0xff]  }
  0xb0   : > { %v421_v47 = vpop.xlane.xlu0 %420 }
  0xb1   : > { %v423_v48 = vmul.f32 0.0026041667, %v421_v47  ;;  %v9887_v47 = vld [vmem:[%s14309_s3 + $0x510] ss:$36 sps:$4 sm:$0xff]  }
  0xb3   : > { %v11362_v49 = vsub.f32 %v11224_v0, %v423_v48  ;;  %v11365_v50 = vsub.f32 %v11227_v1, %v423_v48  ;;  %v11368_v51 = vsub.f32 %v11230_v2, %v423_v48  ;;  %v9853_v0 = vld [vmem:[%s14309_s3 + $0x36c] ss:$36 sps:$4 sm:$0xff]   ;;  %v9855_v1 = vld [vmem:[%s14309_s3 + $0x360] ss:$36 sps:$4 sm:$0xff]   ;;  %v9890_v48 = vld [vmem:[%s14309_s3 + $0x518] ss:$36 sps:$4 sm:$0xff]  }
  0xb4   : > { %v9856_v2 = vld [vmem:[%s14309_s3 + $0x368] ss:$36 sps:$4 sm:$0xff]   ;;  %1931 = vmatprep.subr.bf16.mxu1 %v9853_v0  ;;  %1850 = vmatpush1.bf16.msra.mxu0 %v9855_v1  ;;  %v9913_v0 = vld [vmem:[%s14309_s3 + $0x634] ss:$36 sps:$4 sm:$0xff]   ;;  %v9916_v1 = vld [vmem:[%s14309_s3 + $0x63c] ss:$36 sps:$4 sm:$0xff]  }
  0xb5   : > { %v427_v52 = vmul.f32 %v11362_v49, %v11362_v49  ;;  %v428_v53 = vmul.f32 %v11365_v50, %v11365_v50  ;;  %v429_v54 = vmul.f32 %v11368_v51, %v11368_v51  ;;  %1932 = vmatpush1.bf16.msra.mxu1 %v9856_v2  ;;  %1851 = vmatprep.subr.bf16.mxu0 %v9857_v3 }
  0xb6   : > { %1933 = vmatprep.subr.bf16.mxu1 %v9859_v4  ;;  %v452_v3 = vrot.slane %v11460_v24, %v11546_v59  ;;  %v9911_v4 = vld [vmem:[%s14309_s3 + $0x630] ss:$36 sps:$4 sm:$0xff]   ;;  %v9932_v24 = vld [vmem:[%s14309_s3 + $0x60] ss:$36 sps:$4 sm:$0xff]  }
  0xb7   : > { %v430_v55 = vadd.f32 %v428_v53, %v427_v52  ;;  %v9898_v52 = vld [vmem:[%s14309_s3 + $0x564] ss:$36 sps:$4 sm:$0xff]   ;;  %v9893_v53 = vld [vmem:[%s14309_s3 + $0x558] ss:$36 sps:$4 sm:$0xff]  }
  0xb8   : > { %1852 = vmatpush1.bf16.msra.mxu0 %v9861_v5  ;;  %v9914_v5 = vld [vmem:[%s14309_s3 + $0x638] ss:$36 sps:$4 sm:$0xff]  }
  0xb9   : > { %v431_v56 = vadd.f32 %v430_v55, %v429_v54  ;;  %1934 = vmatpush1.bf16.msra.mxu1 %v9862_v6  ;;  %1853 = vmatprep.subr.bf16.mxu0 %v9863_v7  ;;  %v9896_v54 = vld [vmem:[%s14309_s3 + $0x560] ss:$36 sps:$4 sm:$0xff]  }
  0xba   : > { %1935 = vmatprep.subr.bf16.mxu1 %v9865_v8  ;;  %v9901_v55 = vld [vmem:[%s14309_s3 + $0x5a4] ss:$36 sps:$4 sm:$0xff]   ;;  %v9919_v6 = vld [vmem:[%s14309_s3 + $0x67c] ss:$36 sps:$4 sm:$0xff]   ;;  %v471_v8 = vrot.slane %v11465_v25, %v11546_v59 }
  0xbb   : > { %432 = vadd.xlane.f32.xlu0 %v431_v56  ;;  %v9904_v56 = vld [vmem:[%s14309_s3 + $0x5ac] ss:$36 sps:$4 sm:$0xff]   ;;  %v9937_v25 = vld [vmem:[%s14309_s3 + $0xa4] ss:$36 sps:$4 sm:$0xff]  }
  0xbc   : > { %1854 = vmatpush1.bf16.msra.mxu0 %v9867_v9  ;;  %v9917_v9 = vld [vmem:[%s14309_s3 + $0x678] ss:$36 sps:$4 sm:$0xff]  }
  0xbd   : > { %1936 = vmatpush1.bf16.msra.mxu1 %v9868_v10  ;;  %1855 = vmatprep.subr.bf16.mxu0 %v9869_v11  ;;  %v9920_v10 = vld [vmem:[%s14309_s3 + $0x680] ss:$36 sps:$4 sm:$0xff]   ;;  %v9925_v11 = vld [vmem:[%s14309_s3 + $0x14] ss:$36 sps:$4 sm:$0xff]  }
  0xbe   : > { %1937 = vmatprep.subr.bf16.mxu1 %v9871_v12 }
  0xc0   : > { %1856 = vmatpush1.bf16.msra.mxu0 %v9873_v13  ;;  %v9928_v13 = vld [vmem:[%s14309_s3 + $0x1c] ss:$36 sps:$4 sm:$0xff]  }
  0xc1   : > { %1938 = vmatpush1.bf16.msra.mxu1 %v9874_v14  ;;  %1866 = vmatprep.subr.bf16.mxu0 %v9877_v15  ;;  %v9923_v14 = vld [vmem:[%s14309_s3 + $0x10] ss:$36 sps:$4 sm:$0xff]   ;;  %v9926_v15 = vld [vmem:[%s14309_s3 + $0x18] ss:$36 sps:$4 sm:$0xff]  }
  0xc2   : > { %1948 = vmatprep.subr.bf16.mxu1 %v9880_v16  ;;  %v9931_v16 = vld [vmem:[%s14309_s3 + $0x5c] ss:$36 sps:$4 sm:$0xff]  }
 0x148   : > { %v433_v17 = vpop.xlane.xlu0 %432 }
 0x149   : > { %v434_v18 = vmul.f32 0.0026041667, %v433_v17 }
 0x14b   : > { %v435_v20 = vadd.f32 1e-05, %v434_v18  ;;  %v9934_v18 = vld [vmem:[%s14309_s3 + $0x64] ss:$36 sps:$4 sm:$0xff]  }
 0x14d   : > { %11003 = vrsqrt.f32 %v435_v20  ;;  %v9929_v20 = vld [vmem:[%s14309_s3 + $0x58] ss:$36 sps:$4 sm:$0xff]  }
 0x157   : > { %v11471_v28 = vpop.eup %11003 }
 0x158   : > { %v438_v29 = vmul.f32 %v11471_v28, %v11365_v50  ;;  %v437_v31 = vmul.f32 %v11471_v28, %v11362_v49  ;;  %v11098_v49 = vmov 0   ;;  %v9895_v50 = vld [vmem:[%s14309_s3 + $0x55c] ss:$36 sps:$4 sm:$0xff]   ;;  %v439_v2 = vmul.f32 %v11471_v28, %v11368_v51  ;;  %v9922_v51 = vld [vmem:[%s14309_s3 + $0x684] ss:$36 sps:$4 sm:$0xff]  }
 0x159   : > { %v9938_v28 = vld [vmem:[%s14309_s3 + $0xa8] ss:$36 sps:$4 sm:$0xff]  }
 0x15a   : > { %v457_v33 = vmul.f32 %v448_v26, %v438_v29  ;;  %v456_v34 = vmul.f32 %v444_v27, %v437_v31  ;;  %v458_v7 = vmul.f32 %v452_v3, %v439_v2  ;;  %v9940_v26 = vld [vmem:[%s14309_s3 + $0xac] ss:$36 sps:$4 sm:$0xff]   ;;  %v9935_v27 = vld [vmem:[%s14309_s3 + $0xa0] ss:$36 sps:$4 sm:$0xff]   ;;  %v9994_v3 = vld [vmem:[%s14309_s3 + $0x334] ss:$36 sps:$4 sm:$0xff]  }
 0x15b   : > { %v9943_v29 = vld [vmem:[%s14309_s3 + $0xec] ss:$36 sps:$4 sm:$0xff]  }
 0x15c   : > { %v476_v35 = vadd.f32 %v467_v30, %v457_v33  ;;  %v475_v38 = vadd.f32 %v463_v32, %v456_v34  ;;  %v477_v12 = vadd.f32 %v471_v8, %v458_v7  ;;  %v9946_v30 = vld [vmem:[%s14309_s3 + $0xf4] ss:$36 sps:$4 sm:$0xff]   ;;  %v9941_v31 = vld [vmem:[%s14309_s3 + $0xe8] ss:$36 sps:$4 sm:$0xff]   ;;  %v9952_v34 = vld [vmem:[%s14309_s3 + $0x13c] ss:$36 sps:$4 sm:$0xff]  }
 0x15d   : > { %v9944_v32 = vld [vmem:[%s14309_s3 + $0xf0] ss:$36 sps:$4 sm:$0xff]   ;;  %v9998_v8 = vld [vmem:[%s14309_s3 + $0x378] ss:$36 sps:$4 sm:$0xff]  }
 0x15e   : > { %v11493_v41 = vpack.c.bf16 %v476_v35, %v476_v35  ;;  %v11495_v42 = vpack.c.bf16 %v475_v38, %v475_v38  ;;  %v11605_v17 = vpack.c.bf16 %v477_v12, %v477_v12  ;;  %v9949_v33 = vld [vmem:[%s14309_s3 + $0x134] ss:$36 sps:$4 sm:$0xff]   ;;  %v9958_v38 = vld [vmem:[%s14309_s3 + $0x184] ss:$36 sps:$4 sm:$0xff]   ;;  %v9991_v2 = vld [vmem:[%s14309_s3 + $0x32c] ss:$36 sps:$4 sm:$0xff]  }
 0x15f   : > { %v9947_v35 = vld [vmem:[%s14309_s3 + $0x130] ss:$36 sps:$4 sm:$0xff]   ;;  %v10004_v12 = vld [vmem:[%s14309_s3 + $0x3c0] ss:$36 sps:$4 sm:$0xff]  }
 0x160   : > { %1857 = vmatprep.mubr.bf16.mxu0 %v11493_v41  ;;  %1939 = vmatprep.mubr.bf16.mxu1 %v11493_v41  ;;  %v9995_v7 = vld [vmem:[%s14309_s3 + $0x370] ss:$36 sps:$4 sm:$0xff]  }
 0x161   : > { %1858 = vmatmul.mubr.bf16.vlgmr.msra.gmra.mrb[0].mxu0 %v11495_v42  ;;  %1940 = vmatmul.mubr.bf16.vlgmr.msra.gmra.mrb[0].mxu1 %v11495_v42 }
 0x162   : > { %1867 = vmatpush1.bf16.msra.mxu0 %v9875_v36  ;;  %1949 = vmatpush1.bf16.msra.mxu1 %v9878_v37  ;;  %v9950_v36 = vld [vmem:[%s14309_s3 + $0x138] ss:$36 sps:$4 sm:$0xff]  }
 0x163   : > { %1868 = vmatprep.subr.bf16.mxu0 %v9883_v39  ;;  %1950 = vmatprep.subr.bf16.mxu1 %v9886_v40  ;;  %v9955_v37 = vld [vmem:[%s14309_s3 + $0x17c] ss:$36 sps:$4 sm:$0xff]  }
 0x164   : > { %1898 = vmatprep.mubr.bf16.mxu0 %v11098_v49  ;;  %1980 = vmatprep.mubr.bf16.mxu1 %v11098_v49  ;;  %v9953_v39 = vld [vmem:[%s14309_s3 + $0x178] ss:$36 sps:$4 sm:$0xff]   ;;  %v9956_v40 = vld [vmem:[%s14309_s3 + $0x180] ss:$36 sps:$4 sm:$0xff]  }
 0x166   : > { %1869 = vmatpush1.bf16.msra.mxu0 %v9881_v43  ;;  %1951 = vmatpush1.bf16.msra.mxu1 %v9884_v44  ;;  %v9961_v43 = vld [vmem:[%s14309_s3 + $0x1c4] ss:$36 sps:$4 sm:$0xff]   ;;  %v9964_v44 = vld [vmem:[%s14309_s3 + $0x1cc] ss:$36 sps:$4 sm:$0xff]  }
 0x167   : > { %1870 = vmatprep.subr.bf16.mxu0 %v9889_v45  ;;  %1952 = vmatprep.subr.bf16.mxu1 %v9892_v46  ;;  %v9959_v45 = vld [vmem:[%s14309_s3 + $0x1c0] ss:$36 sps:$4 sm:$0xff]   ;;  %v9962_v46 = vld [vmem:[%s14309_s3 + $0x1c8] ss:$36 sps:$4 sm:$0xff]  }
 0x16a   : > { %1871 = vmatpush1.bf16.msra.mxu0 %v9887_v47  ;;  %1953 = vmatpush1.bf16.msra.mxu1 %v9890_v48  ;;  %v9967_v47 = vld [vmem:[%s14309_s3 + $0x20c] ss:$36 sps:$4 sm:$0xff]   ;;  %v9970_v48 = vld [vmem:[%s14309_s3 + $0x214] ss:$36 sps:$4 sm:$0xff]  }
 0x16b   : > { %1872 = vmatprep.subr.bf16.mxu0 %v9895_v50  ;;  %1954 = vmatprep.subr.bf16.mxu1 %v9898_v52  ;;  %v9965_v50 = vld [vmem:[%s14309_s3 + $0x208] ss:$36 sps:$4 sm:$0xff]   ;;  %v9968_v52 = vld [vmem:[%s14309_s3 + $0x210] ss:$36 sps:$4 sm:$0xff]  }
 0x16e   : > { %1873 = vmatpush1.bf16.msra.mxu0 %v9893_v53  ;;  %1955 = vmatpush1.bf16.msra.mxu1 %v9896_v54  ;;  %v9973_v53 = vld [vmem:[%s14309_s3 + $0x254] ss:$36 sps:$4 sm:$0xff]   ;;  %v9976_v54 = vld [vmem:[%s14309_s3 + $0x25c] ss:$36 sps:$4 sm:$0xff]  }
 0x16f   : > { %1874 = vmatprep.subr.bf16.mxu0 %v9901_v55  ;;  %1956 = vmatprep.subr.bf16.mxu1 %v9904_v56  ;;  %v9971_v55 = vld [vmem:[%s14309_s3 + $0x250] ss:$36 sps:$4 sm:$0xff]   ;;  %v9974_v56 = vld [vmem:[%s14309_s3 + $0x258] ss:$36 sps:$4 sm:$0xff]  }
 0x172   : > { %1875 = vmatpush1.bf16.msra.mxu0 %v9899_v57  ;;  %1957 = vmatpush1.bf16.msra.mxu1 %v9902_v58  ;;  %v9979_v57 = vld [vmem:[%s14309_s3 + $0x29c] ss:$36 sps:$4 sm:$0xff]   ;;  %v9982_v58 = vld [vmem:[%s14309_s3 + $0x2a4] ss:$36 sps:$4 sm:$0xff]  }
 0x173   : > { %1876 = vmatprep.subr.bf16.mxu0 %v9907_v60  ;;  %1958 = vmatprep.subr.bf16.mxu1 %v9910_v61  ;;  %v9977_v60 = vld [vmem:[%s14309_s3 + $0x298] ss:$36 sps:$4 sm:$0xff]   ;;  %v9980_v61 = vld [vmem:[%s14309_s3 + $0x2a0] ss:$36 sps:$4 sm:$0xff]  }
 0x176   : > { %1877 = vmatpush1.bf16.msra.mxu0 %v9905_v62  ;;  %1959 = vmatpush1.bf16.msra.mxu1 %v9908_v63  ;;  %v9985_v62 = vld [vmem:[%s14309_s3 + $0x2e4] ss:$36 sps:$4 sm:$0xff]   ;;  %v9988_v63 = vld [vmem:[%s14309_s3 + $0x2ec] ss:$36 sps:$4 sm:$0xff]  }
 0x177   : > { %1878 = vmatprep.subr.bf16.mxu0 %v9913_v0  ;;  %1960 = vmatprep.subr.bf16.mxu1 %v9916_v1  ;;  %v9983_v0 = vld [vmem:[%s14309_s3 + $0x2e0] ss:$36 sps:$4 sm:$0xff]   ;;  %v9986_v1 = vld [vmem:[%s14309_s3 + $0x2e8] ss:$36 sps:$4 sm:$0xff]  }
 0x17a   : > { %1879 = vmatpush1.bf16.msra.mxu0 %v9911_v4  ;;  %1961 = vmatpush1.bf16.msra.mxu1 %v9914_v5  ;;  %v9989_v4 = vld [vmem:[%s14309_s3 + $0x328] ss:$36 sps:$4 sm:$0xff]   ;;  %v9992_v5 = vld [vmem:[%s14309_s3 + $0x330] ss:$36 sps:$4 sm:$0xff]  }
 0x17b   : > { %1880 = vmatprep.subr.bf16.mxu0 %v9919_v6  ;;  %1962 = vmatprep.subr.bf16.mxu1 %v9922_v51  ;;  %v9997_v6 = vld [vmem:[%s14309_s3 + $0x374] ss:$36 sps:$4 sm:$0xff]   ;;  %v10000_v51 = vld [vmem:[%s14309_s3 + $0x37c] ss:$36 sps:$4 sm:$0xff]  }
 0x17e   : > { %1881 = vmatpush1.bf16.msra.mxu0 %v9917_v9  ;;  %1963 = vmatpush1.bf16.msra.mxu1 %v9920_v10  ;;  %v10003_v9 = vld [vmem:[%s14309_s3 + $0x3bc] ss:$36 sps:$4 sm:$0xff]   ;;  %v10006_v10 = vld [vmem:[%s14309_s3 + $0x3c4] ss:$36 sps:$4 sm:$0xff]  }
 0x17f   : > { %1989 = vmatprep.subr.bf16.mxu0 %v9925_v11  ;;  %2071 = vmatprep.subr.bf16.mxu1 %v9928_v13  ;;  %v10001_v11 = vld [vmem:[%s14309_s3 + $0x3b8] ss:$36 sps:$4 sm:$0xff]   ;;  %v10009_v13 = vld [vmem:[%s14309_s3 + $0x404] ss:$36 sps:$4 sm:$0xff]  }
 0x181   : > { %1899 = vmatmul.mubr.bf16.vlgmr.msra.gmra.mrb[0].mxu0 %v11605_v17  ;;  %1981 = vmatmul.mubr.bf16.vlgmr.msra.gmra.mrb[0].mxu1 %v11605_v17 }
 0x182   : > { %1990 = vmatpush1.bf16.msra.mxu0 %v9923_v14  ;;  %2021 = vmatprep.mubr.bf16.mxu0 %v11493_v41  ;;  %v10012_v14 = vld [vmem:[%s14309_s3 + $0x40c] ss:$36 sps:$4 sm:$0xff]  }
 0x183   : > { %2072 = vmatpush1.bf16.msra.mxu1 %v9926_v15  ;;  %2103 = vmatprep.mubr.bf16.mxu1 %v11493_v41  ;;  %v10007_v15 = vld [vmem:[%s14309_s3 + $0x400] ss:$36 sps:$4 sm:$0xff]  }
 0x184   : > { %1991 = vmatprep.subr.bf16.mxu0 %v9931_v16  ;;  %2073 = vmatprep.subr.bf16.mxu1 %v9934_v18  ;;  %v10010_v16 = vld [vmem:[%s14309_s3 + $0x408] ss:$36 sps:$4 sm:$0xff]  }
 0x185   : > { %v10015_v18 = vld [vmem:[%s14309_s3 + $0x44c] ss:$36 sps:$4 sm:$0xff]  }
 0x186   : > { %1992 = vmatpush1.bf16.msra.mxu0 %v9929_v20  ;;  %v10018_v20 = vld [vmem:[%s14309_s3 + $0x454] ss:$36 sps:$4 sm:$0xff]  }
 0x187   : > { %2074 = vmatpush1.bf16.msra.mxu1 %v9932_v24  ;;  %1993 = vmatprep.subr.bf16.mxu0 %v9937_v25  ;;  %v10013_v24 = vld [vmem:[%s14309_s3 + $0x448] ss:$36 sps:$4 sm:$0xff]   ;;  %v10016_v25 = vld [vmem:[%s14309_s3 + $0x450] ss:$36 sps:$4 sm:$0xff]  }
 0x188   : > { %2075 = vmatprep.subr.bf16.mxu1 %v9940_v26  ;;  %v10021_v26 = vld [vmem:[%s14309_s3 + $0x494] ss:$36 sps:$4 sm:$0xff]  }
 0x18a   : > { %1994 = vmatpush1.bf16.msra.mxu0 %v9935_v27  ;;  %v10024_v27 = vld [vmem:[%s14309_s3 + $0x49c] ss:$36 sps:$4 sm:$0xff]  }
 0x18b   : > { %2076 = vmatpush1.bf16.msra.mxu1 %v9938_v28  ;;  %1995 = vmatprep.subr.bf16.mxu0 %v9943_v29  ;;  %v10019_v28 = vld [vmem:[%s14309_s3 + $0x490] ss:$36 sps:$4 sm:$0xff]   ;;  %v10022_v29 = vld [vmem:[%s14309_s3 + $0x498] ss:$36 sps:$4 sm:$0xff]  }
 0x18c   : > { %2077 = vmatprep.subr.bf16.mxu1 %v9946_v30  ;;  %v10027_v30 = vld [vmem:[%s14309_s3 + $0x4dc] ss:$36 sps:$4 sm:$0xff]  }
 0x18e   : > { %1996 = vmatpush1.bf16.msra.mxu0 %v9941_v31  ;;  %v10030_v31 = vld [vmem:[%s14309_s3 + $0x4e4] ss:$36 sps:$4 sm:$0xff]  }
 0x18f   : > { %2078 = vmatpush1.bf16.msra.mxu1 %v9944_v32  ;;  %1997 = vmatprep.subr.bf16.mxu0 %v9949_v33  ;;  %v10025_v32 = vld [vmem:[%s14309_s3 + $0x4d8] ss:$36 sps:$4 sm:$0xff]   ;;  %v10028_v33 = vld [vmem:[%s14309_s3 + $0x4e0] ss:$36 sps:$4 sm:$0xff]  }
 0x190   : > { %2079 = vmatprep.subr.bf16.mxu1 %v9952_v34  ;;  %v10033_v34 = vld [vmem:[%s14309_s3 + $0x524] ss:$36 sps:$4 sm:$0xff]  }
 0x192   : > { %1998 = vmatpush1.bf16.msra.mxu0 %v9947_v35  ;;  %v10036_v35 = vld [vmem:[%s14309_s3 + $0x52c] ss:$36 sps:$4 sm:$0xff]  }
 0x193   : > { %2080 = vmatpush1.bf16.msra.mxu1 %v9950_v36  ;;  %1999 = vmatprep.subr.bf16.mxu0 %v9955_v37  ;;  %v10031_v36 = vld [vmem:[%s14309_s3 + $0x520] ss:$36 sps:$4 sm:$0xff]   ;;  %v10034_v37 = vld [vmem:[%s14309_s3 + $0x528] ss:$36 sps:$4 sm:$0xff]  }
 0x194   : > { %2081 = vmatprep.subr.bf16.mxu1 %v9958_v38  ;;  %v10039_v38 = vld [vmem:[%s14309_s3 + $0x56c] ss:$36 sps:$4 sm:$0xff]  }
 0x196   : > { %2000 = vmatpush1.bf16.msra.mxu0 %v9953_v39  ;;  %v10042_v39 = vld [vmem:[%s14309_s3 + $0x574] ss:$36 sps:$4 sm:$0xff]  }
 0x197   : > { %2082 = vmatpush1.bf16.msra.mxu1 %v9956_v40  ;;  %2001 = vmatprep.subr.bf16.mxu0 %v9961_v43  ;;  %v10037_v40 = vld [vmem:[%s14309_s3 + $0x568] ss:$36 sps:$4 sm:$0xff]   ;;  %v10040_v43 = vld [vmem:[%s14309_s3 + $0x570] ss:$36 sps:$4 sm:$0xff]  }
 0x198   : > { %2083 = vmatprep.subr.bf16.mxu1 %v9964_v44  ;;  %v10045_v44 = vld [vmem:[%s14309_s3 + $0x5b4] ss:$36 sps:$4 sm:$0xff]  }
 0x19a   : > { %2002 = vmatpush1.bf16.msra.mxu0 %v9959_v45  ;;  %v10048_v45 = vld [vmem:[%s14309_s3 + $0x5bc] ss:$36 sps:$4 sm:$0xff]  }
 0x19b   : > { %2084 = vmatpush1.bf16.msra.mxu1 %v9962_v46  ;;  %2003 = vmatprep.subr.bf16.mxu0 %v9967_v47  ;;  %v10043_v46 = vld [vmem:[%s14309_s3 + $0x5b0] ss:$36 sps:$4 sm:$0xff]   ;;  %v10046_v47 = vld [vmem:[%s14309_s3 + $0x5b8] ss:$36 sps:$4 sm:$0xff]  }
 0x19c   : > { %2085 = vmatprep.subr.bf16.mxu1 %v9970_v48  ;;  %v10051_v48 = vld [vmem:[%s14309_s3 + $0x5fc] ss:$36 sps:$4 sm:$0xff]  }
 0x19e   : > { %2004 = vmatpush1.bf16.msra.mxu0 %v9965_v50  ;;  %v10054_v50 = vld [vmem:[%s14309_s3 + $0x604] ss:$36 sps:$4 sm:$0xff]  }
 0x19f   : > { %2086 = vmatpush1.bf16.msra.mxu1 %v9968_v52  ;;  %2005 = vmatprep.subr.bf16.mxu0 %v9973_v53  ;;  %v10049_v52 = vld [vmem:[%s14309_s3 + $0x5f8] ss:$36 sps:$4 sm:$0xff]   ;;  %v10052_v53 = vld [vmem:[%s14309_s3 + $0x600] ss:$36 sps:$4 sm:$0xff]  }
 0x1a0   : > { %2087 = vmatprep.subr.bf16.mxu1 %v9976_v54  ;;  %v10057_v54 = vld [vmem:[%s14309_s3 + $0x644] ss:$36 sps:$4 sm:$0xff]  }
 0x1a2   : > { %2006 = vmatpush1.bf16.msra.mxu0 %v9971_v55  ;;  %v10060_v55 = vld [vmem:[%s14309_s3 + $0x64c] ss:$36 sps:$4 sm:$0xff]  }
 0x1a3   : > { %2088 = vmatpush1.bf16.msra.mxu1 %v9974_v56  ;;  %2007 = vmatprep.subr.bf16.mxu0 %v9979_v57  ;;  %v10055_v56 = vld [vmem:[%s14309_s3 + $0x640] ss:$36 sps:$4 sm:$0xff]   ;;  %v10058_v57 = vld [vmem:[%s14309_s3 + $0x648] ss:$36 sps:$4 sm:$0xff]  }
 0x1a4   : > { %2089 = vmatprep.subr.bf16.mxu1 %v9982_v58  ;;  %v10063_v58 = vld [vmem:[%s14309_s3 + $0x68c] ss:$36 sps:$4 sm:$0xff]  }
 0x1a6   : > { %2008 = vmatpush1.bf16.msra.mxu0 %v9977_v60  ;;  %v10066_v60 = vld [vmem:[%s14309_s3 + $0x694] ss:$36 sps:$4 sm:$0xff]  }
 0x1a7   : > { %2090 = vmatpush1.bf16.msra.mxu1 %v9980_v61  ;;  %2009 = vmatprep.subr.bf16.mxu0 %v9985_v62  ;;  %v10061_v61 = vld [vmem:[%s14309_s3 + $0x688] ss:$36 sps:$4 sm:$0xff]   ;;  %v10064_v62 = vld [vmem:[%s14309_s3 + $0x690] ss:$36 sps:$4 sm:$0xff]  }
 0x1a8   : > { %2091 = vmatprep.subr.bf16.mxu1 %v9988_v63  ;;  %v10067_v63 = vld [vmem:[%s14309_s3 + $0x260] ss:$36 sps:$4 sm:$0xff]  }
 0x1aa   : > { %2010 = vmatpush1.bf16.msra.mxu0 %v9983_v0  ;;  %v10068_v0 = vld [vmem:[%s14309_s3 + $0x20] ss:$36 sps:$4 sm:$0xff]  }
 0x1ab   : > { %2092 = vmatpush1.bf16.msra.mxu1 %v9986_v1  ;;  %2011 = vmatprep.subr.bf16.mxu0 %v9991_v2  ;;  %v10069_v1 = vld [vmem:[%s14309_s3 + $0x4a0] ss:$36 sps:$4 sm:$0xff]   ;;  %v11099_v2 = vmov 0.0  }
 0x1ac   : > { %2093 = vmatprep.subr.bf16.mxu1 %v9994_v3  ;;  %v10070_v3 = vld [vmem:[%s14309_s3 + $0x2a8] ss:$36 sps:$4 sm:$0xff]  }
 0x1ae   : > { %2012 = vmatpush1.bf16.msra.mxu0 %v9989_v4  ;;  %v10071_v4 = vld [vmem:[%s14309_s3 + $0x68] ss:$36 sps:$4 sm:$0xff]  }
 0x1af   : > { %2094 = vmatpush1.bf16.msra.mxu1 %v9992_v5  ;;  %2013 = vmatprep.subr.bf16.mxu0 %v9997_v6  ;;  %v10072_v5 = vld [vmem:[%s14309_s3 + $0x4e8] ss:$36 sps:$4 sm:$0xff]   ;;  %v10073_v6 = vld [vmem:[%s14309_s3 + $0x2f0] ss:$36 sps:$4 sm:$0xff]  }
 0x1b0   : > { %2095 = vmatprep.subr.bf16.mxu1 %v10000_v51  ;;  %v10075_v51 = vld [vmem:[%s14309_s3 + $0x530] ss:$36 sps:$4 sm:$0xff]  }
 0x1b2   : > { %2014 = vmatpush1.bf16.msra.mxu0 %v9995_v7  ;;  %v10076_v7 = vld [vmem:[%s14309_s3 + $0x338] ss:$36 sps:$4 sm:$0xff]  }
 0x1b3   : > { %2096 = vmatpush1.bf16.msra.mxu1 %v9998_v8  ;;  %2015 = vmatprep.subr.bf16.mxu0 %v10003_v9  ;;  %v10077_v8 = vld [vmem:[%s14309_s3 + $0xf8] ss:$36 sps:$4 sm:$0xff]  }
 0x1b4   : > { %2097 = vmatprep.subr.bf16.mxu1 %v10006_v10  ;;  %v10078_v9 = vld [vmem:[%s14309_s3 + $0x578] ss:$36 sps:$4 sm:$0xff]   ;;  %v10079_v10 = vld [vmem:[%s14309_s3 + $0x380] ss:$36 sps:$4 sm:$0xff]  }
 0x1b6   : > { %2016 = vmatpush1.bf16.msra.mxu0 %v10001_v11  ;;  %v10080_v11 = vld [vmem:[%s14309_s3 + $0x140] ss:$36 sps:$4 sm:$0xff]  }
 0x1b7   : > { %2098 = vmatpush1.bf16.msra.mxu1 %v10004_v12  ;;  %2017 = vmatprep.subr.bf16.mxu0 %v10009_v13  ;;  %v10081_v12 = vld [vmem:[%s14309_s3 + $0x5c0] ss:$36 sps:$4 sm:$0xff]   ;;  %v10082_v13 = vld [vmem:[%s14309_s3 + $0x3c8] ss:$36 sps:$4 sm:$0xff]  }
 0x1b8   : > { %2099 = vmatprep.subr.bf16.mxu1 %v10012_v14  ;;  %v10083_v14 = vld [vmem:[%s14309_s3 + $0x188] ss:$36 sps:$4 sm:$0xff]  }
 0x1ba   : > { %2018 = vmatpush1.bf16.msra.mxu0 %v10007_v15  ;;  %v10084_v15 = vld [vmem:[%s14309_s3 + $0x608] ss:$36 sps:$4 sm:$0xff]  }
 0x1bb   : > { %2100 = vmatpush1.bf16.msra.mxu1 %v10010_v16  ;;  %2019 = vmatprep.subr.bf16.mxu0 %v10015_v18  ;;  %v10085_v16 = vld [vmem:[%s14309_s3 + $0x410] ss:$36 sps:$4 sm:$0xff]  }
 0x1bc   : > { %2101 = vmatprep.subr.bf16.mxu1 %v10018_v20  ;;  %v10086_v18 = vld [vmem:[%s14309_s3 + $0x1d0] ss:$36 sps:$4 sm:$0xff]  }
 0x1bd   : > { %v10087_v20 = vld [vmem:[%s14309_s3 + $0x650] ss:$36 sps:$4 sm:$0xff]  }
 0x1be   : > { %2020 = vmatpush1.bf16.msra.mxu0 %v10013_v24  ;;  %v10088_v24 = vld [vmem:[%s14309_s3 + $0x458] ss:$36 sps:$4 sm:$0xff]  }
 0x1bf   : > { %2102 = vmatpush1.bf16.msra.mxu1 %v10016_v25  ;;  %2030 = vmatprep.subr.bf16.mxu0 %v10021_v26  ;;  %v10089_v25 = vld [vmem:[%s14309_s3 + $0x218] ss:$36 sps:$4 sm:$0xff]  }
 0x1c0   : > { %2112 = vmatprep.subr.bf16.mxu1 %v10024_v27  ;;  %v10090_v26 = vld [vmem:[%s14309_s3 + $0x698] ss:$36 sps:$4 sm:$0xff]  }
 0x1c1   : > { %2022 = vmatmul.mubr.bf16.vlgmr.msra.gmra.mrb[4].mxu0 %v11495_v42 }
 0x1c2   : > { %2104 = vmatmul.mubr.bf16.vlgmr.msra.gmra.mrb[4].mxu1 %v11495_v42  ;;  %2031 = vmatpush1.bf16.msra.mxu0 %v10019_v28 }
 0x1c3   : > { %2113 = vmatpush1.bf16.msra.mxu1 %v10022_v29  ;;  %2032 = vmatprep.subr.bf16.mxu0 %v10027_v30 }
 0x1c4   : > { %2114 = vmatprep.subr.bf16.mxu1 %v10030_v31  ;;  %2062 = vmatprep.mubr.bf16.mxu0 %v11098_v49 }
 0x1c5   : > { %2144 = vmatprep.mubr.bf16.mxu1 %v11098_v49 }
 0x1c6   : > { %2033 = vmatpush1.bf16.msra.mxu0 %v10025_v32 }
 0x1c7   : > { %2115 = vmatpush1.bf16.msra.mxu1 %v10028_v33  ;;  %2034 = vmatprep.subr.bf16.mxu0 %v10033_v34 }
 0x1c8   : > { %2116 = vmatprep.subr.bf16.mxu1 %v10036_v35 }
 0x1ca   : > { %2035 = vmatpush1.bf16.msra.mxu0 %v10031_v36 }
 0x1cb   : > { %2117 = vmatpush1.bf16.msra.mxu1 %v10034_v37  ;;  %2036 = vmatprep.subr.bf16.mxu0 %v10039_v38 }
 0x1cc   : > { %2118 = vmatprep.subr.bf16.mxu1 %v10042_v39 }
 0x1ce   : > { %2037 = vmatpush1.bf16.msra.mxu0 %v10037_v40 }
 0x1cf   : > { %2119 = vmatpush1.bf16.msra.mxu1 %v10040_v43  ;;  %2038 = vmatprep.subr.bf16.mxu0 %v10045_v44 }
 0x1d0   : > { %2120 = vmatprep.subr.bf16.mxu1 %v10048_v45 }
 0x1d2   : > { %2039 = vmatpush1.bf16.msra.mxu0 %v10043_v46 }
 0x1d3   : > { %2121 = vmatpush1.bf16.msra.mxu1 %v10046_v47  ;;  %2040 = vmatprep.subr.bf16.mxu0 %v10051_v48 }
 0x1d4   : > { %2122 = vmatprep.subr.bf16.mxu1 %v10054_v50 }
 0x1d6   : > { %2041 = vmatpush1.bf16.msra.mxu0 %v10049_v52 }
 0x1d7   : > { %2123 = vmatpush1.bf16.msra.mxu1 %v10052_v53  ;;  %2042 = vmatprep.subr.bf16.mxu0 %v10057_v54 }
 0x1d8   : > { %2124 = vmatprep.subr.bf16.mxu1 %v10060_v55 }
 0x1da   : > { %2043 = vmatpush1.bf16.msra.mxu0 %v10055_v56 }
 0x1db   : > { %2125 = vmatpush1.bf16.msra.mxu1 %v10058_v57  ;;  %2044 = vmatprep.subr.bf16.mxu0 %v10063_v58 }
 0x1dc   : > { %2126 = vmatprep.subr.bf16.mxu1 %v10066_v60 }
 0x1de   : > { %2045 = vmatpush1.bf16.msra.mxu0 %v10061_v61 }
 0x1df   : > { %2127 = vmatpush1.bf16.msra.mxu1 %v10064_v62  ;;  %9346 = vmatprep.subr.bf16.mxu0 %v10067_v63 }
 0x1e0   : > { %9564 = vmatprep.subr.bf16.mxu1 %v11099_v2 }
 0x1e1   : > { %2063 = vmatmul.mubr.bf16.vlgmr.msra.gmra.mrb[4].mxu0 %v11605_v17 }
 0x1e2   : > { %2145 = vmatmul.mubr.bf16.vlgmr.msra.gmra.mrb[4].mxu1 %v11605_v17  ;;  %9347 = vmatpush3.bf16.msra.mxu0 %v10068_v0 }
 0x1e3   : > { %2185 = vmatprep.mubr.bf16.mxu0 %v11493_v41  ;;  %9565 = vmatpush3.bf16.msra.mxu1 %v10069_v1  ;;  %v10074_v41 = vld [vmem:[%s14309_s3 + $0xb0] ss:$36 sps:$4 sm:$0xff]   ;;  %v2236_v1 = vand.u32 127, %v441_v19 }
 0x1e4   : > { %9348 = vmatprep.subr.bf16.mxu0 %v10070_v3  ;;  %9566 = vmatprep.subr.bf16.mxu1 %v11099_v2 }
 0x1e5   : > { %9580 = vmatprep.mubr.msk.bf16.mxu1 %vm11100_vm0, %v11099_v2  ;;  %vm12009_vm3 = vcmp.le.s32.totalorder %v2236_v1, %v11449_v21 }
 0x1e6   : > { %9349 = vmatpush3.bf16.msra.mxu0 %v10071_v4 }
 0x1e7   : > { %9567 = vmatpush3.bf16.msra.mxu1 %v10072_v5  ;;  %9350 = vmatprep.subr.bf16.mxu0 %v10073_v6 }
 0x1e8   : > { %9568 = vmatprep.subr.bf16.mxu1 %v11099_v2 }
 0x1ea   : > { %9351 = vmatpush3.bf16.msra.mxu0 %v10074_v41 }
 0x1eb   : > { %9569 = vmatpush3.bf16.msra.mxu1 %v10075_v51  ;;  %9352 = vmatprep.subr.bf16.mxu0 %v10076_v7 }
 0x1ec   : > { %9570 = vmatprep.subr.bf16.mxu1 %v11099_v2 }
 0x1ee   : > { %9353 = vmatpush3.bf16.msra.mxu0 %v10077_v8 }
 0x1ef   : > { %9571 = vmatpush3.bf16.msra.mxu1 %v10078_v9  ;;  %9354 = vmatprep.subr.bf16.mxu0 %v10079_v10 }
 0x1f0   : > { %9572 = vmatprep.subr.bf16.mxu1 %v11099_v2 }
 0x1f2   : > { %9355 = vmatpush3.bf16.msra.mxu0 %v10080_v11 }
 0x1f3   : > { %9573 = vmatpush3.bf16.msra.mxu1 %v10081_v12  ;;  %9356 = vmatprep.subr.bf16.mxu0 %v10082_v13 }
 0x1f4   : > { %9574 = vmatprep.subr.bf16.mxu1 %v11099_v2 }
 0x1f6   : > { %9357 = vmatpush3.bf16.msra.mxu0 %v10083_v14 }
 0x1f7   : > { %9575 = vmatpush3.bf16.msra.mxu1 %v10084_v15  ;;  %9358 = vmatprep.subr.bf16.mxu0 %v10085_v16 }
 0x1f8   : > { %9576 = vmatprep.subr.bf16.mxu1 %v11099_v2 }
 0x1fa   : > { %9359 = vmatpush3.bf16.msra.mxu0 %v10086_v18 }
 0x1fb   : > { %9577 = vmatpush3.bf16.msra.mxu1 %v10087_v20  ;;  %9360 = vmatprep.subr.bf16.mxu0 %v10088_v24 }
 0x1fc   : > { %9578 = vmatprep.subr.bf16.mxu1 %v11099_v2 }
 0x1fe   : > { %9361 = vmatpush3.bf16.msra.mxu0 %v10089_v25 }
 0x1ff   : > { %9579 = vmatpush3.bf16.msra.mxu1 %v10090_v26  ;;  %9608 = vmatprep.subr.bf16.mxu0 %v11099_v2 }
 0x200   : > { %9584 = vmatprep.subr.bf16.mxu1 %v11099_v2 }
 0x201   : > { %2186 = vmatmul.mubr.bf16.vlgmr.msra.gmra.mrb[8].mxu0 %v11495_v42 }
 0x202   : > { %9581 = vmatmul.mubr.bf16.vlgmr.msra.gmra.mrb[8].mxu1 %v11605_v17  ;;  %9610 = vmatprep.mubr.msk.bf16.mxu0 %vm11100_vm0, %v11099_v2 }
 0x203   : > { %9586 = vmatprep.mubr.msk.bf16.mxu1 %vm11100_vm0, %v11099_v2 }
 0x254   : > { %v1900_v27 = vpop.f32.mrb[0].mxu0  ;;  %v11981_v28 = vpop.f32.mrb[0].mxu1 }
 0x255   : > { %v1902_v29 = vpop.f32.mrb[1].mxu0  ;;  %v1984_v30 = vpop.f32.mrb[1].mxu1  ;;  %v2238_v17 = vpack.c.bf16 %v1900_v27, %v1900_v27  ;;  %v2685_v16 = vpack.c.bf16 %v11981_v28, %v11981_v28 }
 0x256   : > { %v2239_v31 = vpack.c.bf16 %v1984_v30, %v1984_v30  ;;  %v1904_v32 = vpop.f32.mrb[2].mxu0  ;;  %v1986_v33 = vpop.f32.mrb[2].mxu1  ;;  %v2463_v53 = vpack.c.bf16 %v1902_v29, %v1902_v29 }
 0x257   : > { %v1905_v34 = vpop.f32.mrb[3].mxu0  ;;  %v1987_v35 = vpop.f32.mrb[3].mxu1 }
 0x258   : > { %v2246_v42 = vsel %vm2241_vm1, %v2239_v31, 0  ;;  %2353 = vrot.lane.b32.xlu0 %v2239_v31, %s11101_s0 }
 0x259   : > { %9585 = vmatpush3.bf16.xpose.msra.mxu1 %v2246_v42 }
 0x25a   : > { %9590 = vmatprep.subr.bf16.mxu1 %v11099_v2 }
 0x260   : > { %9587 = vmatmul.mubr.msk.bf16.vlgmr.msra.gmra.mrb[12].mxu1 %vm2241_vm1, %v2238_v17 }
 0x261   : > { %9592 = vmatprep.mubr.msk.bf16.mxu1 %vm11100_vm0, %v11099_v2 }
 0x2b4   : > { %v2064_v36 = vpop.f32.mrb[4].mxu0 }
 0x2b5   : > { %v2464_v37 = vpack.c.bf16 %v2064_v36, %v2064_v36  ;;  %v2146_v38 = vpop.f32.mrb[4].mxu1  ;;  %v2066_v39 = vpop.f32.mrb[5].mxu0 }
 0x2b6   : > { %v11989_v40 = vpack.c.bf16 %v2146_v38, %v2146_v38  ;;  %v11991_v43 = vpack.c.bf16 %v2066_v39, %v2066_v39  ;;  %v11993_v44 = vpop.f32.mrb[5].mxu1  ;;  %v2068_v45 = vpop.f32.mrb[6].mxu0 }
 0x2b7   : > { %v2470_v46 = vsel %vm2241_vm1, %v2464_v37, 0  ;;  %v2150_v47 = vpop.f32.mrb[6].mxu1  ;;  %v2069_v48 = vpop.f32.mrb[7].mxu0 }
 0x2b8   : > { %v2307_v50 = vsel %vm2305_vm2, %v11989_v40, 0  ;;  %v2151_v52 = vpop.f32.mrb[7].mxu1  ;;  %9609 = vmatpush3.bf16.xpose.msra.mxu0 %v2470_v46  ;;  %2797 = vrot.lane.b32.xlu0 %v11991_v43, %s11101_s0  ;;  %v2692_v34 = vsel %vm2241_vm1, %v11991_v43, 0 }
 0x2b9   : > { %9591 = vmatpush3.bf16.msra.mxu1 %v2307_v50  ;;  %9620 = vmatprep.subr.bf16.mxu0 %v11099_v2 }
 0x2ba   : > { %9596 = vmatprep.subr.bf16.mxu1 %v11099_v2 }
 0x2bf   : > { %9611 = vmatmul.mubr.msk.bf16.vlgmr.msra.gmra.mrb[12].mxu0 %vm2241_vm1, %v2463_v53 }
 0x2c0   : > { %9622 = vmatprep.mubr.msk.bf16.mxu0 %vm11100_vm0, %v11099_v2 }
 0x2ca   : > { %v2354_v28 = vpop.permute.xlu0 %2353 }
 0x2cb   : > { %v2359_v32 = vsel %vm2241_vm1, %v2354_v28, 0 }
 0x2d4   : > { %v9362_v54 = vpop.f32.mrb[8].mxu0 }
 0x2d5   : > { %v2227_v55 = vpop.f32.mrb[8].mxu1  ;;  %v9363_v56 = vpop.f32.mrb[9].mxu0 }
 0x2d6   : > { %v9364_v57 = vadd.f32 %v9363_v56, %v9362_v54  ;;  %v9582_v58 = vpop.f32.mrb[9].mxu1  ;;  %v9365_v60 = vpop.f32.mrb[10].mxu0 }
 0x2d7   : > { %v2230_v61 = vpop.f32.mrb[10].mxu1  ;;  %v9366_v62 = vpop.f32.mrb[11].mxu0 }
 0x2d8   : > { %v12005_v63 = vadd.f32 %v9364_v57, %v2227_v55  ;;  %v9583_v0 = vpop.f32.mrb[11].mxu1 }
 0x32a   : > { %v2798_v35 = vpop.permute.xlu0 %2797 }
 0x32b   : > { %v2803_v42 = vsel %vm2241_vm1, %v2798_v35, 0 }
 0x333   : > { %v2282_v4 = vpop.f32.mrb[12].mxu1 }
 0x334   : > { %v2288_v5 = vsel %vm12009_vm3, %v2282_v4, -1e+30  ;;  %v9588_v6 = vpop.f32.mrb[13].mxu1 }
 0x335   : > { %v2285_v41 = vpop.f32.mrb[14].mxu1  ;;  %v2290_v51 = vsel %vm2289_vm4, %v2288_v5, -inf }
 0x336   : > { %2291 = vmax.xlane.f32.xlu1 %v2290_v51  ;;  %v9589_v7 = vpop.f32.mrb[15].mxu1 }
 0x392   : > { %v2506_v8 = vpop.f32.mrb[12].mxu0 }
 0x393   : > { %v9612_v9 = vpop.f32.mrb[13].mxu0  ;;  %v2512_v18 = vsel %vm12009_vm3, %v2506_v8, -1e+30 }
 0x394   : > { %v2509_v10 = vpop.f32.mrb[14].mxu0  ;;  %v2513_v20 = vsel %vm2289_vm4, %v2512_v18, -inf }
 0x395   : > { %v9613_v19 = vpop.f32.mrb[15].mxu0 }
 0x3c3   : > { %v2292_v11 = vpop.xlane.xlu1 %2291 }
 0x3c4   : > { %v2293_v12 = vsub.f32 %v2288_v5, %v2292_v11 }
 0x3c6   : > { %v2294_v13 = vmul.f32 1.442695, %v2293_v12 }
 0x3c8   : > { %11005 = vpow2.f32 %v2294_v13 }
 0x3d2   : > { %v11006_v14 = vpop.eup %11005 }
 0x3d3   : > { %v2296_v15 = vsel %vm2289_vm4, %v11006_v14, 0.0 }
 0x3d4   : > { %2297 = vadd.xlane.f32.xlu1 %v2296_v15 }
 0x3e5   : > { %2350 = vrot.lane.b32.xlu1 %v2238_v17, %s11101_s0 }
 0x3e9   : > { %2575 = vrot.lane.b32.xlu1 %v2464_v37, %s11101_s0 }
 0x3ed   : > { %2572 = vrot.lane.b32.xlu1 %v2463_v53, %s11101_s0 }
 0x3f1   : > { %2794 = vrot.lane.b32.xlu1 %v2685_v16, %s11101_s0 }
 0x415   : > { %2514 = vmax.xlane.f32.xlu1 %v2513_v20 }
 0x461   : > { %v2298_v24 = vpop.xlane.xlu1 %2297 }
 0x462   : > { %11007 = vrcp.f32 %v2298_v24 }
 0x465   : > { %v2351_v25 = vpop.permute.xlu1 %2350 }
 0x469   : > { %v2576_v26 = vpop.permute.xlu1 %2575 }
 0x46a   : > { %v2581_v27 = vsel %vm2241_vm1, %v2576_v26, 0 }
 0x46b   : > { %9621 = vmatpush3.bf16.xpose.msra.mxu0 %v2581_v27 }
 0x46c   : > { %v11008_v29 = vpop.eup %11007  ;;  %9632 = vmatprep.subr.bf16.mxu0 %v11099_v2 }
 0x46d   : > { %v2300_v30 = vmul.f32 %v11008_v29, %v11006_v14  ;;  %v2573_v33 = vpop.permute.xlu1 %2572 }
 0x46f   : > { %v2301_v31 = vpack.c.bf16 %v2300_v30, %v2300_v30 }
 0x471   : > { %9593 = vmatmul.mubr.msk.bf16.vlgmr.msra.gmra.mrb[16].mxu1 %vm2289_vm4, %v2301_v31  ;;  %v2795_v17 = vpop.permute.xlu1 %2794 }
 0x472   : > { %9597 = vmatpush3.bf16.xpose.msra.mxu1 %v2359_v32  ;;  %9623 = vmatmul.mubr.msk.bf16.vlgmr.msra.gmra.mrb[16].mxu0 %vm2241_vm1, %v2573_v33 }
 0x473   : > { %9633 = vmatpush3.bf16.xpose.msra.mxu0 %v2692_v34  ;;  %9598 = vmatprep.mubr.msk.bf16.mxu1 %vm11100_vm0, %v11099_v2 }
 0x474   : > { %9634 = vmatprep.mubr.msk.bf16.mxu0 %vm11100_vm0, %v11099_v2  ;;  %9644 = vmatprep.subr.bf16.mxu0 %v11099_v2 }
 0x475   : > { %9602 = vmatprep.subr.bf16.mxu1 %v11099_v2 }
 0x479   : > { %9599 = vmatmul.mubr.msk.bf16.vlgmr.msra.gmra.mrb[20].mxu1 %vm2241_vm1, %v2351_v25 }
 0x47a   : > { %9635 = vmatmul.mubr.msk.bf16.vlgmr.msra.gmra.mrb[20].mxu0 %vm2241_vm1, %v2685_v16  ;;  %9604 = vmatprep.mubr.msk.bf16.mxu1 %vm11100_vm0, %v11099_v2 }
 0x47b   : > { %9645 = vmatpush3.bf16.xpose.msra.mxu0 %v2803_v42  ;;  %9646 = vmatprep.mubr.msk.bf16.mxu0 %vm11100_vm0, %v11099_v2  ;;  %v2687_v42 = vpack.c.bf16 %v12005_v63, %v12005_v63 }
 0x482   : > { %9647 = vmatmul.mubr.msk.bf16.vlgmr.msra.gmra.mrb[24].mxu0 %vm2241_vm1, %v2795_v17  ;;  %v2465_v17 = vpack.c.bf16 %v11993_v44, %v11993_v44 }
 0x4a2   : > { %v2515_v36 = vpop.xlane.xlu1 %2514 }
 0x4a3   : > { %v2516_v50 = vsub.f32 %v2512_v18, %v2515_v36 }
 0x4a5   : > { %v2517_v53 = vmul.f32 1.442695, %v2516_v50  ;;  %v2529_v50 = vsel %vm2305_vm2, %v2465_v17, 0 }
 0x4a7   : > { %11009 = vpow2.f32 %v2517_v53 }
 0x4b1   : > { %v11010_v19 = vpop.eup %11009 }
 0x4b2   : > { %v2519_v11 = vsel %vm2289_vm4, %v11010_v19, 0.0 }
 0x544   : > { %v12047_v37 = vpop.f32.mrb[16].mxu1 }
 0x545   : > { %v9594_v38 = vpop.f32.mrb[17].mxu1  ;;  %v2617_v39 = vpop.f32.mrb[16].mxu0 }
 0x546   : > { %v2346_v43 = vpop.f32.mrb[18].mxu1  ;;  %v9624_v45 = vpop.f32.mrb[17].mxu0  ;;  %v2623_v61 = vsel %vm12009_vm3, %v2617_v39, -1e+30 }
 0x547   : > { %v9595_v46 = vpop.f32.mrb[19].mxu1  ;;  %v2620_v47 = vpop.f32.mrb[18].mxu0  ;;  %v2624_v4 = vsel %vm2289_vm4, %v2623_v61, -inf }
 0x548   : > { %v9625_v48 = vpop.f32.mrb[19].mxu0 }
 0x54c   : > { %v2395_v52 = vpop.f32.mrb[20].mxu1 }
 0x54d   : > { %v2401_v54 = vsel %vm12009_vm3, %v2395_v52, -1e+30  ;;  %v9600_v55 = vpop.f32.mrb[21].mxu1  ;;  %v2728_v56 = vpop.f32.mrb[20].mxu0 }
 0x54e   : > { %v2398_v57 = vpop.f32.mrb[22].mxu1  ;;  %v9636_v58 = vpop.f32.mrb[21].mxu0  ;;  %v2402_v60 = vsel %vm2289_vm4, %v2401_v54, -inf  ;;  %v2734_v5 = vsel %vm12009_vm3, %v2728_v56, -1e+30 }
 0x54f   : > { %v9601_v62 = vpop.f32.mrb[23].mxu1  ;;  %2403 = vmax.xlane.f32.xlu0 %v2402_v60  ;;  %v2731_v0 = vpop.f32.mrb[22].mxu0  ;;  %v2735_v51 = vsel %vm2289_vm4, %v2734_v5, -inf }
 0x550   : > { %v9637_v1 = vpop.f32.mrb[23].mxu0 }
 0x553   : > { %2625 = vmax.xlane.f32.xlu0 %v2624_v4 }
 0x555   : > { %v2839_v6 = vpop.f32.mrb[24].mxu0 }
 0x556   : > { %v9648_v41 = vpop.f32.mrb[25].mxu0  ;;  %v2845_v7 = vsel %vm12009_vm3, %v2839_v6, -1e+30 }
 0x557   : > { %2736 = vmax.xlane.f32.xlu0 %v2735_v51  ;;  %v2842_v8 = vpop.f32.mrb[26].mxu0  ;;  %v2846_v10 = vsel %vm2289_vm4, %v2845_v7, -inf  ;;  %v10091_v51 = vld [vmem:[%s14310_s4] ss:$12 sps:$4 sm:$0xff]  }
 0x558   : > { %v9649_v9 = vpop.f32.mrb[27].mxu0  ;;  %v10096_v8 = vld [vmem:[%s14310_s4 + $0x1c] ss:$12 sps:$4 sm:$0xff]  }
 0x559   : > { %v10094_v9 = vld [vmem:[%s14310_s4 + $0x18] ss:$12 sps:$4 sm:$0xff]  }
 0x55b   : > { %2847 = vmax.xlane.f32.xlu0 %v2846_v10  ;;  %v10099_v10 = vld [vmem:[%s14310_s4 + $0x34] ss:$12 sps:$4 sm:$0xff]  }
 0x55f   : > { %2520 = vadd.xlane.f32.xlu0 %v2519_v11  ;;  %v10114_v11 = vld [vmem:[%s14310_s4 + $0x184] ss:$12 sps:$4 sm:$0xff]  }
 0x5dc   : > { %v2404_v12 = vpop.xlane.xlu0 %2403 }
 0x5dd   : > { %v2405_v13 = vsub.f32 %v2401_v54, %v2404_v12  ;;  %v10120_v12 = vld [vmem:[%s14310_s4 + $0x19c] ss:$12 sps:$4 sm:$0xff]  }
 0x5df   : > { %v2406_v16 = vmul.f32 1.442695, %v2405_v13  ;;  %v10097_v13 = vld [vmem:[%s14310_s4 + $0x30] ss:$12 sps:$4 sm:$0xff]  }
 0x5e0   : > { %v2626_v14 = vpop.xlane.xlu0 %2625 }
 0x5e1   : > { %v2627_v15 = vsub.f32 %v2623_v61, %v2626_v14  ;;  %v2751_v61 = vsel %vm2305_vm2, %v2687_v42, 0  ;;  %v10102_v14 = vld [vmem:[%s14310_s4 + $0x4c] ss:$12 sps:$4 sm:$0xff]  }
 0x5e3   : > { %v2628_v18 = vmul.f32 1.442695, %v2627_v15  ;;  %v10118_v15 = vld [vmem:[%s14310_s4 + $0x198] ss:$12 sps:$4 sm:$0xff]  }
 0x5e4   : > { %v2737_v20 = vpop.xlane.xlu0 %2736 }
 0x5e5   : > { %11011 = vpow2.f32 %v2628_v18  ;;  %v2738_v3 = vsub.f32 %v2734_v5, %v2737_v20  ;;  %v10100_v18 = vld [vmem:[%s14310_s4 + $0x48] ss:$12 sps:$4 sm:$0xff]   ;;  %v10105_v20 = vld [vmem:[%s14310_s4 + $0x64] ss:$12 sps:$4 sm:$0xff]  }
 0x5e6   : > { %11013 = vpow2.f32 %v2406_v16  ;;  %v10126_v16 = vld [vmem:[%s14310_s4 + $0x1b4] ss:$12 sps:$4 sm:$0xff]  }
 0x5e7   : > { %v2739_v24 = vmul.f32 1.442695, %v2738_v3  ;;  %v10124_v3 = vld [vmem:[%s14310_s4 + $0x1b0] ss:$12 sps:$4 sm:$0xff]  }
 0x5e8   : > { %v2848_v25 = vpop.xlane.xlu0 %2847 }
 0x5e9   : > { %11015 = vpow2.f32 %v2739_v24  ;;  %v2849_v26 = vsub.f32 %v2845_v7, %v2848_v25  ;;  %v10093_v7 = vld [vmem:[%s14310_s4 + $0x4] ss:$12 sps:$4 sm:$0xff]   ;;  %v10132_v24 = vld [vmem:[%s14310_s4 + $0x1cc] ss:$12 sps:$4 sm:$0xff]  }
 0x5ea   : > { %3422 = vmatprep.subr.bf16.mxu0 %v10093_v7  ;;  %v10103_v25 = vld [vmem:[%s14310_s4 + $0x60] ss:$12 sps:$4 sm:$0xff]   ;;  %v10157_v7 = vld [vmem:[%s14310_s4 + $0x150] ss:$12 sps:$4 sm:$0xff]  }
 0x5eb   : > { %v2850_v27 = vmul.f32 1.442695, %v2849_v26  ;;  %3423 = vmatpush1.bf16.msra.mxu0 %v10091_v51  ;;  %v10108_v26 = vld [vmem:[%s14310_s4 + $0x7c] ss:$12 sps:$4 sm:$0xff]   ;;  %v10159_v51 = vld [vmem:[%s14310_s4 + $0x154] ss:$12 sps:$4 sm:$0xff]  }
 0x5ec   : > { %v2521_v39 = vpop.xlane.xlu0 %2520  ;;  %3424 = vmatprep.subr.bf16.mxu0 %v10096_v8  ;;  %v10160_v8 = vld [vmem:[%s14310_s4 + $0xc8] ss:$12 sps:$4 sm:$0xff]  }
 0x5ed   : > { %11017 = vpow2.f32 %v2850_v27  ;;  %v10130_v27 = vld [vmem:[%s14310_s4 + $0x1c8] ss:$12 sps:$4 sm:$0xff]  }
 0x5ef   : > { %v11012_v29 = vpop.eup %11011  ;;  %3425 = vmatpush1.bf16.msra.mxu0 %v10094_v9 }
 0x5f0   : > { %v2630_v30 = vsel %vm2289_vm4, %v11012_v29, 0.0  ;;  %v11014_v28 = vpop.eup %11013  ;;  %3426 = vmatprep.subr.bf16.mxu0 %v10099_v10  ;;  %v10164_v10 = vld [vmem:[%s14310_s4 + $0x16c] ss:$12 sps:$4 sm:$0xff]  }
 0x5f1   : > { %2631 = vadd.xlane.f32.xlu1 %v2630_v30  ;;  %v2408_v32 = vsel %vm2289_vm4, %v11014_v28, 0.0  ;;  %v10106_v30 = vld [vmem:[%s14310_s4 + $0x78] ss:$12 sps:$4 sm:$0xff]  }
 0x5f3   : > { %v11016_v31 = vpop.eup %11015  ;;  %3427 = vmatpush1.bf16.msra.mxu0 %v10097_v13 }
 0x5f4   : > { %v2741_v33 = vsel %vm2289_vm4, %v11016_v31, 0.0  ;;  %3428 = vmatprep.subr.bf16.mxu0 %v10102_v14 }
 0x5f5   : > { %2409 = vadd.xlane.f32.xlu1 %v2408_v32  ;;  %2742 = vadd.xlane.f32.xlu0 %v2741_v33  ;;  %v10144_v32 = vld [vmem:[%s14310_s4 + $0x1fc] ss:$12 sps:$4 sm:$0xff]  }
 0x5f6   : > { %v10109_v33 = vld [vmem:[%s14310_s4 + $0x90] ss:$12 sps:$4 sm:$0xff]  }
 0x5f7   : > { %v11018_v34 = vpop.eup %11017  ;;  %3429 = vmatpush1.bf16.msra.mxu0 %v10100_v18 }
 0x5f8   : > { %v2852_v35 = vsel %vm2289_vm4, %v11018_v34, 0.0  ;;  %3430 = vmatprep.subr.bf16.mxu0 %v10105_v20 }
 0x5f9   : > { %2853 = vadd.xlane.f32.xlu0 %v2852_v35  ;;  %v10142_v35 = vld [vmem:[%s14310_s4 + $0x1f8] ss:$12 sps:$4 sm:$0xff]  }
 0x5fb   : > { %3431 = vmatpush1.bf16.msra.mxu0 %v10103_v25 }
 0x5fc   : > { %3432 = vmatprep.subr.bf16.mxu0 %v10108_v26  ;;  %v10165_v26 = vld [vmem:[%s14310_s4 + $0xe0] ss:$12 sps:$4 sm:$0xff]  }
 0x5ff   : > { %3433 = vmatpush1.bf16.msra.mxu0 %v10106_v30 }
 0x606   : > { %2415 = vrot.lane.b32.xlu1 %v11989_v40, %s11101_s0 }
 0x60a   : > { %2859 = vrot.lane.b32.xlu1 %v2687_v42, %s11101_s0  ;;  %v10150_v42 = vld [vmem:[%s14310_s4 + $0x214] ss:$12 sps:$4 sm:$0xff]  }
 0x60f   : > { %2637 = vrot.lane.b32.xlu0 %v2465_v17, %s11101_s0  ;;  %v10115_v17 = vld [vmem:[%s14310_s4 + $0xa8] ss:$12 sps:$4 sm:$0xff]  }
 0x67e   : > { %v2632_v36 = vpop.xlane.xlu1 %2631 }
 0x682   : > { %v2410_v38 = vpop.xlane.xlu1 %2409  ;;  %v2743_v40 = vpop.xlane.xlu0 %2742 }
 0x683   : > { %11019 = vrcp.f32 %v2410_v38  ;;  %v10148_v38 = vld [vmem:[%s14310_s4 + $0x210] ss:$12 sps:$4 sm:$0xff]  }
 0x684   : > { %11021 = vrcp.f32 %v2521_v39  ;;  %v10156_v39 = vld [vmem:[%s14310_s4 + $0x22c] ss:$12 sps:$4 sm:$0xff]  }
 0x685   : > { %11023 = vrcp.f32 %v2632_v36  ;;  %v10123_v36 = vld [vmem:[%s14310_s4 + $0xc4] ss:$12 sps:$4 sm:$0xff]  }
 0x686   : > { %v2416_v43 = vpop.permute.xlu1 %2415  ;;  %v2854_v44 = vpop.xlane.xlu0 %2853  ;;  %11025 = vrcp.f32 %v2743_v40  ;;  %v10154_v40 = vld [vmem:[%s14310_s4 + $0x228] ss:$12 sps:$4 sm:$0xff]  }
 0x687   : > { %v2421_v45 = vsel %vm2305_vm2, %v2416_v43, 0  ;;  %11027 = vrcp.f32 %v2854_v44  ;;  %v10121_v43 = vld [vmem:[%s14310_s4 + $0xc0] ss:$12 sps:$4 sm:$0xff]   ;;  %v10139_v44 = vld [vmem:[%s14310_s4 + $0x108] ss:$12 sps:$4 sm:$0xff]  }
 0x688   : > { %9603 = vmatpush3.bf16.msra.mxu1 %v2421_v45  ;;  %v10129_v45 = vld [vmem:[%s14310_s4 + $0xdc] ss:$12 sps:$4 sm:$0xff]  }
 0x689   : > { %9614 = vmatprep.subr.bf16.mxu1 %v11099_v2 }
 0x68a   : > { %v2638_v53 = vpop.permute.xlu0 %2637  ;;  %v2860_v0 = vpop.permute.xlu1 %2859 }
 0x68b   : > { %v2643_v56 = vsel %vm2305_vm2, %v2638_v53, 0  ;;  %v2865_v5 = vsel %vm2305_vm2, %v2860_v0, 0  ;;  %v10153_v53 = vld [vmem:[%s14310_s4 + $0x13c] ss:$12 sps:$4 sm:$0xff]  }
 0x68d   : > { %v11020_v63 = vpop.eup %11019 }
 0x68e   : > { %v2412_v46 = vmul.f32 %v11020_v63, %v11014_v28  ;;  %v11022_v48 = vpop.eup %11021  ;;  %v10111_v28 = vld [vmem:[%s14310_s4 + $0x94] ss:$12 sps:$4 sm:$0xff]   ;;  %v10127_v63 = vld [vmem:[%s14310_s4 + $0xd8] ss:$12 sps:$4 sm:$0xff]  }
 0x68f   : > { %v2523_v52 = vmul.f32 %v11022_v48, %v11010_v19  ;;  %v11024_v55 = vpop.eup %11023  ;;  %v10112_v19 = vld [vmem:[%s14310_s4 + $0x180] ss:$12 sps:$4 sm:$0xff]   ;;  %3434 = vmatprep.subr.bf16.mxu0 %v10111_v28 }
 0x690   : > { %v2413_v47 = vpack.c.bf16 %v2412_v46, %v2412_v46  ;;  %v2634_v57 = vmul.f32 %v11024_v55, %v11012_v29  ;;  %v11026_v60 = vpop.eup %11025  ;;  %v10138_v29 = vld [vmem:[%s14310_s4 + $0x1e4] ss:$12 sps:$4 sm:$0xff]   ;;  %3435 = vmatpush1.bf16.msra.mxu0 %v10109_v33  ;;  %v10135_v46 = vld [vmem:[%s14310_s4 + $0xf4] ss:$12 sps:$4 sm:$0xff]   ;;  %v10141_v48 = vld [vmem:[%s14310_s4 + $0x10c] ss:$12 sps:$4 sm:$0xff]  }
 0x691   : > { %v2524_v54 = vpack.c.bf16 %v2523_v52, %v2523_v52  ;;  %v2745_v62 = vmul.f32 %v11026_v60, %v11016_v31  ;;  %v11028_v4 = vpop.eup %11027  ;;  %v10136_v31 = vld [vmem:[%s14310_s4 + $0x1e0] ss:$12 sps:$4 sm:$0xff]   ;;  %v10167_v33 = vld [vmem:[%s14310_s4 + $0xf8] ss:$12 sps:$4 sm:$0xff]  }
 0x692   : > { %9605 = vmatmul.mubr.msk.bf16.vlgmr.msra.gmra.mrb[24].mxu1 %vm2289_vm4, %v2413_v47  ;;  %v2635_v58 = vpack.c.bf16 %v2634_v57, %v2634_v57  ;;  %v2856_v6 = vmul.f32 %v11028_v4, %v11018_v34  ;;  %v10117_v34 = vld [vmem:[%s14310_s4 + $0xac] ss:$12 sps:$4 sm:$0xff]   ;;  %v10133_v47 = vld [vmem:[%s14310_s4 + $0xf0] ss:$12 sps:$4 sm:$0xff]  }
 0x693   : > { %9615 = vmatpush3.bf16.msra.mxu1 %v2529_v50  ;;  %9616 = vmatprep.mubr.msk.bf16.mxu1 %vm11100_vm0, %v11099_v2  ;;  %v2746_v1 = vpack.c.bf16 %v2745_v62, %v2745_v62  ;;  %v10147_v50 = vld [vmem:[%s14310_s4 + $0x124] ss:$12 sps:$4 sm:$0xff]   ;;  %v10145_v52 = vld [vmem:[%s14310_s4 + $0x120] ss:$12 sps:$4 sm:$0xff]  }
 0x694   : > { %9626 = vmatprep.subr.bf16.mxu1 %v11099_v2  ;;  %v2857_v41 = vpack.c.bf16 %v2856_v6, %v2856_v6  ;;  %3436 = vmatprep.subr.bf16.mxu0 %v10117_v34  ;;  %v10166_v28 = vld [vmem:[%s14310_s4 + $0x20] ss:$12 sps:$4 sm:$0xff]  }
 0x695   : > { %3437 = vmatpush1.bf16.msra.mxu0 %v10115_v17  ;;  %v10169_v17 = vld [vmem:[%s14310_s4 + $0x38] ss:$12 sps:$4 sm:$0xff]  }
 0x696   : > { %3438 = vmatprep.subr.bf16.mxu0 %v10123_v36  ;;  %v10171_v36 = vld [vmem:[%s14310_s4 + $0x1a0] ss:$12 sps:$4 sm:$0xff]  }
 0x699   : > { %3439 = vmatpush1.bf16.msra.mxu0 %v10121_v43  ;;  %v10174_v43 = vld [vmem:[%s14310_s4 + $0x1b8] ss:$12 sps:$4 sm:$0xff]  }
 0x69a   : > { %9617 = vmatmul.mubr.msk.bf16.vlgmr.msra.gmra.mrb[28].mxu1 %vm2289_vm4, %v2524_v54  ;;  %3440 = vmatprep.subr.bf16.mxu0 %v10129_v45  ;;  %v10151_v54 = vld [vmem:[%s14310_s4 + $0x138] ss:$12 sps:$4 sm:$0xff]   ;;  %v10175_v45 = vld [vmem:[%s14310_s4 + $0x68] ss:$12 sps:$4 sm:$0xff]  }
 0x69b   : > { %9627 = vmatpush3.bf16.msra.mxu1 %v2643_v56  ;;  %9628 = vmatprep.mubr.msk.bf16.mxu1 %vm11100_vm0, %v11099_v2 }
 0x69c   : > { %9638 = vmatprep.subr.bf16.mxu1 %v11099_v2 }
 0x69d   : > { %3441 = vmatpush1.bf16.msra.mxu0 %v10127_v63  ;;  %v10177_v63 = vld [vmem:[%s14310_s4 + $0x1d0] ss:$12 sps:$4 sm:$0xff]  }
 0x69e   : > { %3442 = vmatprep.subr.bf16.mxu0 %v10135_v46  ;;  %v10178_v46 = vld [vmem:[%s14310_s4 + $0x80] ss:$12 sps:$4 sm:$0xff]  }
 0x6a1   : > { %3443 = vmatpush1.bf16.msra.mxu0 %v10133_v47  ;;  %v10179_v47 = vld [vmem:[%s14310_s4 + $0x158] ss:$12 sps:$4 sm:$0xff]  }
 0x6a2   : > { %9629 = vmatmul.mubr.msk.bf16.vlgmr.msra.gmra.mrb[32].mxu1 %vm2289_vm4, %v2635_v58  ;;  %3444 = vmatprep.subr.bf16.mxu0 %v10141_v48  ;;  %v10180_v48 = vld [vmem:[%s14310_s4 + $0x1e8] ss:$12 sps:$4 sm:$0xff]  }
 0x6a3   : > { %9639 = vmatpush3.bf16.msra.mxu1 %v2751_v61  ;;  %9640 = vmatprep.mubr.msk.bf16.mxu1 %vm11100_vm0, %v11099_v2 }
 0x6a4   : > { %9650 = vmatprep.subr.bf16.mxu1 %v11099_v2 }
 0x6a5   : > { %3445 = vmatpush1.bf16.msra.mxu0 %v10139_v44  ;;  %v10181_v44 = vld [vmem:[%s14310_s4 + $0x98] ss:$12 sps:$4 sm:$0xff]  }
 0x6a6   : > { %3446 = vmatprep.subr.bf16.mxu0 %v10147_v50  ;;  %v10182_v50 = vld [vmem:[%s14310_s4 + $0x170] ss:$12 sps:$4 sm:$0xff]  }
 0x6a9   : > { %3447 = vmatpush1.bf16.msra.mxu0 %v10145_v52  ;;  %v10183_v52 = vld [vmem:[%s14310_s4 + $0x200] ss:$12 sps:$4 sm:$0xff]  }
 0x6aa   : > { %9641 = vmatmul.mubr.msk.bf16.vlgmr.msra.gmra.mrb[36].mxu1 %vm2289_vm4, %v2746_v1  ;;  %3448 = vmatprep.subr.bf16.mxu0 %v10153_v53  ;;  %v10184_v53 = vld [vmem:[%s14310_s4 + $0xb0] ss:$12 sps:$4 sm:$0xff]  }
 0x6ab   : > { %9651 = vmatpush3.bf16.msra.mxu1 %v2865_v5  ;;  %9652 = vmatprep.mubr.msk.bf16.mxu1 %vm11100_vm0, %v11099_v2 }
 0x6ac   : > { %3463 = vmatprep.subr.bf16.mxu1 %v10114_v11  ;;  %v10162_v11 = vld [vmem:[%s14310_s4 + $0x168] ss:$12 sps:$4 sm:$0xff]  }
 0x6ad   : > { %3449 = vmatpush1.bf16.msra.mxu0 %v10151_v54  ;;  %v10185_v54 = vld [vmem:[%s14310_s4 + $0x218] ss:$12 sps:$4 sm:$0xff]  }
 0x6ae   : > { %3450 = vmatprep.subr.bf16.mxu0 %v10159_v51 }
 0x6b1   : > { %3451 = vmatpush1.bf16.msra.mxu0 %v10157_v7 }
 0x6b2   : > { %9653 = vmatmul.mubr.msk.bf16.vlgmr.msra.gmra.mrb[40].mxu1 %vm2289_vm4, %v2857_v41  ;;  %3452 = vmatprep.subr.bf16.mxu0 %v10164_v10 }
 0x6b3   : > { %3495 = vmatprep.mubr.bf16.mxu1 %v11098_v49  ;;  %3464 = vmatpush1.bf16.msra.mxu1 %v10112_v19 }
 0x6b4   : > { %3465 = vmatprep.subr.bf16.mxu1 %v10120_v12 }
 0x6b5   : > { %3453 = vmatpush1.bf16.msra.mxu0 %v10162_v11 }
 0x6b6   : > { %9656 = vmatprep.subr.bf16.mxu0 %v11099_v2 }
 0x6b7   : > { %3466 = vmatpush1.bf16.msra.mxu1 %v10118_v15 }
 0x6b8   : > { %3467 = vmatprep.subr.bf16.mxu1 %v10126_v16 }
 0x6bb   : > { %3468 = vmatpush1.bf16.msra.mxu1 %v10124_v3 }
 0x6bc   : > { %3469 = vmatprep.subr.bf16.mxu1 %v10132_v24  ;;  %v10161_v24 = vld [vmem:[%s14310_s4 + $0x8] ss:$12 sps:$4 sm:$0xff]  }
 0x6bf   : > { %3470 = vmatpush1.bf16.msra.mxu1 %v10130_v27 }
 0x6c0   : > { %3471 = vmatprep.subr.bf16.mxu1 %v10138_v29 }
 0x6c3   : > { %3472 = vmatpush1.bf16.msra.mxu1 %v10136_v31 }
 0x6c4   : > { %3473 = vmatprep.subr.bf16.mxu1 %v10144_v32 }
 0x6c7   : > { %3474 = vmatpush1.bf16.msra.mxu1 %v10142_v35 }
 0x6c8   : > { %3475 = vmatprep.subr.bf16.mxu1 %v10150_v42  ;;  %v10168_v42 = vld [vmem:[%s14310_s4 + $0x188] ss:$12 sps:$4 sm:$0xff]  }
 0x6cb   : > { %3476 = vmatpush1.bf16.msra.mxu1 %v10148_v38  ;;  %v10172_v38 = vld [vmem:[%s14310_s4 + $0x50] ss:$12 sps:$4 sm:$0xff]  }
 0x6cc   : > { %3477 = vmatprep.subr.bf16.mxu1 %v10156_v39  ;;  %v10173_v39 = vld [vmem:[%s14310_s4 + $0x128] ss:$12 sps:$4 sm:$0xff]  }
 0x6cf   : > { %3478 = vmatpush1.bf16.msra.mxu1 %v10154_v40  ;;  %v10176_v40 = vld [vmem:[%s14310_s4 + $0x140] ss:$12 sps:$4 sm:$0xff]  }
 0x6d0   : > { %9401 = vmatprep.subr.bf16.mxu1 %v10160_v8 }
 0x765   : > { %v2457_v55 = vpop.f32.mrb[24].mxu1 }
 0x766   : > { %v9606_v56 = vpop.f32.mrb[25].mxu1 }
 0x767   : > { %v2460_v57 = vpop.f32.mrb[26].mxu1 }
 0x768   : > { %v9607_v58 = vpop.f32.mrb[27].mxu1 }
 0x769   : > { %v3021_v58 = vld [vmem:[%s14311_s5] sm:$0x7] }
 0x76a   : > { %v3034_v11 = vrot.slane %v3021_v58, %v11546_v59 }
 0x76d   : > { %v2565_v60 = vpop.f32.mrb[28].mxu1 }
 0x76e   : > { %v9618_v61 = vpop.f32.mrb[29].mxu1 }
 0x76f   : > { %v2568_v62 = vpop.f32.mrb[30].mxu1 }
 0x770   : > { %v9619_v0 = vpop.f32.mrb[31].mxu1  ;;  %v3026_v62 = vrot.slane %v3021_v58, %v11455_v23 }
 0x771   : > { %v3030_v0 = vrot.slane %v3021_v58, %v11452_v22  ;;  %v10223_v58 = vld [vmem:[%s14314_s8 + $0x240] ss:$48 sps:$4 sm:$0xff]  }
 0x775   : > { %v2679_v1 = vpop.f32.mrb[32].mxu1 }
 0x776   : > { %v9774_v4 = vpack.i.bf16 %v2457_v55, %v2679_v1  ;;  %v9630_v5 = vpop.f32.mrb[33].mxu1  ;;  %v10186_v55 = vld [vmem:[%s14310_s4 + $0x230] ss:$12 sps:$4 sm:$0xff]  }
 0x777   : > { %v2682_v6 = vpop.f32.mrb[34].mxu1 }
 0x778   : > { %v9631_v41 = vpop.f32.mrb[35].mxu1 }
 0x77d   : > { %v2787_v9 = vpop.f32.mrb[36].mxu1 }
 0x77e   : > { %v9642_v19 = vpop.f32.mrb[37].mxu1 }
 0x77f   : > { %v2790_v12 = vpop.f32.mrb[38].mxu1 }
 0x780   : > { %v9643_v13 = vpop.f32.mrb[39].mxu1 }
 0x781   : > { %v11031_v13 = vld [vmem:[%s11221_s19] sm:$0xff] }
 0x785   : > { %v2901_v14 = vpop.f32.mrb[40].mxu1 }
 0x786   : > { %2916 = vrot.lane.b32.xlu1 %v2901_v14, %s11101_s0  ;;  %v9654_v15 = vpop.f32.mrb[41].mxu1 }
 0x787   : > { %v2904_v16 = vpop.f32.mrb[42].mxu1  ;;  %v11032_v15 = vld [vmem:[%s11221_s19 + $0x8] sm:$0xff] }
 0x788   : > { %v9655_v18 = vpop.f32.mrb[43].mxu1 }
 0x78a   : > { %9775 = vrot.lane.b32.xlu1 %v9774_v4, %s11101_s0 }
 0x7f8   : > { %v2917_v20 = vpop.permute.xlu1 %2916 }
 0x7f9   : > { %v2921_v3 = vsel %vm2241_vm1, %v2787_v9, %v2917_v20 }
 0x7fa   : > { %v12251_v25 = vpack.c.bf16 %v2921_v3, %v2921_v3 }
 0x7fc   : > { %3496 = vmatmul.mubr.bf16.vlgmr.msra.gmra.mrb[44].mxu1 %v12251_v25  ;;  %v9776_v27 = vpop.permute.xlu1 %9775 }
 0x7fd   : > { %9402 = vmatpush3.bf16.msra.mxu1 %v10161_v24  ;;  %v9778_v29 = vunpack.i.h.bf16 %v9776_v27  ;;  %v9777_v30 = vunpack.i.l.bf16 %v9776_v27 }
 0x7fe   : > { %9403 = vmatprep.subr.bf16.mxu1 %v10165_v26  ;;  %v11033_v26 = vld [vmem:[%s11221_s19 + $0x10] sm:$0xff]  ;;  %s9728_s19 = smul.u32 24, %s404_s15 }
 0x7ff   : > { %v2919_v31 = vsel %vm2241_vm1, %v12047_v37, %v9778_v29  ;;  %v2920_v32 = vsel %vm2241_vm1, %v2565_v60, %v9777_v30  ;;  %v10170_v37 = vld [vmem:[%s14310_s4 + $0x110] ss:$12 sps:$4 sm:$0xff]  }
 0x800   : > { %v2922_v34 = vpack.c.bf16 %v2919_v31, %v2919_v31  ;;  %v2923_v35 = vpack.c.bf16 %v2920_v32, %v2920_v32  ;;  %v10187_v31 = vld [vmem:[%s14314_s8] ss:$48 sps:$4 sm:$0xff]   ;;  %v10189_v32 = vld [vmem:[%s14314_s8 + $0x4] ss:$48 sps:$4 sm:$0xff]   ;;  %s14249_s16 = scalar_lea.vmem [#allocation2], %s9728_s19 }
 0x801   : > { %9404 = vmatpush3.bf16.msra.mxu1 %v10166_v28  ;;  %s8403_s18 = sshll.u32 %s14249_s16, 4  ;;  %s14263_s18 = int_to_ptr.vmem [resolvable:$true] %s8403_s18 }
 0x802   : > { %3454 = vmatprep.mubr.bf16.mxu0 %v2923_v35  ;;  %3536 = vmatprep.mubr.bf16.mxu1 %v2923_v35  ;;  %v10195_v35 = vld [vmem:[%s14314_s8 + $0x64] ss:$48 sps:$4 sm:$0xff]   ;;  %s11034_s30 = scalar_lea.vmem %s14263_s18, 384  ;;  %p11041_p0 = scmp.lt.s32.totalorder %s14263_s18, %s11039_s23 }
 0x803   : > { %3455 = vmatmul.mubr.bf16.vlgmr.msra.gmra.mrb[28].mxu0 %v2922_v34  ;;  %9405 = vmatprep.subr.bf16.mxu1 %v10167_v33  ;;  %v10190_v33 = vld [vmem:[%s14314_s8 + $0x8] ss:$48 sps:$4 sm:$0xff]   ;;  %p11035_p11 = scmp.ne.s32.totalorder %s14263_s18, %s11034_s30  ;;  %p11042_p1 = scmp.lt.s32.totalorder %s11040_s27, %s11034_s30 }
 0x804   : > { %9657 = vmatpush3.bf16.msra.mxu0 %v10168_v42  ;;  %9672 = vmatprep.mubr.msk.bf16.mxu0 %vm11100_vm0, %v11099_v2  ;;  %v10198_v42 = vld [vmem:[%s14314_s8 + $0x6c] ss:$48 sps:$4 sm:$0xff]  }
 0x805   : > { %9406 = vmatpush3.bf16.msra.mxu1 %v10169_v17  ;;  %9658 = vmatprep.subr.bf16.mxu0 %v11099_v2  ;;  %v10193_v17 = vld [vmem:[%s14314_s8 + $0x60] ss:$48 sps:$4 sm:$0xff]   ;;  %p11036_p12 = pnand %p11035_p11, %p11206_p5  ;;  %p11043_p2 = por %p11042_p1, %p11041_p0 }
 0x806   : > { %9407 = vmatprep.subr.bf16.mxu1 %v10170_v37  ;;  %v10196_v37 = vld [vmem:[%s14314_s8 + $0x68] ss:$48 sps:$4 sm:$0xff]  }
 0x807   : > { %p11037_p13 = pneg %p11036_p12 }
 0x808   : > { %9659 = vmatpush3.bf16.msra.mxu0 %v10171_v36  ;;  %v10201_v36 = vld [vmem:[%s14314_s8 + $0xc4] ss:$48 sps:$4 sm:$0xff]  }
 0x809   : > { %9408 = vmatpush3.bf16.msra.mxu1 %v10172_v38  ;;  %9660 = vmatprep.subr.bf16.mxu0 %v11099_v2  ;;  %v10204_v38 = vld [vmem:[%s14314_s8 + $0xcc] ss:$48 sps:$4 sm:$0xff]   ;;  %p11044_p3 = pnand %p11043_p2, %p11037_p13 }
 0x80a   : > { %9409 = vmatprep.subr.bf16.mxu1 %v10173_v39  ;;  %v10199_v39 = vld [vmem:[%s14314_s8 + $0xc0] ss:$48 sps:$4 sm:$0xff]  }
 0x80c   : > { %9661 = vmatpush3.bf16.msra.mxu0 %v10174_v43  ;;  %v10202_v43 = vld [vmem:[%s14314_s8 + $0xc8] ss:$48 sps:$4 sm:$0xff]  }
 0x80d   : > { %9410 = vmatpush3.bf16.msra.mxu1 %v10175_v45  ;;  %9662 = vmatprep.subr.bf16.mxu0 %v11099_v2  ;;  %v10207_v45 = vld [vmem:[%s14314_s8 + $0x124] ss:$48 sps:$4 sm:$0xff]  }
 0x80e   : > { %9411 = vmatprep.subr.bf16.mxu1 %v10176_v40  ;;  %v10210_v40 = vld [vmem:[%s14314_s8 + $0x12c] ss:$48 sps:$4 sm:$0xff]  }
 0x810   : > { %9663 = vmatpush3.bf16.msra.mxu0 %v10177_v63  ;;  %v10205_v63 = vld [vmem:[%s14314_s8 + $0x120] ss:$48 sps:$4 sm:$0xff]  }
 0x811   : > { %9412 = vmatpush3.bf16.msra.mxu1 %v10178_v46  ;;  %9664 = vmatprep.subr.bf16.mxu0 %v11099_v2  ;;  %v10208_v46 = vld [vmem:[%s14314_s8 + $0x128] ss:$48 sps:$4 sm:$0xff]  }
 0x812   : > { %9413 = vmatprep.subr.bf16.mxu1 %v10179_v47  ;;  %v10213_v47 = vld [vmem:[%s14314_s8 + $0x184] ss:$48 sps:$4 sm:$0xff]  }
 0x814   : > { %9665 = vmatpush3.bf16.msra.mxu0 %v10180_v48  ;;  %v10216_v48 = vld [vmem:[%s14314_s8 + $0x18c] ss:$48 sps:$4 sm:$0xff]  }
 0x815   : > { %9414 = vmatpush3.bf16.msra.mxu1 %v10181_v44  ;;  %9666 = vmatprep.subr.bf16.mxu0 %v11099_v2  ;;  %v10211_v44 = vld [vmem:[%s14314_s8 + $0x180] ss:$48 sps:$4 sm:$0xff]  }
 0x816   : > { %9415 = vmatprep.subr.bf16.mxu1 %v10182_v50  ;;  %v10214_v50 = vld [vmem:[%s14314_s8 + $0x188] ss:$48 sps:$4 sm:$0xff]  }
 0x818   : > { %9667 = vmatpush3.bf16.msra.mxu0 %v10183_v52  ;;  %v10219_v52 = vld [vmem:[%s14314_s8 + $0x1e4] ss:$48 sps:$4 sm:$0xff]  }
 0x819   : > { %9416 = vmatpush3.bf16.msra.mxu1 %v10184_v53  ;;  %9668 = vmatprep.subr.bf16.mxu0 %v11099_v2  ;;  %v10222_v53 = vld [vmem:[%s14314_s8 + $0x1ec] ss:$48 sps:$4 sm:$0xff]  }
 0x81a   : > { %5443 = vmatprep.subr.bf16.mxu1 %v10189_v32  ;;  %v10256_v32 = vld [vmem:[%s14314_s8 + $0x428] ss:$48 sps:$4 sm:$0xff]  }
 0x81c   : > { %3537 = vmatmul.mubr.bf16.vlgmr.msra.gmra.mrb[48].mxu1 %v2922_v34  ;;  %9669 = vmatpush3.bf16.msra.mxu0 %v10185_v54  ;;  %v10192_v34 = vld [vmem:[%s14314_s8 + $0xc] ss:$48 sps:$4 sm:$0xff]   ;;  %v10217_v54 = vld [vmem:[%s14314_s8 + $0x1e0] ss:$48 sps:$4 sm:$0xff]  }
 0x81d   : > { %9670 = vmatprep.subr.bf16.mxu0 %v11099_v2  ;;  %5444 = vmatpush1.bf16.msra.mxu1 %v10187_v31  ;;  %v10253_v31 = vld [vmem:[%s14314_s8 + $0x420] ss:$48 sps:$4 sm:$0xff]  }
 0x81e   : > { %5445 = vmatprep.subr.bf16.mxu1 %v10195_v35  ;;  %v10262_v35 = vld [vmem:[%s14314_s8 + $0x488] ss:$48 sps:$4 sm:$0xff]  }
 0x820   : > { %9671 = vmatpush3.bf16.msra.mxu0 %v10186_v55  ;;  %v10220_v55 = vld [vmem:[%s14314_s8 + $0x1e8] ss:$48 sps:$4 sm:$0xff]  }
 0x821   : > { %5525 = vmatprep.subr.bf16.mxu0 %v10192_v34  ;;  %5446 = vmatpush1.bf16.msra.mxu1 %v10193_v17  ;;  %v10261_v34 = vld [vmem:[%s14314_s8 + $0x484] ss:$48 sps:$4 sm:$0xff]  }
 0x822   : > { %5447 = vmatprep.subr.bf16.mxu1 %v10201_v36  ;;  %v10267_v17 = vld [vmem:[%s14314_s8 + $0x4e4] ss:$48 sps:$4 sm:$0xff]   ;;  %v10265_v36 = vld [vmem:[%s14314_s8 + $0x4e0] ss:$48 sps:$4 sm:$0xff]  }
 0x823   : > { %9673 = vmatmul.mubr.bf16.vlgmr.msra.gmra.mrb[32].mxu0 %v12251_v25 }
 0x824   : > { %5526 = vmatpush1.bf16.msra.mxu0 %v10190_v33  ;;  %v10259_v33 = vld [vmem:[%s14314_s8 + $0x480] ss:$48 sps:$4 sm:$0xff]  }
 0x825   : > { %5527 = vmatprep.subr.bf16.mxu0 %v10198_v42  ;;  %5448 = vmatpush1.bf16.msra.mxu1 %v10199_v39  ;;  %v10264_v42 = vld [vmem:[%s14314_s8 + $0x48c] ss:$48 sps:$4 sm:$0xff]   ;;  %v10273_v39 = vld [vmem:[%s14314_s8 + $0x544] ss:$48 sps:$4 sm:$0xff]  }
 0x826   : > { %5449 = vmatprep.subr.bf16.mxu1 %v10207_v45  ;;  %v10271_v45 = vld [vmem:[%s14314_s8 + $0x540] ss:$48 sps:$4 sm:$0xff]  }
 0x828   : > { %5528 = vmatpush1.bf16.msra.mxu0 %v10196_v37  ;;  %v10270_v37 = vld [vmem:[%s14314_s8 + $0x4ec] ss:$48 sps:$4 sm:$0xff]  }
 0x829   : > { %5529 = vmatprep.subr.bf16.mxu0 %v10204_v38  ;;  %5450 = vmatpush1.bf16.msra.mxu1 %v10205_v63  ;;  %v10268_v38 = vld [vmem:[%s14314_s8 + $0x4e8] ss:$48 sps:$4 sm:$0xff]   ;;  %v10279_v63 = vld [vmem:[%s14314_s8 + $0x5a4] ss:$48 sps:$4 sm:$0xff]  }
 0x82a   : > { %5451 = vmatprep.subr.bf16.mxu1 %v10213_v47  ;;  %v10277_v47 = vld [vmem:[%s14314_s8 + $0x5a0] ss:$48 sps:$4 sm:$0xff]  }
 0x82c   : > { %5530 = vmatpush1.bf16.msra.mxu0 %v10202_v43  ;;  %v10276_v43 = vld [vmem:[%s14314_s8 + $0x54c] ss:$48 sps:$4 sm:$0xff]  }
 0x82d   : > { %5531 = vmatprep.subr.bf16.mxu0 %v10210_v40  ;;  %5452 = vmatpush1.bf16.msra.mxu1 %v10211_v44  ;;  %v10274_v40 = vld [vmem:[%s14314_s8 + $0x548] ss:$48 sps:$4 sm:$0xff]   ;;  %v10285_v44 = vld [vmem:[%s14314_s8 + $0x604] ss:$48 sps:$4 sm:$0xff]  }
 0x82e   : > { %5453 = vmatprep.subr.bf16.mxu1 %v10219_v52 }
 0x830   : > { %5532 = vmatpush1.bf16.msra.mxu0 %v10208_v46  ;;  %v10282_v46 = vld [vmem:[%s14314_s8 + $0x5ac] ss:$48 sps:$4 sm:$0xff]  }
 0x831   : > { %5533 = vmatprep.subr.bf16.mxu0 %v10216_v48  ;;  %5454 = vmatpush1.bf16.msra.mxu1 %v10217_v54  ;;  %v10280_v48 = vld [vmem:[%s14314_s8 + $0x5a8] ss:$48 sps:$4 sm:$0xff]  }
 0x834   : > { %5534 = vmatpush1.bf16.msra.mxu0 %v10214_v50  ;;  %v10288_v50 = vld [vmem:[%s14314_s8 + $0x60c] ss:$48 sps:$4 sm:$0xff]  }
 0x835   : > { %5535 = vmatprep.subr.bf16.mxu0 %v10222_v53 }
 0x838   : > { %5536 = vmatpush1.bf16.msra.mxu0 %v10220_v55  ;;  %v12563_v55 = vld [vmem:[%s14312_s6] sm:$0x7] }
 0x8cf   : > { %v3497_v56 = vpop.f32.mrb[44].mxu1 }
 0x8d0   : > { %v3499_v57 = vpop.f32.mrb[45].mxu1 }
 0x8d1   : > { %v3501_v60 = vpop.f32.mrb[46].mxu1 }
 0x8d2   : > { %v3502_v61 = vpop.f32.mrb[47].mxu1  ;;  %v10226_v60 = vld [vmem:[%s14314_s8 + $0x248] ss:$48 sps:$4 sm:$0xff]  }
 0x8d3   : > { %v10231_v61 = vld [vmem:[%s14314_s8 + $0x2a4] ss:$48 sps:$4 sm:$0xff]  }
 0x8d6   : > { %v3456_v1 = vpop.f32.mrb[28].mxu0 }
 0x8d7   : > { %v3457_v4 = vadd.f32 %v3456_v1, %v3026_v62  ;;  %v3458_v2 = vpop.f32.mrb[29].mxu0  ;;  %v10234_v62 = vld [vmem:[%s14314_s8 + $0x2ac] ss:$48 sps:$4 sm:$0xff]   ;;  %v10232_v1 = vld [vmem:[%s14314_s8 + $0x2a8] ss:$48 sps:$4 sm:$0xff]  }
 0x8d8   : > { %v3459_v5 = vadd.f32 %v3458_v2, %v3030_v0  ;;  %v3460_v6 = vpop.f32.mrb[30].mxu0  ;;  %v10229_v0 = vld [vmem:[%s14314_s8 + $0x2a0] ss:$48 sps:$4 sm:$0xff]   ;;  %v10240_v2 = vld [vmem:[%s14314_s8 + $0x30c] ss:$48 sps:$4 sm:$0xff]  }
 0x8d9   : > { %v3498_v41 = vadd.f32 %v3497_v56, %v3457_v4  ;;  %v3461_v51 = vpop.f32.mrb[31].mxu0  ;;  %v10225_v56 = vld [vmem:[%s14314_s8 + $0x244] ss:$48 sps:$4 sm:$0xff]   ;;  %v10238_v6 = vld [vmem:[%s14314_s8 + $0x308] ss:$48 sps:$4 sm:$0xff]  }
 0x8da   : > { %v3500_v7 = vadd.f32 %v3499_v57, %v3459_v5  ;;  %v10228_v57 = vld [vmem:[%s14314_s8 + $0x24c] ss:$48 sps:$4 sm:$0xff]   ;;  %5455 = vmatprep.subr.bf16.mxu1 %v10225_v56  ;;  %v10237_v4 = vld [vmem:[%s14314_s8 + $0x304] ss:$48 sps:$4 sm:$0xff]   ;;  %v10235_v5 = vld [vmem:[%s14314_s8 + $0x300] ss:$48 sps:$4 sm:$0xff]  }
 0x8db   : > { %v12340_v14 = vadd.f32 %v11031_v13, %v3498_v41  ;;  %5537 = vmatprep.subr.bf16.mxu0 %v10228_v57  ;;  %5456 = vmatpush1.bf16.msra.mxu1 %v10223_v58  ;;  %v10243_v41 = vld [vmem:[%s14314_s8 + $0x364] ss:$48 sps:$4 sm:$0xff]   ;;  %v10246_v51 = vld [vmem:[%s14314_s8 + $0x36c] ss:$48 sps:$4 sm:$0xff]   ;;  %v12568_v56 = vld [vmem:[%s14313_s7] sm:$0x7]  ;;  %v3618_v57 = vrot.slane %v12563_v55, %v11452_v22  ;;  %v3614_v58 = vrot.slane %v12563_v55, %v11455_v23 }
 0x8dc   : > { %v12343_v16 = vadd.f32 %v11032_v15, %v3500_v7  ;;  %5538 = vmatpush1.bf16.msra.mxu0 %v10226_v60  ;;  %5457 = vmatprep.subr.bf16.mxu1 %v10231_v61  ;;  %v10241_v7 = vld [vmem:[%s14314_s8 + $0x360] ss:$48 sps:$4 sm:$0xff]  }
 0x8dd   : > { %5539 = vmatprep.subr.bf16.mxu0 %v10234_v62  ;;  %v3637_v62 = vrot.slane %v12568_v56, %v11452_v22 }
 0x8de   : > { %v3589_v30 = vadd.f32 %v12343_v16, %v12340_v14 }
 0x8df   : > { %5458 = vmatpush1.bf16.msra.mxu1 %v10229_v0 }
 0x8e0   : > { %5540 = vmatpush1.bf16.msra.mxu0 %v10232_v1  ;;  %5459 = vmatprep.subr.bf16.mxu1 %v10237_v4  ;;  %v3633_v1 = vrot.slane %v12568_v56, %v11455_v23 }
 0x8e1   : > { %5541 = vmatprep.subr.bf16.mxu0 %v10240_v2 }
 0x8e3   : > { %5460 = vmatpush1.bf16.msra.mxu1 %v10235_v5 }
 0x8e4   : > { %5542 = vmatpush1.bf16.msra.mxu0 %v10238_v6  ;;  %5461 = vmatprep.subr.bf16.mxu1 %v10243_v41 }
 0x8e5   : > { %5543 = vmatprep.subr.bf16.mxu0 %v10246_v51  ;;  %v10283_v51 = vld [vmem:[%s14314_s8 + $0x600] ss:$48 sps:$4 sm:$0xff]  }
 0x8e7   : > { %5462 = vmatpush1.bf16.msra.mxu1 %v10241_v7  ;;  %v10286_v7 = vld [vmem:[%s14314_s8 + $0x608] ss:$48 sps:$4 sm:$0xff]  }
 0x8ef   : > { %v9417_v8 = vpop.f32.mrb[48].mxu1 }
 0x8f0   : > { %v9418_v9 = vpop.f32.mrb[49].mxu1 }
 0x8f1   : > { %v9419_v10 = vadd.f32 %v9418_v9, %v9417_v8  ;;  %v9420_v19 = vpop.f32.mrb[50].mxu1  ;;  %v10244_v8 = vld [vmem:[%s14314_s8 + $0x368] ss:$48 sps:$4 sm:$0xff]   ;;  %v10249_v9 = vld [vmem:[%s14314_s8 + $0x3c4] ss:$48 sps:$4 sm:$0xff]  }
 0x8f2   : > { %v9421_v12 = vpop.f32.mrb[51].mxu1  ;;  %v10247_v19 = vld [vmem:[%s14314_s8 + $0x3c0] ss:$48 sps:$4 sm:$0xff]   ;;  %5544 = vmatpush1.bf16.msra.mxu0 %v10244_v8  ;;  %5463 = vmatprep.subr.bf16.mxu1 %v10249_v9  ;;  %v10291_v9 = vld [vmem:[%s14314_s8 + $0x664] ss:$48 sps:$4 sm:$0xff]  }
 0x8f3   : > { %v3539_v18 = vadd.f32 %v9419_v10, %v3034_v11  ;;  %v10252_v10 = vld [vmem:[%s14314_s8 + $0x3cc] ss:$48 sps:$4 sm:$0xff]   ;;  %v10250_v11 = vld [vmem:[%s14314_s8 + $0x3c8] ss:$48 sps:$4 sm:$0xff]   ;;  %5464 = vmatpush1.bf16.msra.mxu1 %v10247_v19  ;;  %v10289_v19 = vld [vmem:[%s14314_s8 + $0x660] ss:$48 sps:$4 sm:$0xff]  }
 0x8f4   : > { %5545 = vmatprep.subr.bf16.mxu0 %v10252_v10  ;;  %v10294_v10 = vld [vmem:[%s14314_s8 + $0x66c] ss:$48 sps:$4 sm:$0xff]  }
 0x8f6   : > { %v3578_v20 = vpop.f32.mrb[32].mxu0  ;;  %5546 = vmatpush1.bf16.msra.mxu0 %v10250_v11  ;;  %v10292_v11 = vld [vmem:[%s14314_s8 + $0x668] ss:$48 sps:$4 sm:$0xff]  }
 0x8f7   : > { %v3579_v3 = vadd.f32 %v3578_v20, %v3539_v18  ;;  %v9674_v24 = vpop.f32.mrb[33].mxu0 }
 0x8f8   : > { %v3581_v25 = vpop.f32.mrb[34].mxu0 }
 0x8f9   : > { %v12346_v27 = vadd.f32 %v11033_v26, %v3579_v3  ;;  %v9675_v29 = vpop.f32.mrb[35].mxu0 }
 0x8fb   : > { %v3590_v28 = vadd.f32 %v3589_v30, %v12346_v27  ;;  %v10255_v30 = vld [vmem:[%s14314_s8 + $0x424] ss:$48 sps:$4 sm:$0xff]  }
 0x8fc   : > { %5465 = vmatprep.subr.bf16.mxu1 %v10255_v30  ;;  %v10312_v30 = vld [vmem:[%s14314_s8 + $0x78c] ss:$48 sps:$4 sm:$0xff]  }
 0x8fd   : > { %3591 = vadd.xlane.f32.xlu1 %v3590_v28  ;;  %v10258_v28 = vld [vmem:[%s14314_s8 + $0x42c] ss:$48 sps:$4 sm:$0xff]   ;;  %5466 = vmatpush1.bf16.msra.mxu1 %v10253_v31  ;;  %v10310_v31 = vld [vmem:[%s14314_s8 + $0x788] ss:$48 sps:$4 sm:$0xff]  }
 0x8fe   : > { %5547 = vmatprep.subr.bf16.mxu0 %v10258_v28  ;;  %5467 = vmatprep.subr.bf16.mxu1 %v10261_v34  ;;  %v10307_v28 = vld [vmem:[%s14314_s8 + $0x780] ss:$48 sps:$4 sm:$0xff]  }
 0x8ff   : > { %5548 = vmatpush1.bf16.msra.mxu0 %v10256_v32  ;;  %v10315_v32 = vld [vmem:[%s14314_s8 + $0x7e4] ss:$48 sps:$4 sm:$0xff]   ;;  %v10313_v34 = vld [vmem:[%s14314_s8 + $0x7e0] ss:$48 sps:$4 sm:$0xff]  }
 0x900   : > { %5549 = vmatprep.subr.bf16.mxu0 %v10264_v42  ;;  %v10321_v42 = vld [vmem:[%s14314_s8 + $0x844] ss:$48 sps:$4 sm:$0xff]  }
 0x901   : > { %5468 = vmatpush1.bf16.msra.mxu1 %v10259_v33  ;;  %v10318_v33 = vld [vmem:[%s14314_s8 + $0x7ec] ss:$48 sps:$4 sm:$0xff]  }
 0x902   : > { %5469 = vmatprep.subr.bf16.mxu1 %v10267_v17  ;;  %v10324_v17 = vld [vmem:[%s14314_s8 + $0x84c] ss:$48 sps:$4 sm:$0xff]  }
 0x903   : > { %5550 = vmatpush1.bf16.msra.mxu0 %v10262_v35  ;;  %v10316_v35 = vld [vmem:[%s14314_s8 + $0x7e8] ss:$48 sps:$4 sm:$0xff]  }
 0x904   : > { %5551 = vmatprep.subr.bf16.mxu0 %v10270_v37 }
 0x905   : > { %5470 = vmatpush1.bf16.msra.mxu1 %v10265_v36  ;;  %v3622_v36 = vrot.slane %v12563_v55, %v11546_v59  ;;  %v10342_v55 = vld [vmem:[%s14314_s8 + $0x7c] ss:$48 sps:$4 sm:$0xff]  }
 0x906   : > { %5471 = vmatprep.subr.bf16.mxu1 %v10273_v39  ;;  %v10322_v39 = vld [vmem:[%s14314_s8 + $0x848] ss:$48 sps:$4 sm:$0xff]  }
 0x907   : > { %5552 = vmatpush1.bf16.msra.mxu0 %v10268_v38  ;;  %v10319_v38 = vld [vmem:[%s14314_s8 + $0x840] ss:$48 sps:$4 sm:$0xff]  }
 0x908   : > { %5553 = vmatprep.subr.bf16.mxu0 %v10276_v43  ;;  %v10327_v43 = vld [vmem:[%s14314_s8 + $0x8a4] ss:$48 sps:$4 sm:$0xff]  }
 0x909   : > { %5472 = vmatpush1.bf16.msra.mxu1 %v10271_v45 }
 0x90a   : > { %5473 = vmatprep.subr.bf16.mxu1 %v10279_v63  ;;  %v10325_v63 = vld [vmem:[%s14314_s8 + $0x8a0] ss:$48 sps:$4 sm:$0xff]  }
 0x90b   : > { %5554 = vmatpush1.bf16.msra.mxu0 %v10274_v40  ;;  %v3641_v40 = vrot.slane %v12568_v56, %v11546_v59  ;;  %v10337_v56 = vld [vmem:[%s14314_s8 + $0x70] ss:$48 sps:$4 sm:$0xff]  }
 0x90c   : > { %5555 = vmatprep.subr.bf16.mxu0 %v10282_v46  ;;  %v10328_v46 = vld [vmem:[%s14314_s8 + $0x8a8] ss:$48 sps:$4 sm:$0xff]  }
 0x90d   : > { %5474 = vmatpush1.bf16.msra.mxu1 %v10277_v47 }
 0x90e   : > { %5484 = vmatprep.subr.bf16.mxu1 %v10285_v44  ;;  %v10336_v44 = vld [vmem:[%s14314_s8 + $0x1c] ss:$48 sps:$4 sm:$0xff]  }
 0x90f   : > { %5556 = vmatpush1.bf16.msra.mxu0 %v10280_v48  ;;  %v10333_v48 = vld [vmem:[%s14314_s8 + $0x14] ss:$48 sps:$4 sm:$0xff]  }
 0x910   : > { %5566 = vmatprep.subr.bf16.mxu0 %v10288_v50  ;;  %v10331_v50 = vld [vmem:[%s14314_s8 + $0x10] ss:$48 sps:$4 sm:$0xff]  }
 0x98a   : > { %v3592_v12 = vpop.xlane.xlu1 %3591 }
 0x98b   : > { %v3593_v13 = vmul.f32 0.0026041667, %v3592_v12  ;;  %v10297_v12 = vld [vmem:[%s14314_s8 + $0x6c4] ss:$48 sps:$4 sm:$0xff]  }
 0x98d   : > { %v12484_v15 = vsub.f32 %v12340_v14, %v3593_v13  ;;  %v3595_v18 = vsub.f32 %v12343_v16, %v3593_v13  ;;  %v12488_v20 = vsub.f32 %v12346_v27, %v3593_v13  ;;  %v10300_v13 = vld [vmem:[%s14314_s8 + $0x6cc] ss:$48 sps:$4 sm:$0xff]  }
 0x98f   : > { %v3597_v3 = vmul.f32 %v12484_v15, %v12484_v15  ;;  %v3598_v24 = vmul.f32 %v3595_v18, %v3595_v18  ;;  %v3599_v25 = vmul.f32 %v12488_v20, %v12488_v20 }
 0x991   : > { %v3600_v26 = vadd.f32 %v3598_v24, %v3597_v3  ;;  %v10303_v3 = vld [vmem:[%s14314_s8 + $0x724] ss:$48 sps:$4 sm:$0xff]   ;;  %v10306_v24 = vld [vmem:[%s14314_s8 + $0x72c] ss:$48 sps:$4 sm:$0xff]  }
 0x993   : > { %v3601_v29 = vadd.f32 %v3600_v26, %v3599_v25  ;;  %v10301_v25 = vld [vmem:[%s14314_s8 + $0x720] ss:$48 sps:$4 sm:$0xff]   ;;  %v10304_v26 = vld [vmem:[%s14314_s8 + $0x728] ss:$48 sps:$4 sm:$0xff]  }
 0x995   : > { %3602 = vadd.xlane.f32.xlu0 %v3601_v29  ;;  %v10309_v29 = vld [vmem:[%s14314_s8 + $0x784] ss:$48 sps:$4 sm:$0xff]  }
 0xa22   : > { %v3603_v52 = vpop.xlane.xlu0 %3602 }
 0xa23   : > { %v3604_v53 = vmul.f32 0.0026041667, %v3603_v52 }
 0xa25   : > { %v3605_v54 = vadd.f32 1e-05, %v3604_v53  ;;  %v10334_v53 = vld [vmem:[%s14314_s8 + $0x18] ss:$48 sps:$4 sm:$0xff]  }
 0xa27   : > { %11029 = vrsqrt.f32 %v3605_v54  ;;  %v10339_v54 = vld [vmem:[%s14314_s8 + $0x74] ss:$48 sps:$4 sm:$0xff]  }
 0xa31   : > { %v11030_v60 = vpop.eup %11029 }
 0xa32   : > { %v3608_v61 = vmul.f32 %v11030_v60, %v3595_v18  ;;  %v3607_v0 = vmul.f32 %v11030_v60, %v12484_v15  ;;  %v10295_v15 = vld [vmem:[%s14314_s8 + $0x6c0] ss:$48 sps:$4 sm:$0xff]   ;;  %v10298_v18 = vld [vmem:[%s14314_s8 + $0x6c8] ss:$48 sps:$4 sm:$0xff]   ;;  %v3609_v37 = vmul.f32 %v11030_v60, %v12488_v20  ;;  %v10330_v20 = vld [vmem:[%s14314_s8 + $0x8ac] ss:$48 sps:$4 sm:$0xff]  }
 0xa33   : > { %v10348_v60 = vld [vmem:[%s14314_s8 + $0xdc] ss:$48 sps:$4 sm:$0xff]  }
 0xa34   : > { %v3627_v4 = vmul.f32 %v3618_v57, %v3608_v61  ;;  %v3626_v2 = vmul.f32 %v3614_v58, %v3607_v0  ;;  %v3628_v45 = vmul.f32 %v3622_v36, %v3609_v37  ;;  %v10340_v57 = vld [vmem:[%s14314_s8 + $0x78] ss:$48 sps:$4 sm:$0xff]   ;;  %v10345_v58 = vld [vmem:[%s14314_s8 + $0xd4] ss:$48 sps:$4 sm:$0xff]   ;;  %v10343_v61 = vld [vmem:[%s14314_s8 + $0xd0] ss:$48 sps:$4 sm:$0xff]  }
 0xa35   : > { %v10351_v0 = vld [vmem:[%s14314_s8 + $0x134] ss:$48 sps:$4 sm:$0xff]   ;;  %v10391_v37 = vld [vmem:[%s14314_s8 + $0x3d0] ss:$48 sps:$4 sm:$0xff]   ;;  %v10394_v36 = vld [vmem:[%s14314_s8 + $0x3d8] ss:$48 sps:$4 sm:$0xff]  }
 0xa36   : > { %v3646_v5 = vadd.f32 %v3637_v62, %v3627_v4  ;;  %v3645_v6 = vadd.f32 %v3633_v1, %v3626_v2  ;;  %v3647_v47 = vadd.f32 %v3641_v40, %v3628_v45  ;;  %v10346_v62 = vld [vmem:[%s14314_s8 + $0xd8] ss:$48 sps:$4 sm:$0xff]   ;;  %v10354_v1 = vld [vmem:[%s14314_s8 + $0x13c] ss:$48 sps:$4 sm:$0xff]   ;;  %v10349_v4 = vld [vmem:[%s14314_s8 + $0x130] ss:$48 sps:$4 sm:$0xff]  }
 0xa37   : > { %v10352_v2 = vld [vmem:[%s14314_s8 + $0x138] ss:$48 sps:$4 sm:$0xff]   ;;  %v10405_v45 = vld [vmem:[%s14314_s8 + $0x494] ss:$48 sps:$4 sm:$0xff]   ;;  %v10408_v40 = vld [vmem:[%s14314_s8 + $0x49c] ss:$48 sps:$4 sm:$0xff]  }
 0xa38   : > { %v12579_v41 = vpack.c.bf16 %v3646_v5, %v3646_v5  ;;  %v12587_v8 = vpack.c.bf16 %v3645_v6, %v3645_v6  ;;  %v12693_v52 = vpack.c.bf16 %v3647_v47, %v3647_v47  ;;  %v10357_v5 = vld [vmem:[%s14314_s8 + $0x194] ss:$48 sps:$4 sm:$0xff]   ;;  %v10360_v6 = vld [vmem:[%s14314_s8 + $0x19c] ss:$48 sps:$4 sm:$0xff]  }
 0xa39   : > { %v10411_v47 = vld [vmem:[%s14314_s8 + $0x4f4] ss:$48 sps:$4 sm:$0xff]  }
 0xa3a   : > { %5475 = vmatprep.mubr.bf16.mxu1 %v12579_v41  ;;  %5557 = vmatprep.mubr.bf16.mxu0 %v12579_v41 }
 0xa3b   : > { %5476 = vmatmul.mubr.bf16.vlgmr.msra.gmra.mrb[52].mxu1 %v12587_v8  ;;  %5558 = vmatmul.mubr.bf16.vlgmr.msra.gmra.mrb[36].mxu0 %v12587_v8 }
 0xa3c   : > { %5485 = vmatpush1.bf16.msra.mxu1 %v10283_v51  ;;  %5567 = vmatpush1.bf16.msra.mxu0 %v10286_v7  ;;  %v10355_v51 = vld [vmem:[%s14314_s8 + $0x190] ss:$48 sps:$4 sm:$0xff]   ;;  %v10358_v7 = vld [vmem:[%s14314_s8 + $0x198] ss:$48 sps:$4 sm:$0xff]  }
 0xa3d   : > { %5486 = vmatprep.subr.bf16.mxu1 %v10291_v9  ;;  %5568 = vmatprep.subr.bf16.mxu0 %v10294_v10  ;;  %v10363_v9 = vld [vmem:[%s14314_s8 + $0x1f4] ss:$48 sps:$4 sm:$0xff]   ;;  %v10366_v10 = vld [vmem:[%s14314_s8 + $0x1fc] ss:$48 sps:$4 sm:$0xff]  }
 0xa3e   : > { %5516 = vmatprep.mubr.bf16.mxu1 %v11098_v49  ;;  %5598 = vmatprep.mubr.bf16.mxu0 %v11098_v49 }
 0xa40   : > { %5487 = vmatpush1.bf16.msra.mxu1 %v10289_v19  ;;  %5569 = vmatpush1.bf16.msra.mxu0 %v10292_v11  ;;  %v10361_v19 = vld [vmem:[%s14314_s8 + $0x1f0] ss:$48 sps:$4 sm:$0xff]   ;;  %v10364_v11 = vld [vmem:[%s14314_s8 + $0x1f8] ss:$48 sps:$4 sm:$0xff]  }
 0xa41   : > { %5488 = vmatprep.subr.bf16.mxu1 %v10297_v12  ;;  %5570 = vmatprep.subr.bf16.mxu0 %v10300_v13  ;;  %v10369_v12 = vld [vmem:[%s14314_s8 + $0x254] ss:$48 sps:$4 sm:$0xff]   ;;  %v10372_v13 = vld [vmem:[%s14314_s8 + $0x25c] ss:$48 sps:$4 sm:$0xff]  }
 0xa44   : > { %5489 = vmatpush1.bf16.msra.mxu1 %v10295_v15  ;;  %5571 = vmatpush1.bf16.msra.mxu0 %v10298_v18  ;;  %v10367_v15 = vld [vmem:[%s14314_s8 + $0x250] ss:$48 sps:$4 sm:$0xff]   ;;  %v10370_v18 = vld [vmem:[%s14314_s8 + $0x258] ss:$48 sps:$4 sm:$0xff]  }
 0xa45   : > { %5490 = vmatprep.subr.bf16.mxu1 %v10303_v3  ;;  %5572 = vmatprep.subr.bf16.mxu0 %v10306_v24  ;;  %v10375_v3 = vld [vmem:[%s14314_s8 + $0x2b4] ss:$48 sps:$4 sm:$0xff]   ;;  %v10378_v24 = vld [vmem:[%s14314_s8 + $0x2bc] ss:$48 sps:$4 sm:$0xff]  }
 0xa48   : > { %5491 = vmatpush1.bf16.msra.mxu1 %v10301_v25  ;;  %5573 = vmatpush1.bf16.msra.mxu0 %v10304_v26  ;;  %v10373_v25 = vld [vmem:[%s14314_s8 + $0x2b0] ss:$48 sps:$4 sm:$0xff]   ;;  %v10376_v26 = vld [vmem:[%s14314_s8 + $0x2b8] ss:$48 sps:$4 sm:$0xff]  }
 0xa49   : > { %5492 = vmatprep.subr.bf16.mxu1 %v10309_v29  ;;  %5574 = vmatprep.subr.bf16.mxu0 %v10312_v30  ;;  %v10381_v29 = vld [vmem:[%s14314_s8 + $0x314] ss:$48 sps:$4 sm:$0xff]   ;;  %v10384_v30 = vld [vmem:[%s14314_s8 + $0x31c] ss:$48 sps:$4 sm:$0xff]  }
 0xa4c   : > { %5493 = vmatpush1.bf16.msra.mxu1 %v10307_v28  ;;  %5575 = vmatpush1.bf16.msra.mxu0 %v10310_v31  ;;  %v10379_v28 = vld [vmem:[%s14314_s8 + $0x310] ss:$48 sps:$4 sm:$0xff]   ;;  %v10382_v31 = vld [vmem:[%s14314_s8 + $0x318] ss:$48 sps:$4 sm:$0xff]  }
 0xa4d   : > { %5494 = vmatprep.subr.bf16.mxu1 %v10315_v32  ;;  %5576 = vmatprep.subr.bf16.mxu0 %v10318_v33  ;;  %v10387_v32 = vld [vmem:[%s14314_s8 + $0x374] ss:$48 sps:$4 sm:$0xff]   ;;  %v10390_v33 = vld [vmem:[%s14314_s8 + $0x37c] ss:$48 sps:$4 sm:$0xff]  }
 0xa50   : > { %5495 = vmatpush1.bf16.msra.mxu1 %v10313_v34  ;;  %5577 = vmatpush1.bf16.msra.mxu0 %v10316_v35  ;;  %v10385_v34 = vld [vmem:[%s14314_s8 + $0x370] ss:$48 sps:$4 sm:$0xff]   ;;  %v10388_v35 = vld [vmem:[%s14314_s8 + $0x378] ss:$48 sps:$4 sm:$0xff]  }
 0xa51   : > { %5496 = vmatprep.subr.bf16.mxu1 %v10321_v42  ;;  %5578 = vmatprep.subr.bf16.mxu0 %v10324_v17  ;;  %v10393_v42 = vld [vmem:[%s14314_s8 + $0x3d4] ss:$48 sps:$4 sm:$0xff]   ;;  %v10396_v17 = vld [vmem:[%s14314_s8 + $0x3dc] ss:$48 sps:$4 sm:$0xff]  }
 0xa54   : > { %5497 = vmatpush1.bf16.msra.mxu1 %v10319_v38  ;;  %5579 = vmatpush1.bf16.msra.mxu0 %v10322_v39  ;;  %v10399_v38 = vld [vmem:[%s14314_s8 + $0x434] ss:$48 sps:$4 sm:$0xff]   ;;  %v10402_v39 = vld [vmem:[%s14314_s8 + $0x43c] ss:$48 sps:$4 sm:$0xff]  }
 0xa55   : > { %5498 = vmatprep.subr.bf16.mxu1 %v10327_v43  ;;  %5580 = vmatprep.subr.bf16.mxu0 %v10330_v20  ;;  %v10397_v43 = vld [vmem:[%s14314_s8 + $0x430] ss:$48 sps:$4 sm:$0xff]   ;;  %v10400_v20 = vld [vmem:[%s14314_s8 + $0x438] ss:$48 sps:$4 sm:$0xff]  }
 0xa58   : > { %5499 = vmatpush1.bf16.msra.mxu1 %v10325_v63  ;;  %5581 = vmatpush1.bf16.msra.mxu0 %v10328_v46  ;;  %v10403_v63 = vld [vmem:[%s14314_s8 + $0x490] ss:$48 sps:$4 sm:$0xff]   ;;  %v10406_v46 = vld [vmem:[%s14314_s8 + $0x498] ss:$48 sps:$4 sm:$0xff]  }
 0xa59   : > { %5607 = vmatprep.subr.bf16.mxu1 %v10333_v48  ;;  %5689 = vmatprep.subr.bf16.mxu0 %v10336_v44  ;;  %v10414_v48 = vld [vmem:[%s14314_s8 + $0x4fc] ss:$48 sps:$4 sm:$0xff]   ;;  %v10409_v44 = vld [vmem:[%s14314_s8 + $0x4f0] ss:$48 sps:$4 sm:$0xff]  }
 0xa5b   : > { %5517 = vmatmul.mubr.bf16.vlgmr.msra.gmra.mrb[52].mxu1 %v12693_v52  ;;  %5599 = vmatmul.mubr.bf16.vlgmr.msra.gmra.mrb[36].mxu0 %v12693_v52 }
 0xa5c   : > { %5608 = vmatpush1.bf16.msra.mxu1 %v10331_v50  ;;  %5639 = vmatprep.mubr.bf16.mxu1 %v12579_v41  ;;  %v10412_v50 = vld [vmem:[%s14314_s8 + $0x4f8] ss:$48 sps:$4 sm:$0xff]  }
 0xa5d   : > { %5690 = vmatpush1.bf16.msra.mxu0 %v10334_v53  ;;  %5721 = vmatprep.mubr.bf16.mxu0 %v12579_v41  ;;  %v10417_v53 = vld [vmem:[%s14314_s8 + $0x554] ss:$48 sps:$4 sm:$0xff]  }
 0xa5e   : > { %5609 = vmatprep.subr.bf16.mxu1 %v10339_v54  ;;  %5691 = vmatprep.subr.bf16.mxu0 %v10342_v55  ;;  %v10420_v54 = vld [vmem:[%s14314_s8 + $0x55c] ss:$48 sps:$4 sm:$0xff]   ;;  %v10415_v55 = vld [vmem:[%s14314_s8 + $0x550] ss:$48 sps:$4 sm:$0xff]  }
 0xa60   : > { %5610 = vmatpush1.bf16.msra.mxu1 %v10337_v56  ;;  %v10418_v56 = vld [vmem:[%s14314_s8 + $0x558] ss:$48 sps:$4 sm:$0xff]  }
 0xa61   : > { %5692 = vmatpush1.bf16.msra.mxu0 %v10340_v57  ;;  %5611 = vmatprep.subr.bf16.mxu1 %v10345_v58  ;;  %v10423_v57 = vld [vmem:[%s14314_s8 + $0x5b4] ss:$48 sps:$4 sm:$0xff]   ;;  %v10426_v58 = vld [vmem:[%s14314_s8 + $0x5bc] ss:$48 sps:$4 sm:$0xff]  }
 0xa62   : > { %5693 = vmatprep.subr.bf16.mxu0 %v10348_v60  ;;  %v10421_v60 = vld [vmem:[%s14314_s8 + $0x5b0] ss:$48 sps:$4 sm:$0xff]  }
 0xa64   : > { %5612 = vmatpush1.bf16.msra.mxu1 %v10343_v61  ;;  %v10424_v61 = vld [vmem:[%s14314_s8 + $0x5b8] ss:$48 sps:$4 sm:$0xff]  }
 0xa65   : > { %5694 = vmatpush1.bf16.msra.mxu0 %v10346_v62  ;;  %5613 = vmatprep.subr.bf16.mxu1 %v10351_v0  ;;  %v10429_v62 = vld [vmem:[%s14314_s8 + $0x614] ss:$48 sps:$4 sm:$0xff]   ;;  %v10432_v0 = vld [vmem:[%s14314_s8 + $0x61c] ss:$48 sps:$4 sm:$0xff]  }
 0xa66   : > { %5695 = vmatprep.subr.bf16.mxu0 %v10354_v1  ;;  %v10427_v1 = vld [vmem:[%s14314_s8 + $0x610] ss:$48 sps:$4 sm:$0xff]  }
 0xa68   : > { %5614 = vmatpush1.bf16.msra.mxu1 %v10349_v4  ;;  %v10430_v4 = vld [vmem:[%s14314_s8 + $0x618] ss:$48 sps:$4 sm:$0xff]  }
 0xa69   : > { %5696 = vmatpush1.bf16.msra.mxu0 %v10352_v2  ;;  %5615 = vmatprep.subr.bf16.mxu1 %v10357_v5  ;;  %v10435_v2 = vld [vmem:[%s14314_s8 + $0x674] ss:$48 sps:$4 sm:$0xff]   ;;  %v10438_v5 = vld [vmem:[%s14314_s8 + $0x67c] ss:$48 sps:$4 sm:$0xff]  }
 0xa6a   : > { %5697 = vmatprep.subr.bf16.mxu0 %v10360_v6  ;;  %v10433_v6 = vld [vmem:[%s14314_s8 + $0x670] ss:$48 sps:$4 sm:$0xff]  }
 0xa6c   : > { %5616 = vmatpush1.bf16.msra.mxu1 %v10355_v51  ;;  %v10436_v51 = vld [vmem:[%s14314_s8 + $0x678] ss:$48 sps:$4 sm:$0xff]  }
 0xa6d   : > { %5698 = vmatpush1.bf16.msra.mxu0 %v10358_v7  ;;  %5617 = vmatprep.subr.bf16.mxu1 %v10363_v9  ;;  %v10441_v7 = vld [vmem:[%s14314_s8 + $0x6d4] ss:$48 sps:$4 sm:$0xff]   ;;  %v10444_v9 = vld [vmem:[%s14314_s8 + $0x6dc] ss:$48 sps:$4 sm:$0xff]  }
 0xa6e   : > { %5699 = vmatprep.subr.bf16.mxu0 %v10366_v10  ;;  %v10439_v10 = vld [vmem:[%s14314_s8 + $0x6d0] ss:$48 sps:$4 sm:$0xff]  }
 0xa70   : > { %5618 = vmatpush1.bf16.msra.mxu1 %v10361_v19  ;;  %v10442_v19 = vld [vmem:[%s14314_s8 + $0x6d8] ss:$48 sps:$4 sm:$0xff]  }
 0xa71   : > { %5700 = vmatpush1.bf16.msra.mxu0 %v10364_v11  ;;  %5619 = vmatprep.subr.bf16.mxu1 %v10369_v12  ;;  %v10447_v11 = vld [vmem:[%s14314_s8 + $0x734] ss:$48 sps:$4 sm:$0xff]   ;;  %v10450_v12 = vld [vmem:[%s14314_s8 + $0x73c] ss:$48 sps:$4 sm:$0xff]  }
 0xa72   : > { %5701 = vmatprep.subr.bf16.mxu0 %v10372_v13  ;;  %v10445_v13 = vld [vmem:[%s14314_s8 + $0x730] ss:$48 sps:$4 sm:$0xff]  }
 0xa74   : > { %5620 = vmatpush1.bf16.msra.mxu1 %v10367_v15  ;;  %v10448_v15 = vld [vmem:[%s14314_s8 + $0x738] ss:$48 sps:$4 sm:$0xff]  }
 0xa75   : > { %5702 = vmatpush1.bf16.msra.mxu0 %v10370_v18  ;;  %5621 = vmatprep.subr.bf16.mxu1 %v10375_v3  ;;  %v10453_v18 = vld [vmem:[%s14314_s8 + $0x794] ss:$48 sps:$4 sm:$0xff]   ;;  %v10456_v3 = vld [vmem:[%s14314_s8 + $0x79c] ss:$48 sps:$4 sm:$0xff]  }
 0xa76   : > { %5703 = vmatprep.subr.bf16.mxu0 %v10378_v24  ;;  %v10451_v24 = vld [vmem:[%s14314_s8 + $0x790] ss:$48 sps:$4 sm:$0xff]  }
 0xa78   : > { %5622 = vmatpush1.bf16.msra.mxu1 %v10373_v25  ;;  %v10454_v25 = vld [vmem:[%s14314_s8 + $0x798] ss:$48 sps:$4 sm:$0xff]  }
 0xa79   : > { %5704 = vmatpush1.bf16.msra.mxu0 %v10376_v26  ;;  %5623 = vmatprep.subr.bf16.mxu1 %v10381_v29  ;;  %v10459_v26 = vld [vmem:[%s14314_s8 + $0x7f4] ss:$48 sps:$4 sm:$0xff]   ;;  %v10462_v29 = vld [vmem:[%s14314_s8 + $0x7fc] ss:$48 sps:$4 sm:$0xff]  }
 0xa7a   : > { %5705 = vmatprep.subr.bf16.mxu0 %v10384_v30  ;;  %v10457_v30 = vld [vmem:[%s14314_s8 + $0x7f0] ss:$48 sps:$4 sm:$0xff]  }
 0xa7c   : > { %5624 = vmatpush1.bf16.msra.mxu1 %v10379_v28  ;;  %v10460_v28 = vld [vmem:[%s14314_s8 + $0x7f8] ss:$48 sps:$4 sm:$0xff]  }
 0xa7d   : > { %5706 = vmatpush1.bf16.msra.mxu0 %v10382_v31  ;;  %5625 = vmatprep.subr.bf16.mxu1 %v10387_v32  ;;  %v10465_v31 = vld [vmem:[%s14314_s8 + $0x854] ss:$48 sps:$4 sm:$0xff]   ;;  %v10468_v32 = vld [vmem:[%s14314_s8 + $0x85c] ss:$48 sps:$4 sm:$0xff]  }
 0xa7e   : > { %5707 = vmatprep.subr.bf16.mxu0 %v10390_v33  ;;  %v10463_v33 = vld [vmem:[%s14314_s8 + $0x850] ss:$48 sps:$4 sm:$0xff]  }
 0xa80   : > { %5626 = vmatpush1.bf16.msra.mxu1 %v10385_v34  ;;  %v10466_v34 = vld [vmem:[%s14314_s8 + $0x858] ss:$48 sps:$4 sm:$0xff]  }
 0xa81   : > { %5708 = vmatpush1.bf16.msra.mxu0 %v10388_v35  ;;  %5627 = vmatprep.subr.bf16.mxu1 %v10393_v42  ;;  %v10471_v35 = vld [vmem:[%s14314_s8 + $0x8b4] ss:$48 sps:$4 sm:$0xff]   ;;  %v10474_v42 = vld [vmem:[%s14314_s8 + $0x8bc] ss:$48 sps:$4 sm:$0xff]  }
 0xa82   : > { %5709 = vmatprep.subr.bf16.mxu0 %v10396_v17  ;;  %v10469_v17 = vld [vmem:[%s14314_s8 + $0x8b0] ss:$48 sps:$4 sm:$0xff]  }
 0xa84   : > { %5628 = vmatpush1.bf16.msra.mxu1 %v10391_v37  ;;  %v10472_v37 = vld [vmem:[%s14314_s8 + $0x8b8] ss:$48 sps:$4 sm:$0xff]  }
 0xa85   : > { %5710 = vmatpush1.bf16.msra.mxu0 %v10394_v36  ;;  %5629 = vmatprep.subr.bf16.mxu1 %v10399_v38  ;;  %v10477_v36 = vld [vmem:[%s14314_s8 + $0x24] ss:$48 sps:$4 sm:$0xff]   ;;  %v10480_v38 = vld [vmem:[%s14314_s8 + $0x2c] ss:$48 sps:$4 sm:$0xff]  }
 0xa86   : > { %5711 = vmatprep.subr.bf16.mxu0 %v10402_v39  ;;  %v10475_v39 = vld [vmem:[%s14314_s8 + $0x20] ss:$48 sps:$4 sm:$0xff]  }
 0xa88   : > { %5630 = vmatpush1.bf16.msra.mxu1 %v10397_v43  ;;  %v10478_v43 = vld [vmem:[%s14314_s8 + $0x28] ss:$48 sps:$4 sm:$0xff]  }
 0xa89   : > { %5712 = vmatpush1.bf16.msra.mxu0 %v10400_v20  ;;  %5631 = vmatprep.subr.bf16.mxu1 %v10405_v45  ;;  %v10483_v20 = vld [vmem:[%s14314_s8 + $0x84] ss:$48 sps:$4 sm:$0xff]   ;;  %v10486_v45 = vld [vmem:[%s14314_s8 + $0x8c] ss:$48 sps:$4 sm:$0xff]  }
 0xa8a   : > { %5713 = vmatprep.subr.bf16.mxu0 %v10408_v40  ;;  %v10481_v40 = vld [vmem:[%s14314_s8 + $0x80] ss:$48 sps:$4 sm:$0xff]  }
 0xa8c   : > { %5632 = vmatpush1.bf16.msra.mxu1 %v10403_v63  ;;  %v10484_v63 = vld [vmem:[%s14314_s8 + $0x88] ss:$48 sps:$4 sm:$0xff]  }
 0xa8d   : > { %5714 = vmatpush1.bf16.msra.mxu0 %v10406_v46  ;;  %5633 = vmatprep.subr.bf16.mxu1 %v10411_v47  ;;  %v10489_v46 = vld [vmem:[%s14314_s8 + $0xe4] ss:$48 sps:$4 sm:$0xff]   ;;  %v10492_v47 = vld [vmem:[%s14314_s8 + $0xec] ss:$48 sps:$4 sm:$0xff]  }
 0xa8e   : > { %5715 = vmatprep.subr.bf16.mxu0 %v10414_v48  ;;  %v10487_v48 = vld [vmem:[%s14314_s8 + $0xe0] ss:$48 sps:$4 sm:$0xff]  }
 0xa90   : > { %5634 = vmatpush1.bf16.msra.mxu1 %v10409_v44  ;;  %v10490_v44 = vld [vmem:[%s14314_s8 + $0xe8] ss:$48 sps:$4 sm:$0xff]  }
 0xa91   : > { %5716 = vmatpush1.bf16.msra.mxu0 %v10412_v50  ;;  %5635 = vmatprep.subr.bf16.mxu1 %v10417_v53  ;;  %v10498_v50 = vld [vmem:[%s14314_s8 + $0x14c] ss:$48 sps:$4 sm:$0xff]   ;;  %v10493_v53 = vld [vmem:[%s14314_s8 + $0x140] ss:$48 sps:$4 sm:$0xff]  }
 0xa92   : > { %5717 = vmatprep.subr.bf16.mxu0 %v10420_v54  ;;  %v10496_v54 = vld [vmem:[%s14314_s8 + $0x148] ss:$48 sps:$4 sm:$0xff]  }
 0xa94   : > { %5636 = vmatpush1.bf16.msra.mxu1 %v10415_v55  ;;  %v10501_v55 = vld [vmem:[%s14314_s8 + $0x1a4] ss:$48 sps:$4 sm:$0xff]  }
 0xa95   : > { %5718 = vmatpush1.bf16.msra.mxu0 %v10418_v56  ;;  %5637 = vmatprep.subr.bf16.mxu1 %v10423_v57  ;;  %v10504_v56 = vld [vmem:[%s14314_s8 + $0x1ac] ss:$48 sps:$4 sm:$0xff]   ;;  %v10499_v57 = vld [vmem:[%s14314_s8 + $0x1a0] ss:$48 sps:$4 sm:$0xff]  }
 0xa96   : > { %5719 = vmatprep.subr.bf16.mxu0 %v10426_v58  ;;  %v10502_v58 = vld [vmem:[%s14314_s8 + $0x1a8] ss:$48 sps:$4 sm:$0xff]  }
 0xa98   : > { %5638 = vmatpush1.bf16.msra.mxu1 %v10421_v60  ;;  %v10507_v60 = vld [vmem:[%s14314_s8 + $0x204] ss:$48 sps:$4 sm:$0xff]  }
 0xa99   : > { %5720 = vmatpush1.bf16.msra.mxu0 %v10424_v61  ;;  %5648 = vmatprep.subr.bf16.mxu1 %v10429_v62  ;;  %v10510_v61 = vld [vmem:[%s14314_s8 + $0x20c] ss:$48 sps:$4 sm:$0xff]   ;;  %v10505_v62 = vld [vmem:[%s14314_s8 + $0x200] ss:$48 sps:$4 sm:$0xff]  }
 0xa9a   : > { %5730 = vmatprep.subr.bf16.mxu0 %v10432_v0  ;;  %v10508_v0 = vld [vmem:[%s14314_s8 + $0x208] ss:$48 sps:$4 sm:$0xff]  }
 0xa9b   : > { %5640 = vmatmul.mubr.bf16.vlgmr.msra.gmra.mrb[56].mxu1 %v12587_v8 }
 0xa9c   : > { %5722 = vmatmul.mubr.bf16.vlgmr.msra.gmra.mrb[40].mxu0 %v12587_v8  ;;  %5649 = vmatpush1.bf16.msra.mxu1 %v10427_v1  ;;  %v10513_v1 = vld [vmem:[%s14314_s8 + $0x264] ss:$48 sps:$4 sm:$0xff]  }
 0xa9d   : > { %5731 = vmatpush1.bf16.msra.mxu0 %v10430_v4  ;;  %5650 = vmatprep.subr.bf16.mxu1 %v10435_v2  ;;  %v10516_v4 = vld [vmem:[%s14314_s8 + $0x26c] ss:$48 sps:$4 sm:$0xff]   ;;  %v10511_v2 = vld [vmem:[%s14314_s8 + $0x260] ss:$48 sps:$4 sm:$0xff]  }
 0xa9e   : > { %5732 = vmatprep.subr.bf16.mxu0 %v10438_v5  ;;  %5680 = vmatprep.mubr.bf16.mxu1 %v11098_v49  ;;  %v10514_v5 = vld [vmem:[%s14314_s8 + $0x268] ss:$48 sps:$4 sm:$0xff]  }
 0xa9f   : > { %5762 = vmatprep.mubr.bf16.mxu0 %v11098_v49 }
 0xaa0   : > { %5651 = vmatpush1.bf16.msra.mxu1 %v10433_v6  ;;  %v10519_v6 = vld [vmem:[%s14314_s8 + $0x2c4] ss:$48 sps:$4 sm:$0xff]  }
 0xaa1   : > { %5733 = vmatpush1.bf16.msra.mxu0 %v10436_v51  ;;  %5652 = vmatprep.subr.bf16.mxu1 %v10441_v7  ;;  %v10522_v51 = vld [vmem:[%s14314_s8 + $0x2cc] ss:$48 sps:$4 sm:$0xff]   ;;  %v10517_v7 = vld [vmem:[%s14314_s8 + $0x2c0] ss:$48 sps:$4 sm:$0xff]  }
 0xaa2   : > { %5734 = vmatprep.subr.bf16.mxu0 %v10444_v9  ;;  %v10520_v9 = vld [vmem:[%s14314_s8 + $0x2c8] ss:$48 sps:$4 sm:$0xff]  }
 0xaa4   : > { %5653 = vmatpush1.bf16.msra.mxu1 %v10439_v10  ;;  %v10525_v10 = vld [vmem:[%s14314_s8 + $0x324] ss:$48 sps:$4 sm:$0xff]  }
 0xaa5   : > { %5735 = vmatpush1.bf16.msra.mxu0 %v10442_v19  ;;  %5654 = vmatprep.subr.bf16.mxu1 %v10447_v11  ;;  %v10528_v19 = vld [vmem:[%s14314_s8 + $0x32c] ss:$48 sps:$4 sm:$0xff]   ;;  %v10523_v11 = vld [vmem:[%s14314_s8 + $0x320] ss:$48 sps:$4 sm:$0xff]  }
 0xaa6   : > { %5736 = vmatprep.subr.bf16.mxu0 %v10450_v12  ;;  %v10526_v12 = vld [vmem:[%s14314_s8 + $0x328] ss:$48 sps:$4 sm:$0xff]  }
 0xaa8   : > { %5655 = vmatpush1.bf16.msra.mxu1 %v10445_v13  ;;  %v10531_v13 = vld [vmem:[%s14314_s8 + $0x384] ss:$48 sps:$4 sm:$0xff]  }
 0xaa9   : > { %5737 = vmatpush1.bf16.msra.mxu0 %v10448_v15  ;;  %5656 = vmatprep.subr.bf16.mxu1 %v10453_v18  ;;  %v10534_v15 = vld [vmem:[%s14314_s8 + $0x38c] ss:$48 sps:$4 sm:$0xff]   ;;  %v10529_v18 = vld [vmem:[%s14314_s8 + $0x380] ss:$48 sps:$4 sm:$0xff]  }
 0xaaa   : > { %5738 = vmatprep.subr.bf16.mxu0 %v10456_v3  ;;  %v10532_v3 = vld [vmem:[%s14314_s8 + $0x388] ss:$48 sps:$4 sm:$0xff]  }
 0xaac   : > { %5657 = vmatpush1.bf16.msra.mxu1 %v10451_v24  ;;  %v10537_v24 = vld [vmem:[%s14314_s8 + $0x3e4] ss:$48 sps:$4 sm:$0xff]  }
 0xaad   : > { %5739 = vmatpush1.bf16.msra.mxu0 %v10454_v25  ;;  %5658 = vmatprep.subr.bf16.mxu1 %v10459_v26  ;;  %v10540_v25 = vld [vmem:[%s14314_s8 + $0x3ec] ss:$48 sps:$4 sm:$0xff]   ;;  %v10535_v26 = vld [vmem:[%s14314_s8 + $0x3e0] ss:$48 sps:$4 sm:$0xff]  }
 0xaae   : > { %5740 = vmatprep.subr.bf16.mxu0 %v10462_v29  ;;  %v10538_v29 = vld [vmem:[%s14314_s8 + $0x3e8] ss:$48 sps:$4 sm:$0xff]  }
 0xab0   : > { %5659 = vmatpush1.bf16.msra.mxu1 %v10457_v30  ;;  %v10543_v30 = vld [vmem:[%s14314_s8 + $0x444] ss:$48 sps:$4 sm:$0xff]  }
 0xab1   : > { %5741 = vmatpush1.bf16.msra.mxu0 %v10460_v28  ;;  %5660 = vmatprep.subr.bf16.mxu1 %v10465_v31  ;;  %v10546_v28 = vld [vmem:[%s14314_s8 + $0x44c] ss:$48 sps:$4 sm:$0xff]   ;;  %v10541_v31 = vld [vmem:[%s14314_s8 + $0x440] ss:$48 sps:$4 sm:$0xff]  }
 0xab2   : > { %5742 = vmatprep.subr.bf16.mxu0 %v10468_v32  ;;  %v10544_v32 = vld [vmem:[%s14314_s8 + $0x448] ss:$48 sps:$4 sm:$0xff]  }
 0xab4   : > { %5661 = vmatpush1.bf16.msra.mxu1 %v10463_v33  ;;  %v10549_v33 = vld [vmem:[%s14314_s8 + $0x4a4] ss:$48 sps:$4 sm:$0xff]  }
 0xab5   : > { %5743 = vmatpush1.bf16.msra.mxu0 %v10466_v34  ;;  %5662 = vmatprep.subr.bf16.mxu1 %v10471_v35  ;;  %v10552_v34 = vld [vmem:[%s14314_s8 + $0x4ac] ss:$48 sps:$4 sm:$0xff]   ;;  %v10547_v35 = vld [vmem:[%s14314_s8 + $0x4a0] ss:$48 sps:$4 sm:$0xff]  }
 0xab6   : > { %5744 = vmatprep.subr.bf16.mxu0 %v10474_v42  ;;  %v10550_v42 = vld [vmem:[%s14314_s8 + $0x4a8] ss:$48 sps:$4 sm:$0xff]  }
 0xab8   : > { %5663 = vmatpush1.bf16.msra.mxu1 %v10469_v17  ;;  %v10555_v17 = vld [vmem:[%s14314_s8 + $0x504] ss:$48 sps:$4 sm:$0xff]  }
 0xab9   : > { %5745 = vmatpush1.bf16.msra.mxu0 %v10472_v37  ;;  %5771 = vmatprep.subr.bf16.mxu1 %v10477_v36  ;;  %v10558_v37 = vld [vmem:[%s14314_s8 + $0x50c] ss:$48 sps:$4 sm:$0xff]   ;;  %v10553_v36 = vld [vmem:[%s14314_s8 + $0x500] ss:$48 sps:$4 sm:$0xff]  }
 0xaba   : > { %5853 = vmatprep.subr.bf16.mxu0 %v10480_v38  ;;  %v10556_v38 = vld [vmem:[%s14314_s8 + $0x508] ss:$48 sps:$4 sm:$0xff]  }
 0xabb   : > { %5681 = vmatmul.mubr.bf16.vlgmr.msra.gmra.mrb[56].mxu1 %v12693_v52 }
 0xabc   : > { %5763 = vmatmul.mubr.bf16.vlgmr.msra.gmra.mrb[40].mxu0 %v12693_v52  ;;  %5772 = vmatpush1.bf16.msra.mxu1 %v10475_v39  ;;  %v10561_v39 = vld [vmem:[%s14314_s8 + $0x564] ss:$48 sps:$4 sm:$0xff]  }
 0xabd   : > { %5803 = vmatprep.mubr.bf16.mxu1 %v12579_v41  ;;  %5854 = vmatpush1.bf16.msra.mxu0 %v10478_v43  ;;  %v10564_v43 = vld [vmem:[%s14314_s8 + $0x56c] ss:$48 sps:$4 sm:$0xff]  }
 0xabe   : > { %5885 = vmatprep.mubr.bf16.mxu0 %v12579_v41  ;;  %5773 = vmatprep.subr.bf16.mxu1 %v10483_v20  ;;  %v10495_v41 = vld [vmem:[%s14314_s8 + $0x144] ss:$48 sps:$4 sm:$0xff]   ;;  %v10559_v20 = vld [vmem:[%s14314_s8 + $0x560] ss:$48 sps:$4 sm:$0xff]  }
 0xabf   : > { %5855 = vmatprep.subr.bf16.mxu0 %v10486_v45  ;;  %v10562_v45 = vld [vmem:[%s14314_s8 + $0x568] ss:$48 sps:$4 sm:$0xff]  }
 0xac0   : > { %5774 = vmatpush1.bf16.msra.mxu1 %v10481_v40  ;;  %v10567_v40 = vld [vmem:[%s14314_s8 + $0x5c4] ss:$48 sps:$4 sm:$0xff]  }
 0xac1   : > { %5856 = vmatpush1.bf16.msra.mxu0 %v10484_v63  ;;  %5775 = vmatprep.subr.bf16.mxu1 %v10489_v46  ;;  %v10570_v63 = vld [vmem:[%s14314_s8 + $0x5cc] ss:$48 sps:$4 sm:$0xff]   ;;  %v10565_v46 = vld [vmem:[%s14314_s8 + $0x5c0] ss:$48 sps:$4 sm:$0xff]  }
 0xac2   : > { %5857 = vmatprep.subr.bf16.mxu0 %v10492_v47  ;;  %v10568_v47 = vld [vmem:[%s14314_s8 + $0x5c8] ss:$48 sps:$4 sm:$0xff]  }
 0xac4   : > { %5776 = vmatpush1.bf16.msra.mxu1 %v10487_v48  ;;  %v10573_v48 = vld [vmem:[%s14314_s8 + $0x624] ss:$48 sps:$4 sm:$0xff]  }
 0xac5   : > { %5858 = vmatpush1.bf16.msra.mxu0 %v10490_v44  ;;  %5777 = vmatprep.subr.bf16.mxu1 %v10495_v41  ;;  %v10576_v44 = vld [vmem:[%s14314_s8 + $0x62c] ss:$48 sps:$4 sm:$0xff]   ;;  %v10571_v41 = vld [vmem:[%s14314_s8 + $0x620] ss:$48 sps:$4 sm:$0xff]  }
 0xac6   : > { %5859 = vmatprep.subr.bf16.mxu0 %v10498_v50  ;;  %v10574_v50 = vld [vmem:[%s14314_s8 + $0x628] ss:$48 sps:$4 sm:$0xff]  }
 0xac8   : > { %5778 = vmatpush1.bf16.msra.mxu1 %v10493_v53  ;;  %v10579_v53 = vld [vmem:[%s14314_s8 + $0x684] ss:$48 sps:$4 sm:$0xff]  }
 0xac9   : > { %5860 = vmatpush1.bf16.msra.mxu0 %v10496_v54  ;;  %5779 = vmatprep.subr.bf16.mxu1 %v10501_v55  ;;  %v10582_v54 = vld [vmem:[%s14314_s8 + $0x68c] ss:$48 sps:$4 sm:$0xff]   ;;  %v10577_v55 = vld [vmem:[%s14314_s8 + $0x680] ss:$48 sps:$4 sm:$0xff]  }
 0xaca   : > { %5861 = vmatprep.subr.bf16.mxu0 %v10504_v56  ;;  %v10580_v56 = vld [vmem:[%s14314_s8 + $0x688] ss:$48 sps:$4 sm:$0xff]  }
 0xacc   : > { %5780 = vmatpush1.bf16.msra.mxu1 %v10499_v57  ;;  %v10585_v57 = vld [vmem:[%s14314_s8 + $0x6e4] ss:$48 sps:$4 sm:$0xff]  }
 0xacd   : > { %5862 = vmatpush1.bf16.msra.mxu0 %v10502_v58  ;;  %5781 = vmatprep.subr.bf16.mxu1 %v10507_v60  ;;  %v10583_v58 = vld [vmem:[%s14314_s8 + $0x6e0] ss:$48 sps:$4 sm:$0xff]   ;;  %v10586_v60 = vld [vmem:[%s14314_s8 + $0x6e8] ss:$48 sps:$4 sm:$0xff]  }
 0xace   : > { %5863 = vmatprep.subr.bf16.mxu0 %v10510_v61  ;;  %v10591_v61 = vld [vmem:[%s14314_s8 + $0x744] ss:$48 sps:$4 sm:$0xff]  }
 0xad0   : > { %5782 = vmatpush1.bf16.msra.mxu1 %v10505_v62  ;;  %v10589_v62 = vld [vmem:[%s14314_s8 + $0x740] ss:$48 sps:$4 sm:$0xff]  }
 0xad1   : > { %5864 = vmatpush1.bf16.msra.mxu0 %v10508_v0  ;;  %5783 = vmatprep.subr.bf16.mxu1 %v10513_v1  ;;  %v10592_v0 = vld [vmem:[%s14314_s8 + $0x748] ss:$48 sps:$4 sm:$0xff]   ;;  %v10597_v1 = vld [vmem:[%s14314_s8 + $0x7a4] ss:$48 sps:$4 sm:$0xff]  }
 0xad2   : > { %5865 = vmatprep.subr.bf16.mxu0 %v10516_v4  ;;  %v10600_v4 = vld [vmem:[%s14314_s8 + $0x7ac] ss:$48 sps:$4 sm:$0xff]  }
 0xad4   : > { %5784 = vmatpush1.bf16.msra.mxu1 %v10511_v2  ;;  %v10595_v2 = vld [vmem:[%s14314_s8 + $0x7a0] ss:$48 sps:$4 sm:$0xff]  }
 0xad5   : > { %5866 = vmatpush1.bf16.msra.mxu0 %v10514_v5  ;;  %5785 = vmatprep.subr.bf16.mxu1 %v10519_v6  ;;  %v10598_v5 = vld [vmem:[%s14314_s8 + $0x7a8] ss:$48 sps:$4 sm:$0xff]   ;;  %v10603_v6 = vld [vmem:[%s14314_s8 + $0x804] ss:$48 sps:$4 sm:$0xff]  }
 0xad6   : > { %5867 = vmatprep.subr.bf16.mxu0 %v10522_v51  ;;  %v10606_v51 = vld [vmem:[%s14314_s8 + $0x80c] ss:$48 sps:$4 sm:$0xff]  }
 0xad8   : > { %5786 = vmatpush1.bf16.msra.mxu1 %v10517_v7  ;;  %v10601_v7 = vld [vmem:[%s14314_s8 + $0x800] ss:$48 sps:$4 sm:$0xff]  }
 0xad9   : > { %5868 = vmatpush1.bf16.msra.mxu0 %v10520_v9  ;;  %5787 = vmatprep.subr.bf16.mxu1 %v10525_v10  ;;  %v10604_v9 = vld [vmem:[%s14314_s8 + $0x808] ss:$48 sps:$4 sm:$0xff]   ;;  %v10609_v10 = vld [vmem:[%s14314_s8 + $0x864] ss:$48 sps:$4 sm:$0xff]  }
 0xada   : > { %5869 = vmatprep.subr.bf16.mxu0 %v10528_v19  ;;  %v10612_v19 = vld [vmem:[%s14314_s8 + $0x86c] ss:$48 sps:$4 sm:$0xff]  }
 0xadc   : > { %5788 = vmatpush1.bf16.msra.mxu1 %v10523_v11  ;;  %v10607_v11 = vld [vmem:[%s14314_s8 + $0x860] ss:$48 sps:$4 sm:$0xff]  }
 0xadd   : > { %5870 = vmatpush1.bf16.msra.mxu0 %v10526_v12  ;;  %5789 = vmatprep.subr.bf16.mxu1 %v10531_v13  ;;  %v10610_v12 = vld [vmem:[%s14314_s8 + $0x868] ss:$48 sps:$4 sm:$0xff]   ;;  %v10615_v13 = vld [vmem:[%s14314_s8 + $0x8c4] ss:$48 sps:$4 sm:$0xff]  }
 0xade   : > { %5871 = vmatprep.subr.bf16.mxu0 %v10534_v15  ;;  %v10618_v15 = vld [vmem:[%s14314_s8 + $0x8cc] ss:$48 sps:$4 sm:$0xff]  }
 0xae0   : > { %5790 = vmatpush1.bf16.msra.mxu1 %v10529_v18  ;;  %v10613_v18 = vld [vmem:[%s14314_s8 + $0x8c0] ss:$48 sps:$4 sm:$0xff]  }
 0xae1   : > { %5872 = vmatpush1.bf16.msra.mxu0 %v10532_v3  ;;  %5791 = vmatprep.subr.bf16.mxu1 %v10537_v24  ;;  %v10616_v3 = vld [vmem:[%s14314_s8 + $0x8c8] ss:$48 sps:$4 sm:$0xff]   ;;  %v10621_v24 = vld [vmem:[%s14316_s10 + $0x4] ss:$12 sps:$4 sm:$0xff]  }
 0xae2   : > { %5873 = vmatprep.subr.bf16.mxu0 %v10540_v25  ;;  %v10624_v25 = vld [vmem:[%s14316_s10 + $0x184] ss:$12 sps:$4 sm:$0xff]  }
 0xae4   : > { %5792 = vmatpush1.bf16.msra.mxu1 %v10535_v26  ;;  %v10619_v26 = vld [vmem:[%s14316_s10] ss:$12 sps:$4 sm:$0xff]  }
 0xae5   : > { %5874 = vmatpush1.bf16.msra.mxu0 %v10538_v29  ;;  %5793 = vmatprep.subr.bf16.mxu1 %v10543_v30  ;;  %v10622_v29 = vld [vmem:[%s14316_s10 + $0x180] ss:$12 sps:$4 sm:$0xff]   ;;  %v10627_v30 = vld [vmem:[%s14316_s10 + $0x1c] ss:$12 sps:$4 sm:$0xff]  }
 0xae6   : > { %5875 = vmatprep.subr.bf16.mxu0 %v10546_v28  ;;  %v10630_v28 = vld [vmem:[%s14316_s10 + $0x19c] ss:$12 sps:$4 sm:$0xff]  }
 0xae8   : > { %5794 = vmatpush1.bf16.msra.mxu1 %v10541_v31  ;;  %v10625_v31 = vld [vmem:[%s14316_s10 + $0x18] ss:$12 sps:$4 sm:$0xff]  }
 0xae9   : > { %5876 = vmatpush1.bf16.msra.mxu0 %v10544_v32  ;;  %5795 = vmatprep.subr.bf16.mxu1 %v10549_v33  ;;  %v10628_v32 = vld [vmem:[%s14316_s10 + $0x198] ss:$12 sps:$4 sm:$0xff]   ;;  %v10633_v33 = vld [vmem:[%s14316_s10 + $0x34] ss:$12 sps:$4 sm:$0xff]  }
 0xaea   : > { %5877 = vmatprep.subr.bf16.mxu0 %v10552_v34  ;;  %v10631_v34 = vld [vmem:[%s14316_s10 + $0x30] ss:$12 sps:$4 sm:$0xff]  }
 0xaec   : > { %5796 = vmatpush1.bf16.msra.mxu1 %v10547_v35  ;;  %v10634_v35 = vld [vmem:[%s14316_s10 + $0x1b0] ss:$12 sps:$4 sm:$0xff]  }
 0xaed   : > { %5878 = vmatpush1.bf16.msra.mxu0 %v10550_v42  ;;  %5797 = vmatprep.subr.bf16.mxu1 %v10555_v17  ;;  %v10639_v42 = vld [vmem:[%s14316_s10 + $0x4c] ss:$12 sps:$4 sm:$0xff]  }
 0xaee   : > { %5879 = vmatprep.subr.bf16.mxu0 %v10558_v37  ;;  %v10642_v17 = vld [vmem:[%s14316_s10 + $0x1cc] ss:$12 sps:$4 sm:$0xff]   ;;  %v10637_v37 = vld [vmem:[%s14316_s10 + $0x48] ss:$12 sps:$4 sm:$0xff]  }
 0xaf0   : > { %5798 = vmatpush1.bf16.msra.mxu1 %v10553_v36  ;;  %v10640_v36 = vld [vmem:[%s14316_s10 + $0x1c8] ss:$12 sps:$4 sm:$0xff]  }
 0xaf1   : > { %5880 = vmatpush1.bf16.msra.mxu0 %v10556_v38  ;;  %5799 = vmatprep.subr.bf16.mxu1 %v10561_v39  ;;  %v10645_v38 = vld [vmem:[%s14316_s10 + $0x64] ss:$12 sps:$4 sm:$0xff]  }
 0xaf2   : > { %5881 = vmatprep.subr.bf16.mxu0 %v10564_v43  ;;  %v10648_v39 = vld [vmem:[%s14316_s10 + $0x1e4] ss:$12 sps:$4 sm:$0xff]   ;;  %v10643_v43 = vld [vmem:[%s14316_s10 + $0x60] ss:$12 sps:$4 sm:$0xff]  }
 0xaf4   : > { %5800 = vmatpush1.bf16.msra.mxu1 %v10559_v20  ;;  %v3957_v20 = vsub.s32 3, %v11449_v21 }
 0xaf5   : > { %5882 = vmatpush1.bf16.msra.mxu0 %v10562_v45  ;;  %5801 = vmatprep.subr.bf16.mxu1 %v10567_v40  ;;  %v10646_v45 = vld [vmem:[%s14316_s10 + $0x1e0] ss:$12 sps:$4 sm:$0xff]  }
 0xaf6   : > { %5883 = vmatprep.subr.bf16.mxu0 %v10570_v63  ;;  %v13344_v40 = vld [vmem:[%s14315_s9] sm:$0xff]  ;;  %v10651_v63 = vld [vmem:[%s14316_s10 + $0x7c] ss:$12 sps:$4 sm:$0xff]  }
 0xaf8   : > { %5802 = vmatpush1.bf16.msra.mxu1 %v10565_v46  ;;  %v10654_v46 = vld [vmem:[%s14316_s10 + $0x1fc] ss:$12 sps:$4 sm:$0xff]  }
 0xaf9   : > { %5884 = vmatpush1.bf16.msra.mxu0 %v10568_v47  ;;  %5812 = vmatprep.subr.bf16.mxu1 %v10573_v48  ;;  %v3950_v47 = vrot.slane %v13344_v40, %v11452_v22  ;;  %v3958_v48 = vrot.slane %v13344_v40, %v3957_v20 }
 0xafa   : > { %5894 = vmatprep.subr.bf16.mxu0 %v10576_v44  ;;  %v10649_v44 = vld [vmem:[%s14316_s10 + $0x78] ss:$12 sps:$4 sm:$0xff]  }
 0xafb   : > { %5804 = vmatmul.mubr.bf16.vlgmr.msra.gmra.mrb[60].mxu1 %v12587_v8 }
 0xafc   : > { %5886 = vmatmul.mubr.bf16.vlgmr.msra.gmra.mrb[44].mxu0 %v12587_v8  ;;  %5813 = vmatpush1.bf16.msra.mxu1 %v10571_v41  ;;  %v10588_v8 = vld [vmem:[%s14314_s8 + $0x6ec] ss:$48 sps:$4 sm:$0xff]   ;;  %v10652_v41 = vld [vmem:[%s14316_s10 + $0x1f8] ss:$12 sps:$4 sm:$0xff]  }
 0xafd   : > { %5895 = vmatpush1.bf16.msra.mxu0 %v10574_v50  ;;  %5814 = vmatprep.subr.bf16.mxu1 %v10579_v53  ;;  %v10657_v50 = vld [vmem:[%s14316_s10 + $0x94] ss:$12 sps:$4 sm:$0xff]  }
 0xafe   : > { %5896 = vmatprep.subr.bf16.mxu0 %v10582_v54  ;;  %5844 = vmatprep.mubr.bf16.mxu1 %v11098_v49 }
 0xaff   : > { %5926 = vmatprep.mubr.bf16.mxu0 %v11098_v49  ;;  %v10594_v49 = vld [vmem:[%s14314_s8 + $0x74c] ss:$48 sps:$4 sm:$0xff]  }
 0xb00   : > { %5815 = vmatpush1.bf16.msra.mxu1 %v10577_v55  ;;  %v10660_v55 = vld [vmem:[%s14316_s10 + $0x214] ss:$12 sps:$4 sm:$0xff]  }
 0xb01   : > { %5897 = vmatpush1.bf16.msra.mxu0 %v10580_v56  ;;  %5816 = vmatprep.subr.bf16.mxu1 %v10585_v57 }
 0xb02   : > { %5898 = vmatprep.subr.bf16.mxu0 %v10588_v8 }
 0xb04   : > { %5817 = vmatpush1.bf16.msra.mxu1 %v10583_v58 }
 0xb05   : > { %5899 = vmatpush1.bf16.msra.mxu0 %v10586_v60  ;;  %5818 = vmatprep.subr.bf16.mxu1 %v10591_v61 }
 0xb06   : > { %5900 = vmatprep.subr.bf16.mxu0 %v10594_v49  ;;  %v10655_v49 = vld [vmem:[%s14316_s10 + $0x90] ss:$12 sps:$4 sm:$0xff]  }
 0xb08   : > { %5819 = vmatpush1.bf16.msra.mxu1 %v10589_v62 }
 0xb09   : > { %5901 = vmatpush1.bf16.msra.mxu0 %v10592_v0  ;;  %5820 = vmatprep.subr.bf16.mxu1 %v10597_v1  ;;  %v10658_v1 = vld [vmem:[%s14316_s10 + $0x210] ss:$12 sps:$4 sm:$0xff]  }
 0xb0a   : > { %5902 = vmatprep.subr.bf16.mxu0 %v10600_v4  ;;  %v10663_v4 = vld [vmem:[%s14316_s10 + $0xac] ss:$12 sps:$4 sm:$0xff]  }
 0xb0c   : > { %5821 = vmatpush1.bf16.msra.mxu1 %v10595_v2 }
 0xb0d   : > { %5903 = vmatpush1.bf16.msra.mxu0 %v10598_v5  ;;  %5822 = vmatprep.subr.bf16.mxu1 %v10603_v6  ;;  %v10666_v6 = vld [vmem:[%s14316_s10 + $0x22c] ss:$12 sps:$4 sm:$0xff]  }
 0xb0e   : > { %5904 = vmatprep.subr.bf16.mxu0 %v10606_v51 }
 0xb10   : > { %5823 = vmatpush1.bf16.msra.mxu1 %v10601_v7 }
 0xb11   : > { %5905 = vmatpush1.bf16.msra.mxu0 %v10604_v9  ;;  %5824 = vmatprep.subr.bf16.mxu1 %v10609_v10  ;;  %v10661_v9 = vld [vmem:[%s14316_s10 + $0xa8] ss:$12 sps:$4 sm:$0xff]  }
 0xb12   : > { %5906 = vmatprep.subr.bf16.mxu0 %v10612_v19  ;;  %v10664_v10 = vld [vmem:[%s14316_s10 + $0x228] ss:$12 sps:$4 sm:$0xff]   ;;  %v10669_v19 = vld [vmem:[%s14316_s10 + $0xc4] ss:$12 sps:$4 sm:$0xff]  }
 0xb14   : > { %5825 = vmatpush1.bf16.msra.mxu1 %v10607_v11  ;;  %v10672_v11 = vld [vmem:[%s14316_s10 + $0x244] ss:$12 sps:$4 sm:$0xff]  }
 0xb15   : > { %5907 = vmatpush1.bf16.msra.mxu0 %v10610_v12  ;;  %5826 = vmatprep.subr.bf16.mxu1 %v10615_v13  ;;  %v10667_v12 = vld [vmem:[%s14316_s10 + $0xc0] ss:$12 sps:$4 sm:$0xff]  }
 0xb16   : > { %5908 = vmatprep.subr.bf16.mxu0 %v10618_v15  ;;  %v10670_v13 = vld [vmem:[%s14316_s10 + $0x240] ss:$12 sps:$4 sm:$0xff]   ;;  %v10675_v15 = vld [vmem:[%s14316_s10 + $0xdc] ss:$12 sps:$4 sm:$0xff]  }
 0xb18   : > { %5827 = vmatpush1.bf16.msra.mxu1 %v10613_v18  ;;  %v10678_v18 = vld [vmem:[%s14316_s10 + $0x25c] ss:$12 sps:$4 sm:$0xff]  }
 0xb19   : > { %5909 = vmatpush1.bf16.msra.mxu0 %v10616_v3  ;;  %7896 = vmatprep.subr.bf16.mxu1 %v10621_v24  ;;  %v10673_v3 = vld [vmem:[%s14316_s10 + $0xd8] ss:$12 sps:$4 sm:$0xff]  }
 0xb1a   : > { %7937 = vmatprep.subr.bf16.mxu0 %v10624_v25  ;;  %v10676_v24 = vld [vmem:[%s14316_s10 + $0x258] ss:$12 sps:$4 sm:$0xff]   ;;  %v10681_v25 = vld [vmem:[%s14316_s10 + $0xf4] ss:$12 sps:$4 sm:$0xff]  }
 0xb1b   : > { %5845 = vmatmul.mubr.bf16.vlgmr.msra.gmra.mrb[60].mxu1 %v12693_v52 }
 0xb1c   : > { %5927 = vmatmul.mubr.bf16.vlgmr.msra.gmra.mrb[44].mxu0 %v12693_v52  ;;  %7897 = vmatpush1.bf16.msra.mxu1 %v10619_v26  ;;  %v10636_v52 = vld [vmem:[%s14316_s10 + $0x1b4] ss:$12 sps:$4 sm:$0xff]  }
 0xb1d   : > { %7938 = vmatpush1.bf16.msra.mxu0 %v10622_v29  ;;  %7898 = vmatprep.subr.bf16.mxu1 %v10627_v30  ;;  %v10684_v26 = vld [vmem:[%s14316_s10 + $0x274] ss:$12 sps:$4 sm:$0xff]   ;;  %v10679_v29 = vld [vmem:[%s14316_s10 + $0xf0] ss:$12 sps:$4 sm:$0xff]  }
 0xb1e   : > { %7939 = vmatprep.subr.bf16.mxu0 %v10630_v28  ;;  %v10682_v30 = vld [vmem:[%s14316_s10 + $0x270] ss:$12 sps:$4 sm:$0xff]   ;;  %v10687_v28 = vld [vmem:[%s14316_s10 + $0x10c] ss:$12 sps:$4 sm:$0xff]  }
 0xb20   : > { %7899 = vmatpush1.bf16.msra.mxu1 %v10625_v31  ;;  %v10690_v31 = vld [vmem:[%s14316_s10 + $0x28c] ss:$12 sps:$4 sm:$0xff]  }
 0xb21   : > { %7940 = vmatpush1.bf16.msra.mxu0 %v10628_v32  ;;  %7900 = vmatprep.subr.bf16.mxu1 %v10633_v33  ;;  %v10685_v32 = vld [vmem:[%s14316_s10 + $0x108] ss:$12 sps:$4 sm:$0xff]  }
 0xb22   : > { %7941 = vmatprep.subr.bf16.mxu0 %v10636_v52  ;;  %v10688_v33 = vld [vmem:[%s14316_s10 + $0x288] ss:$12 sps:$4 sm:$0xff]   ;;  %v10693_v52 = vld [vmem:[%s14316_s10 + $0x124] ss:$12 sps:$4 sm:$0xff]  }
 0xb24   : > { %7901 = vmatpush1.bf16.msra.mxu1 %v10631_v34  ;;  %v10696_v34 = vld [vmem:[%s14316_s10 + $0x2a4] ss:$12 sps:$4 sm:$0xff]  }
 0xb25   : > { %7942 = vmatpush1.bf16.msra.mxu0 %v10634_v35  ;;  %7902 = vmatprep.subr.bf16.mxu1 %v10639_v42  ;;  %v10691_v35 = vld [vmem:[%s14316_s10 + $0x120] ss:$12 sps:$4 sm:$0xff]  }
 0xb26   : > { %7943 = vmatprep.subr.bf16.mxu0 %v10642_v17  ;;  %v10694_v42 = vld [vmem:[%s14316_s10 + $0x2a0] ss:$12 sps:$4 sm:$0xff]   ;;  %v10699_v17 = vld [vmem:[%s14316_s10 + $0x13c] ss:$12 sps:$4 sm:$0xff]  }
 0xb28   : > { %7903 = vmatpush1.bf16.msra.mxu1 %v10637_v37  ;;  %v10702_v37 = vld [vmem:[%s14316_s10 + $0x2bc] ss:$12 sps:$4 sm:$0xff]  }
 0xb29   : > { %7944 = vmatpush1.bf16.msra.mxu0 %v10640_v36  ;;  %7904 = vmatprep.subr.bf16.mxu1 %v10645_v38  ;;  %v10697_v36 = vld [vmem:[%s14316_s10 + $0x138] ss:$12 sps:$4 sm:$0xff]   ;;  %v3946_v38 = vrot.slane %v13344_v40, %v11455_v23 }
 0xb2a   : > { %7945 = vmatprep.subr.bf16.mxu0 %v10648_v39  ;;  %v10700_v39 = vld [vmem:[%s14316_s10 + $0x2b8] ss:$12 sps:$4 sm:$0xff]  }
 0xb2c   : > { %7905 = vmatpush1.bf16.msra.mxu1 %v10643_v43  ;;  %v10705_v43 = vld [vmem:[%s14316_s10 + $0x154] ss:$12 sps:$4 sm:$0xff]  }
 0xb2d   : > { %7946 = vmatpush1.bf16.msra.mxu0 %v10646_v45  ;;  %7906 = vmatprep.subr.bf16.mxu1 %v10651_v63  ;;  %v3954_v45 = vrot.slane %v13344_v40, %v11546_v59  ;;  %v10708_v63 = vld [vmem:[%s14316_s10 + $0x2d4] ss:$12 sps:$4 sm:$0xff]  }
 0xb2e   : > { %v13366_v53 = vpop.f32.mrb[52].mxu1  ;;  %v13368_v54 = vpop.f32.mrb[36].mxu0  ;;  %7947 = vmatprep.subr.bf16.mxu0 %v10654_v46  ;;  %v10703_v46 = vld [vmem:[%s14316_s10 + $0x150] ss:$12 sps:$4 sm:$0xff]  }
 0xb2f   : > { %v5520_v56 = vpop.f32.mrb[53].mxu1  ;;  %v5602_v57 = vpop.f32.mrb[37].mxu0 }
 0xb30   : > { %v9677_v8 = vadd.f32 %v5520_v56, %v3950_v47  ;;  %v9679_v58 = vadd.f32 %v5602_v57, %v3958_v48  ;;  %v5522_v60 = vpop.f32.mrb[54].mxu1  ;;  %v5604_v61 = vpop.f32.mrb[38].mxu0  ;;  %7907 = vmatpush1.bf16.msra.mxu1 %v10649_v44  ;;  %v9676_v47 = vadd.f32 %v13366_v53, %v3946_v38  ;;  %v10706_v48 = vld [vmem:[%s14316_s10 + $0x2d0] ss:$12 sps:$4 sm:$0xff]   ;;  %v10711_v44 = vld [vmem:[%s14316_s10 + $0x16c] ss:$12 sps:$4 sm:$0xff]  }
 0xb31   : > { %7948 = vmatpush1.bf16.msra.mxu0 %v10652_v41  ;;  %v5523_v62 = vpop.f32.mrb[55].mxu1  ;;  %v5605_v0 = vpop.f32.mrb[39].mxu0  ;;  %7908 = vmatprep.subr.bf16.mxu1 %v10657_v50  ;;  %v9678_v41 = vadd.f32 %v13368_v54, %v3954_v45  ;;  %v10714_v50 = vld [vmem:[%s14316_s10 + $0x2ec] ss:$12 sps:$4 sm:$0xff]   ;;  %v10709_v53 = vld [vmem:[%s14316_s10 + $0x168] ss:$12 sps:$4 sm:$0xff]  }
 0xb32   : > { %v5936_v2 = vmax.f32 %v9677_v8, 0.0  ;;  %v5938_v5 = vmax.f32 %v9679_v58, 0.0  ;;  %7949 = vmatprep.subr.bf16.mxu0 %v10660_v55  ;;  %v5935_v55 = vmax.f32 %v9676_v47, 0.0  ;;  %v10712_v56 = vld [vmem:[%s14316_s10 + $0x2e8] ss:$12 sps:$4 sm:$0xff]  }
 0xb33   : > { %v10717_v54 = vld [vmem:[%s14316_s10 + $0x304] ss:$12 sps:$4 sm:$0xff]   ;;  %v5937_v57 = vmax.f32 %v9678_v41, 0.0  ;;  %v10715_v58 = vld [vmem:[%s14316_s10 + $0x300] ss:$12 sps:$4 sm:$0xff]  }
 0xb34   : > { %v13385_v51 = vpack.c.bf16 %v5936_v2, %v5936_v2  ;;  %v13387_v7 = vpack.c.bf16 %v5938_v5, %v5938_v5  ;;  %7909 = vmatpush1.bf16.msra.mxu1 %v10655_v49  ;;  %v10720_v8 = vld [vmem:[%s14316_s10 + $0x484] ss:$12 sps:$4 sm:$0xff]   ;;  %v13508_v60 = vpack.c.bf16 %v5935_v55, %v5935_v55  ;;  %v10718_v61 = vld [vmem:[%s14316_s10 + $0x480] ss:$12 sps:$4 sm:$0xff]   ;;  %v10723_v49 = vld [vmem:[%s14316_s10 + $0x31c] ss:$12 sps:$4 sm:$0xff]  }
 0xb35   : > { %7950 = vmatpush1.bf16.msra.mxu0 %v10658_v1  ;;  %7910 = vmatprep.subr.bf16.mxu1 %v10663_v4  ;;  %v13516_v62 = vpack.c.bf16 %v5937_v57, %v5937_v57  ;;  %v10726_v0 = vld [vmem:[%s14316_s10 + $0x49c] ss:$12 sps:$4 sm:$0xff]   ;;  %v10721_v1 = vld [vmem:[%s14316_s10 + $0x318] ss:$12 sps:$4 sm:$0xff]   ;;  %v10729_v2 = vld [vmem:[%s14316_s10 + $0x334] ss:$12 sps:$4 sm:$0xff]  }
 0xb36   : > { %7928 = vmatprep.mubr.bf16.mxu1 %v13385_v51  ;;  %7969 = vmatprep.mubr.bf16.mxu0 %v13387_v7  ;;  %v10724_v4 = vld [vmem:[%s14316_s10 + $0x498] ss:$12 sps:$4 sm:$0xff]   ;;  %v10732_v5 = vld [vmem:[%s14316_s10 + $0x4b4] ss:$12 sps:$4 sm:$0xff]   ;;  %v10771_v38 = vld [vmem:[%s14316_s10 + $0x3dc] ss:$12 sps:$4 sm:$0xff]  }
 0xb37   : > { %7951 = vmatprep.subr.bf16.mxu0 %v10666_v6  ;;  %v10727_v6 = vld [vmem:[%s14316_s10 + $0x330] ss:$12 sps:$4 sm:$0xff]   ;;  %v10772_v45 = vld [vmem:[%s14316_s10 + $0x558] ss:$12 sps:$4 sm:$0xff]   ;;  %v3965_v57 = vsub.s32 5, %v11449_v21 }
 0xb38   : > { %7911 = vmatpush1.bf16.msra.mxu1 %v10661_v9  ;;  %v10730_v9 = vld [vmem:[%s14316_s10 + $0x4b0] ss:$12 sps:$4 sm:$0xff]   ;;  %v10786_v41 = vld [vmem:[%s14316_s10 + $0x58c] ss:$12 sps:$4 sm:$0xff]  }
 0xb39   : > { %7952 = vmatpush1.bf16.msra.mxu0 %v10664_v10  ;;  %7912 = vmatprep.subr.bf16.mxu1 %v10669_v19  ;;  %v10735_v10 = vld [vmem:[%s14316_s10 + $0x34c] ss:$12 sps:$4 sm:$0xff]   ;;  %v10775_v47 = vld [vmem:[%s14316_s10 + $0x3f0] ss:$12 sps:$4 sm:$0xff]  }
 0xb3a   : > { %7953 = vmatprep.subr.bf16.mxu0 %v10672_v11  ;;  %v10738_v19 = vld [vmem:[%s14316_s10 + $0x4cc] ss:$12 sps:$4 sm:$0xff]   ;;  %v10733_v11 = vld [vmem:[%s14316_s10 + $0x348] ss:$12 sps:$4 sm:$0xff]   ;;  %v10789_v55 = vld [vmem:[%s14316_s10 + $0x424] ss:$12 sps:$4 sm:$0xff]  }
 0xb3c   : > { %7913 = vmatpush1.bf16.msra.mxu1 %v10667_v12  ;;  %v10736_v12 = vld [vmem:[%s14316_s10 + $0x4c8] ss:$12 sps:$4 sm:$0xff]  }
 0xb3d   : > { %7954 = vmatpush1.bf16.msra.mxu0 %v10670_v13  ;;  %7914 = vmatprep.subr.bf16.mxu1 %v10675_v15  ;;  %v10741_v13 = vld [vmem:[%s14316_s10 + $0x364] ss:$12 sps:$4 sm:$0xff]  }
 0xb3e   : > { %7955 = vmatprep.subr.bf16.mxu0 %v10678_v18  ;;  %v10744_v15 = vld [vmem:[%s14316_s10 + $0x4e4] ss:$12 sps:$4 sm:$0xff]   ;;  %v10739_v18 = vld [vmem:[%s14316_s10 + $0x360] ss:$12 sps:$4 sm:$0xff]  }
 0xb40   : > { %7915 = vmatpush1.bf16.msra.mxu1 %v10673_v3  ;;  %v10742_v3 = vld [vmem:[%s14316_s10 + $0x4e0] ss:$12 sps:$4 sm:$0xff]  }
 0xb41   : > { %7956 = vmatpush1.bf16.msra.mxu0 %v10676_v24  ;;  %7916 = vmatprep.subr.bf16.mxu1 %v10681_v25  ;;  %v10747_v24 = vld [vmem:[%s14316_s10 + $0x37c] ss:$12 sps:$4 sm:$0xff]  }
 0xb42   : > { %7957 = vmatprep.subr.bf16.mxu0 %v10684_v26  ;;  %v10750_v25 = vld [vmem:[%s14316_s10 + $0x4fc] ss:$12 sps:$4 sm:$0xff]   ;;  %v10745_v26 = vld [vmem:[%s14316_s10 + $0x378] ss:$12 sps:$4 sm:$0xff]  }
 0xb44   : > { %7917 = vmatpush1.bf16.msra.mxu1 %v10679_v29  ;;  %v10748_v29 = vld [vmem:[%s14316_s10 + $0x4f8] ss:$12 sps:$4 sm:$0xff]  }
 0xb45   : > { %7958 = vmatpush1.bf16.msra.mxu0 %v10682_v30  ;;  %7918 = vmatprep.subr.bf16.mxu1 %v10687_v28  ;;  %v10753_v30 = vld [vmem:[%s14316_s10 + $0x394] ss:$12 sps:$4 sm:$0xff]  }
 0xb46   : > { %7959 = vmatprep.subr.bf16.mxu0 %v10690_v31  ;;  %v10756_v28 = vld [vmem:[%s14316_s10 + $0x514] ss:$12 sps:$4 sm:$0xff]   ;;  %v10751_v31 = vld [vmem:[%s14316_s10 + $0x390] ss:$12 sps:$4 sm:$0xff]  }
 0xb48   : > { %7919 = vmatpush1.bf16.msra.mxu1 %v10685_v32  ;;  %v10754_v32 = vld [vmem:[%s14316_s10 + $0x510] ss:$12 sps:$4 sm:$0xff]  }
 0xb49   : > { %7960 = vmatpush1.bf16.msra.mxu0 %v10688_v33  ;;  %7920 = vmatprep.subr.bf16.mxu1 %v10693_v52  ;;  %v10759_v33 = vld [vmem:[%s14316_s10 + $0x3ac] ss:$12 sps:$4 sm:$0xff]  }
 0xb4a   : > { %7961 = vmatprep.subr.bf16.mxu0 %v10696_v34  ;;  %v10762_v52 = vld [vmem:[%s14316_s10 + $0x52c] ss:$12 sps:$4 sm:$0xff]   ;;  %v10757_v34 = vld [vmem:[%s14316_s10 + $0x3a8] ss:$12 sps:$4 sm:$0xff]  }
 0xb4c   : > { %7921 = vmatpush1.bf16.msra.mxu1 %v10691_v35  ;;  %v10760_v35 = vld [vmem:[%s14316_s10 + $0x528] ss:$12 sps:$4 sm:$0xff]  }
 0xb4d   : > { %7962 = vmatpush1.bf16.msra.mxu0 %v10694_v42  ;;  %7922 = vmatprep.subr.bf16.mxu1 %v10699_v17  ;;  %v10765_v42 = vld [vmem:[%s14316_s10 + $0x3c4] ss:$12 sps:$4 sm:$0xff]  }
 0xb4e   : > { %7963 = vmatprep.subr.bf16.mxu0 %v10702_v37  ;;  %v10768_v17 = vld [vmem:[%s14316_s10 + $0x544] ss:$12 sps:$4 sm:$0xff]   ;;  %v10763_v37 = vld [vmem:[%s14316_s10 + $0x3c0] ss:$12 sps:$4 sm:$0xff]  }
 0xb50   : > { %7923 = vmatpush1.bf16.msra.mxu1 %v10697_v36  ;;  %v10766_v36 = vld [vmem:[%s14316_s10 + $0x540] ss:$12 sps:$4 sm:$0xff]  }
 0xb51   : > { %7964 = vmatpush1.bf16.msra.mxu0 %v10700_v39  ;;  %7924 = vmatprep.subr.bf16.mxu1 %v10705_v43  ;;  %v10774_v39 = vld [vmem:[%s14316_s10 + $0x55c] ss:$12 sps:$4 sm:$0xff]   ;;  %v10769_v43 = vld [vmem:[%s14316_s10 + $0x3d8] ss:$12 sps:$4 sm:$0xff]  }
 0xb52   : > { %7965 = vmatprep.subr.bf16.mxu0 %v10708_v63  ;;  %v10777_v63 = vld [vmem:[%s14316_s10 + $0x3f4] ss:$12 sps:$4 sm:$0xff]  }
 0xb54   : > { %7925 = vmatpush1.bf16.msra.mxu1 %v10703_v46  ;;  %v10780_v46 = vld [vmem:[%s14316_s10 + $0x574] ss:$12 sps:$4 sm:$0xff]  }
 0xb55   : > { %7966 = vmatpush1.bf16.msra.mxu0 %v10706_v48  ;;  %7926 = vmatprep.subr.bf16.mxu1 %v10711_v44  ;;  %v10778_v48 = vld [vmem:[%s14316_s10 + $0x570] ss:$12 sps:$4 sm:$0xff]   ;;  %v10783_v44 = vld [vmem:[%s14316_s10 + $0x40c] ss:$12 sps:$4 sm:$0xff]  }
 0xb56   : > { %7967 = vmatprep.subr.bf16.mxu0 %v10714_v50  ;;  %v10781_v50 = vld [vmem:[%s14316_s10 + $0x408] ss:$12 sps:$4 sm:$0xff]  }
 0xb58   : > { %7927 = vmatpush1.bf16.msra.mxu1 %v10709_v53  ;;  %v10784_v53 = vld [vmem:[%s14316_s10 + $0x588] ss:$12 sps:$4 sm:$0xff]  }
 0xb59   : > { %7968 = vmatpush1.bf16.msra.mxu0 %v10712_v56  ;;  %7978 = vmatprep.subr.bf16.mxu1 %v10717_v54  ;;  %v10792_v56 = vld [vmem:[%s14316_s10 + $0x5a4] ss:$12 sps:$4 sm:$0xff]   ;;  %v10787_v54 = vld [vmem:[%s14316_s10 + $0x420] ss:$12 sps:$4 sm:$0xff]  }
 0xb5a   : > { %8019 = vmatprep.subr.bf16.mxu0 %v10720_v8  ;;  %v10790_v8 = vld [vmem:[%s14316_s10 + $0x5a0] ss:$12 sps:$4 sm:$0xff]  }
 0xb5b   : > { %7929 = vmatmul.mubr.bf16.vlgmr.msra.gmra.mrb[64].mxu1 %v13508_v60 }
 0xb5c   : > { %7970 = vmatmul.mubr.bf16.vlgmr.msra.gmra.mrb[48].mxu0 %v13516_v62  ;;  %7979 = vmatpush1.bf16.msra.mxu1 %v10715_v58  ;;  %v3961_v58 = vsub.s32 4, %v11449_v21 }
 0xb5d   : > { %8020 = vmatpush1.bf16.msra.mxu0 %v10718_v61  ;;  %7980 = vmatprep.subr.bf16.mxu1 %v10723_v49  ;;  %v3973_v61 = vsub.s32 7, %v11449_v21  ;;  %v10795_v49 = vld [vmem:[%s14316_s10 + $0x43c] ss:$12 sps:$4 sm:$0xff]  }
 0xb5e   : > { %8021 = vmatprep.subr.bf16.mxu0 %v10726_v0  ;;  %v3969_v0 = vsub.s32 6, %v11449_v21  ;;  %v10909_v21 = vld [vmem:[%s14316_s10 + $0x8] ss:$12 sps:$4 sm:$0xff]  }
 0xb60   : > { %7981 = vmatpush1.bf16.msra.mxu1 %v10721_v1  ;;  %v10798_v1 = vld [vmem:[%s14316_s10 + $0x5bc] ss:$12 sps:$4 sm:$0xff]  }
 0xb61   : > { %8022 = vmatpush1.bf16.msra.mxu0 %v10724_v4  ;;  %7982 = vmatprep.subr.bf16.mxu1 %v10729_v2  ;;  %v3966_v4 = vrot.slane %v13344_v40, %v3965_v57  ;;  %v10793_v2 = vld [vmem:[%s14316_s10 + $0x438] ss:$12 sps:$4 sm:$0xff]   ;;  %v10826_v57 = vld [vmem:[%s14316_s10 + $0x7b0] ss:$12 sps:$4 sm:$0xff]  }
 0xb62   : > { %8023 = vmatprep.subr.bf16.mxu0 %v10732_v5  ;;  %v3962_v5 = vrot.slane %v13344_v40, %v3961_v58  ;;  %v10834_v58 = vld [vmem:[%s14316_s10 + $0x7cc] ss:$12 sps:$4 sm:$0xff]  }
 0xb64   : > { %7983 = vmatpush1.bf16.msra.mxu1 %v10727_v6  ;;  %v3974_v6 = vrot.slane %v13344_v40, %v3973_v61  ;;  %v10829_v61 = vld [vmem:[%s14316_s10 + $0x648] ss:$12 sps:$4 sm:$0xff]  }
 0xb65   : > { %8024 = vmatpush1.bf16.msra.mxu0 %v10730_v9  ;;  %7984 = vmatprep.subr.bf16.mxu1 %v10735_v10  ;;  %v10796_v9 = vld [vmem:[%s14316_s10 + $0x5b8] ss:$12 sps:$4 sm:$0xff]   ;;  %v10801_v10 = vld [vmem:[%s14316_s10 + $0x454] ss:$12 sps:$4 sm:$0xff]  }
 0xb66   : > { %8025 = vmatprep.subr.bf16.mxu0 %v10738_v19 }
 0xb68   : > { %7985 = vmatpush1.bf16.msra.mxu1 %v10733_v11  ;;  %v3970_v11 = vrot.slane %v13344_v40, %v3969_v0  ;;  %v10837_v0 = vld [vmem:[%s14316_s10 + $0x664] ss:$12 sps:$4 sm:$0xff]  }
 0xb69   : > { %8026 = vmatpush1.bf16.msra.mxu0 %v10736_v12  ;;  %7986 = vmatprep.subr.bf16.mxu1 %v10741_v13  ;;  %v10804_v12 = vld [vmem:[%s14316_s10 + $0x5d4] ss:$12 sps:$4 sm:$0xff]  }
 0xb6a   : > { %8027 = vmatprep.subr.bf16.mxu0 %v10744_v15 }
 0xb6c   : > { %7987 = vmatpush1.bf16.msra.mxu1 %v10739_v18 }
 0xb6d   : > { %8028 = vmatpush1.bf16.msra.mxu0 %v10742_v3  ;;  %7988 = vmatprep.subr.bf16.mxu1 %v10747_v24 }
 0xb6e   : > { %8029 = vmatprep.subr.bf16.mxu0 %v10750_v25  ;;  %v10799_v25 = vld [vmem:[%s14316_s10 + $0x450] ss:$12 sps:$4 sm:$0xff]  }
 0xb70   : > { %7989 = vmatpush1.bf16.msra.mxu1 %v10745_v26 }
 0xb71   : > { %8030 = vmatpush1.bf16.msra.mxu0 %v10748_v29  ;;  %7990 = vmatprep.subr.bf16.mxu1 %v10753_v30 }
 0xb72   : > { %8031 = vmatprep.subr.bf16.mxu0 %v10756_v28  ;;  %v10802_v28 = vld [vmem:[%s14316_s10 + $0x5d0] ss:$12 sps:$4 sm:$0xff]  }
 0xb74   : > { %7991 = vmatpush1.bf16.msra.mxu1 %v10751_v31  ;;  %v10807_v31 = vld [vmem:[%s14316_s10 + $0x46c] ss:$12 sps:$4 sm:$0xff]  }
 0xb75   : > { %8032 = vmatpush1.bf16.msra.mxu0 %v10754_v32  ;;  %7992 = vmatprep.subr.bf16.mxu1 %v10759_v33 }
 0xb76   : > { %8033 = vmatprep.subr.bf16.mxu0 %v10762_v52 }
 0xb78   : > { %7993 = vmatpush1.bf16.msra.mxu1 %v10757_v34  ;;  %v10810_v34 = vld [vmem:[%s14316_s10 + $0x5ec] ss:$12 sps:$4 sm:$0xff]  }
 0xb79   : > { %8034 = vmatpush1.bf16.msra.mxu0 %v10760_v35  ;;  %7994 = vmatprep.subr.bf16.mxu1 %v10765_v42 }
 0xb7a   : > { %8035 = vmatprep.subr.bf16.mxu0 %v10768_v17  ;;  %v10805_v17 = vld [vmem:[%s14316_s10 + $0x468] ss:$12 sps:$4 sm:$0xff]  }
 0xb7c   : > { %7995 = vmatpush1.bf16.msra.mxu1 %v10763_v37 }
 0xb7d   : > { %8036 = vmatpush1.bf16.msra.mxu0 %v10766_v36  ;;  %7996 = vmatprep.subr.bf16.mxu1 %v10771_v38  ;;  %v10808_v38 = vld [vmem:[%s14316_s10 + $0x5e8] ss:$12 sps:$4 sm:$0xff]  }
 0xb7e   : > { %8037 = vmatprep.subr.bf16.mxu0 %v10774_v39  ;;  %v10813_v39 = vld [vmem:[%s14316_s10 + $0x604] ss:$12 sps:$4 sm:$0xff]  }
 0xb80   : > { %7997 = vmatpush1.bf16.msra.mxu1 %v10769_v43 }
 0xb81   : > { %8038 = vmatpush1.bf16.msra.mxu0 %v10772_v45  ;;  %7998 = vmatprep.subr.bf16.mxu1 %v10777_v63  ;;  %v10816_v45 = vld [vmem:[%s14316_s10 + $0x784] ss:$12 sps:$4 sm:$0xff]   ;;  %v10811_v63 = vld [vmem:[%s14316_s10 + $0x600] ss:$12 sps:$4 sm:$0xff]  }
 0xb82   : > { %8039 = vmatprep.subr.bf16.mxu0 %v10780_v46 }
 0xb84   : > { %7999 = vmatpush1.bf16.msra.mxu1 %v10775_v47  ;;  %v10814_v47 = vld [vmem:[%s14316_s10 + $0x780] ss:$12 sps:$4 sm:$0xff]  }
 0xb85   : > { %8040 = vmatpush1.bf16.msra.mxu0 %v10778_v48  ;;  %8000 = vmatprep.subr.bf16.mxu1 %v10783_v44  ;;  %v10819_v48 = vld [vmem:[%s14316_s10 + $0x61c] ss:$12 sps:$4 sm:$0xff]  }
 0xb86   : > { %8041 = vmatprep.subr.bf16.mxu0 %v10786_v41  ;;  %v10822_v41 = vld [vmem:[%s14316_s10 + $0x79c] ss:$12 sps:$4 sm:$0xff]  }
 0xb88   : > { %8001 = vmatpush1.bf16.msra.mxu1 %v10781_v50  ;;  %v10817_v50 = vld [vmem:[%s14316_s10 + $0x618] ss:$12 sps:$4 sm:$0xff]  }
 0xb89   : > { %8042 = vmatpush1.bf16.msra.mxu0 %v10784_v53  ;;  %8002 = vmatprep.subr.bf16.mxu1 %v10789_v55  ;;  %v10820_v53 = vld [vmem:[%s14316_s10 + $0x798] ss:$12 sps:$4 sm:$0xff]   ;;  %v10825_v55 = vld [vmem:[%s14316_s10 + $0x634] ss:$12 sps:$4 sm:$0xff]  }
 0xb8a   : > { %8043 = vmatprep.subr.bf16.mxu0 %v10792_v56  ;;  %v10828_v56 = vld [vmem:[%s14316_s10 + $0x7b4] ss:$12 sps:$4 sm:$0xff]  }
 0xb8c   : > { %8003 = vmatpush1.bf16.msra.mxu1 %v10787_v54  ;;  %v10823_v54 = vld [vmem:[%s14316_s10 + $0x630] ss:$12 sps:$4 sm:$0xff]  }
 0xb8d   : > { %8044 = vmatpush1.bf16.msra.mxu0 %v10790_v8  ;;  %8004 = vmatprep.subr.bf16.mxu1 %v10795_v49  ;;  %v10831_v8 = vld [vmem:[%s14316_s10 + $0x64c] ss:$12 sps:$4 sm:$0xff]   ;;  %v10832_v49 = vld [vmem:[%s14316_s10 + $0x7c8] ss:$12 sps:$4 sm:$0xff]  }
 0xb8e   : > { %v5682_v19 = vpop.f32.mrb[56].mxu1  ;;  %8045 = vmatprep.subr.bf16.mxu0 %v10798_v1  ;;  %v10840_v1 = vld [vmem:[%s14316_s10 + $0x7e4] ss:$12 sps:$4 sm:$0xff]  }
 0xb8f   : > { %v5764_v13 = vpop.f32.mrb[40].mxu0  ;;  %v5684_v15 = vpop.f32.mrb[57].mxu1  ;;  %v9680_v26 = vadd.f32 %v5682_v19, %v3962_v5  ;;  %v10843_v5 = vld [vmem:[%s14316_s10 + $0x67c] ss:$12 sps:$4 sm:$0xff]   ;;  %v10849_v19 = vld [vmem:[%s14316_s10 + $0x694] ss:$12 sps:$4 sm:$0xff]  }
 0xb90   : > { %v9681_v18 = vadd.f32 %v5684_v15, %v3966_v4  ;;  %v5766_v3 = vpop.f32.mrb[41].mxu0  ;;  %v5686_v24 = vpop.f32.mrb[58].mxu1  ;;  %8005 = vmatpush1.bf16.msra.mxu1 %v10793_v2  ;;  %v9682_v32 = vadd.f32 %v5764_v13, %v3970_v11  ;;  %v10835_v4 = vld [vmem:[%s14316_s10 + $0x660] ss:$12 sps:$4 sm:$0xff]   ;;  %v10850_v13 = vld [vmem:[%s14316_s10 + $0x810] ss:$12 sps:$4 sm:$0xff]  }
 0xb91   : > { %v9683_v29 = vadd.f32 %v5766_v3, %v3974_v6  ;;  %v5768_v30 = vpop.f32.mrb[42].mxu0  ;;  %8046 = vmatpush1.bf16.msra.mxu0 %v10796_v9  ;;  %v5687_v40 = vpop.f32.mrb[59].mxu1  ;;  %8006 = vmatprep.subr.bf16.mxu1 %v10801_v10  ;;  %v5939_v37 = vmax.f32 %v9680_v26, 0.0  ;;  %v10838_v2 = vld [vmem:[%s14316_s10 + $0x7e0] ss:$12 sps:$4 sm:$0xff]  }
 0xb92   : > { %v5940_v33 = vmax.f32 %v9681_v18, 0.0  ;;  %v5769_v52 = vpop.f32.mrb[43].mxu0  ;;  %8047 = vmatprep.subr.bf16.mxu0 %v10804_v12  ;;  %v5941_v43 = vmax.f32 %v9682_v32, 0.0  ;;  %v10846_v6 = vld [vmem:[%s14316_s10 + $0x7fc] ss:$12 sps:$4 sm:$0xff]  }
 0xb93   : > { %v5942_v35 = vmax.f32 %v9683_v29, 0.0  ;;  %v13720_v46 = vpack.c.bf16 %v5939_v37, %v5939_v37  ;;  %v10841_v9 = vld [vmem:[%s14316_s10 + $0x678] ss:$12 sps:$4 sm:$0xff]   ;;  %v10852_v11 = vld [vmem:[%s14316_s10 + $0x814] ss:$12 sps:$4 sm:$0xff]  }
 0xb94   : > { %v13699_v42 = vpack.c.bf16 %v5940_v33, %v5940_v33  ;;  %8007 = vmatpush1.bf16.msra.mxu1 %v10799_v25  ;;  %v13728_v44 = vpack.c.bf16 %v5941_v43, %v5941_v43  ;;  %v10844_v10 = vld [vmem:[%s14316_s10 + $0x7f8] ss:$12 sps:$4 sm:$0xff]   ;;  %v10847_v12 = vld [vmem:[%s14316_s10 + $0x690] ss:$12 sps:$4 sm:$0xff]   ;;  %v10853_v3 = vld [vmem:[%s14316_s10 + $0x6a8] ss:$12 sps:$4 sm:$0xff]  }
 0xb95   : > { %v13704_v36 = vpack.c.bf16 %v5942_v35, %v5942_v35  ;;  %8048 = vmatpush1.bf16.msra.mxu0 %v10802_v28  ;;  %8008 = vmatprep.subr.bf16.mxu1 %v10807_v31  ;;  %v10855_v15 = vld [vmem:[%s14316_s10 + $0x6ac] ss:$12 sps:$4 sm:$0xff]   ;;  %v10856_v24 = vld [vmem:[%s14316_s10 + $0x828] ss:$12 sps:$4 sm:$0xff]   ;;  %v10861_v25 = vld [vmem:[%s14316_s10 + $0x6c4] ss:$12 sps:$4 sm:$0xff]  }
 0xb96   : > { %8010 = vmatprep.mubr.bf16.mxu1 %v13699_v42  ;;  %8049 = vmatprep.subr.bf16.mxu0 %v10810_v34  ;;  %v10858_v18 = vld [vmem:[%s14316_s10 + $0x82c] ss:$12 sps:$4 sm:$0xff]   ;;  %v10864_v26 = vld [vmem:[%s14316_s10 + $0x844] ss:$12 sps:$4 sm:$0xff]   ;;  %v10867_v40 = vld [vmem:[%s14316_s10 + $0x6dc] ss:$12 sps:$4 sm:$0xff]  }
 0xb97   : > { %8051 = vmatprep.mubr.bf16.mxu0 %v13704_v36  ;;  %v10859_v29 = vld [vmem:[%s14316_s10 + $0x6c0] ss:$12 sps:$4 sm:$0xff]   ;;  %v10870_v28 = vld [vmem:[%s14316_s10 + $0x85c] ss:$12 sps:$4 sm:$0xff]   ;;  %v10865_v31 = vld [vmem:[%s14316_s10 + $0x6d8] ss:$12 sps:$4 sm:$0xff]  }
 0xb98   : > { %8009 = vmatpush1.bf16.msra.mxu1 %v10805_v17  ;;  %v10862_v30 = vld [vmem:[%s14316_s10 + $0x840] ss:$12 sps:$4 sm:$0xff]   ;;  %v10868_v32 = vld [vmem:[%s14316_s10 + $0x858] ss:$12 sps:$4 sm:$0xff]   ;;  %v10871_v34 = vld [vmem:[%s14316_s10 + $0x6f0] ss:$12 sps:$4 sm:$0xff]  }
 0xb99   : > { %8050 = vmatpush1.bf16.msra.mxu0 %v10808_v38  ;;  %8060 = vmatprep.subr.bf16.mxu1 %v10813_v39  ;;  %v10873_v33 = vld [vmem:[%s14316_s10 + $0x6f4] ss:$12 sps:$4 sm:$0xff]   ;;  %v10874_v35 = vld [vmem:[%s14316_s10 + $0x870] ss:$12 sps:$4 sm:$0xff]   ;;  %v10879_v17 = vld [vmem:[%s14316_s10 + $0x70c] ss:$12 sps:$4 sm:$0xff]  }
 0xb9a   : > { %8101 = vmatprep.subr.bf16.mxu0 %v10816_v45  ;;  %v10876_v52 = vld [vmem:[%s14316_s10 + $0x874] ss:$12 sps:$4 sm:$0xff]   ;;  %v10882_v37 = vld [vmem:[%s14316_s10 + $0x88c] ss:$12 sps:$4 sm:$0xff]   ;;  %v10885_v43 = vld [vmem:[%s14316_s10 + $0x724] ss:$12 sps:$4 sm:$0xff]  }
 0xb9b   : > { %8011 = vmatmul.mubr.bf16.vlgmr.msra.gmra.mrb[68].mxu1 %v13720_v46  ;;  %v10877_v38 = vld [vmem:[%s14316_s10 + $0x708] ss:$12 sps:$4 sm:$0xff]   ;;  %v10888_v45 = vld [vmem:[%s14316_s10 + $0x8a4] ss:$12 sps:$4 sm:$0xff]  }
 0xb9c   : > { %8052 = vmatmul.mubr.bf16.vlgmr.msra.gmra.mrb[52].mxu0 %v13728_v44  ;;  %8061 = vmatpush1.bf16.msra.mxu1 %v10811_v63  ;;  %v10880_v39 = vld [vmem:[%s14316_s10 + $0x888] ss:$12 sps:$4 sm:$0xff]   ;;  %v10883_v63 = vld [vmem:[%s14316_s10 + $0x720] ss:$12 sps:$4 sm:$0xff]  }
 0xb9d   : > { %8102 = vmatpush1.bf16.msra.mxu0 %v10814_v47  ;;  %8062 = vmatprep.subr.bf16.mxu1 %v10819_v48  ;;  %v10886_v47 = vld [vmem:[%s14316_s10 + $0x8a0] ss:$12 sps:$4 sm:$0xff]   ;;  %v10891_v48 = vld [vmem:[%s14316_s10 + $0x73c] ss:$12 sps:$4 sm:$0xff]  }
 0xb9e   : > { %8103 = vmatprep.subr.bf16.mxu0 %v10822_v41  ;;  %v10894_v41 = vld [vmem:[%s14316_s10 + $0x8bc] ss:$12 sps:$4 sm:$0xff]  }
 0xba0   : > { %8063 = vmatpush1.bf16.msra.mxu1 %v10817_v50  ;;  %v10889_v50 = vld [vmem:[%s14316_s10 + $0x738] ss:$12 sps:$4 sm:$0xff]  }
 0xba1   : > { %8104 = vmatpush1.bf16.msra.mxu0 %v10820_v53  ;;  %8064 = vmatprep.subr.bf16.mxu1 %v10825_v55  ;;  %v10892_v53 = vld [vmem:[%s14316_s10 + $0x8b8] ss:$12 sps:$4 sm:$0xff]   ;;  %v10897_v55 = vld [vmem:[%s14316_s10 + $0x754] ss:$12 sps:$4 sm:$0xff]  }
 0xba2   : > { %8105 = vmatprep.subr.bf16.mxu0 %v10828_v56  ;;  %v10900_v56 = vld [vmem:[%s14316_s10 + $0x8d4] ss:$12 sps:$4 sm:$0xff]  }
 0xba4   : > { %8065 = vmatpush1.bf16.msra.mxu1 %v10823_v54  ;;  %v10895_v54 = vld [vmem:[%s14316_s10 + $0x750] ss:$12 sps:$4 sm:$0xff]  }
 0xba5   : > { %8106 = vmatpush1.bf16.msra.mxu0 %v10826_v57  ;;  %8066 = vmatprep.subr.bf16.mxu1 %v10831_v8  ;;  %v10898_v57 = vld [vmem:[%s14316_s10 + $0x8d0] ss:$12 sps:$4 sm:$0xff]   ;;  %v10903_v8 = vld [vmem:[%s14316_s10 + $0x76c] ss:$12 sps:$4 sm:$0xff]  }
 0xba6   : > { %8107 = vmatprep.subr.bf16.mxu0 %v10834_v58  ;;  %v10906_v58 = vld [vmem:[%s14316_s10 + $0x8ec] ss:$12 sps:$4 sm:$0xff]  }
 0xba8   : > { %8067 = vmatpush1.bf16.msra.mxu1 %v10829_v61  ;;  %v10901_v61 = vld [vmem:[%s14316_s10 + $0x768] ss:$12 sps:$4 sm:$0xff]  }
 0xba9   : > { %8108 = vmatpush1.bf16.msra.mxu0 %v10832_v49  ;;  %8068 = vmatprep.subr.bf16.mxu1 %v10837_v0  ;;  %v10904_v49 = vld [vmem:[%s14316_s10 + $0x8e8] ss:$12 sps:$4 sm:$0xff]  }
 0xbaa   : > { %8109 = vmatprep.subr.bf16.mxu0 %v10840_v1  ;;  %v10907_v0 = vld [vmem:[%s14316_s10 + $0xc8] ss:$12 sps:$4 sm:$0xff]  }
 0xbab   : > { %v10908_v1 = vld [vmem:[%s14316_s10 + $0x248] ss:$12 sps:$4 sm:$0xff]  }
 0xbac   : > { %8069 = vmatpush1.bf16.msra.mxu1 %v10835_v4  ;;  %v3940_v4 = vld [vmem:[%s14315_s9 + $0x8] sm:$0xf] }
 0xbad   : > { %8110 = vmatpush1.bf16.msra.mxu0 %v10838_v2  ;;  %8070 = vmatprep.subr.bf16.mxu1 %v10843_v5  ;;  %v3978_v2 = vrot.slane %v3940_v4, %v11455_v23  ;;  %v3986_v5 = vrot.slane %v3940_v4, %v11546_v59 }
 0xbae   : > { %8111 = vmatprep.subr.bf16.mxu0 %v10846_v6  ;;  %v3982_v6 = vrot.slane %v3940_v4, %v11452_v22 }
 0xbb0   : > { %8071 = vmatpush1.bf16.msra.mxu1 %v10841_v9  ;;  %v3990_v9 = vrot.slane %v3940_v4, %v3957_v20  ;;  %v10936_v4 = vld [vmem:[%s14316_s10 + $0x2f0] ss:$12 sps:$4 sm:$0xff]  }
 0xbb1   : > { %8112 = vmatpush1.bf16.msra.mxu0 %v10844_v10  ;;  %8072 = vmatprep.subr.bf16.mxu1 %v10849_v19 }
 0xbb2   : > { %8113 = vmatprep.subr.bf16.mxu0 %v10852_v11 }
 0xbb4   : > { %8073 = vmatpush1.bf16.msra.mxu1 %v10847_v12 }
 0xbb5   : > { %8114 = vmatpush1.bf16.msra.mxu0 %v10850_v13  ;;  %8074 = vmatprep.subr.bf16.mxu1 %v10855_v15 }
 0xbb6   : > { %8115 = vmatprep.subr.bf16.mxu0 %v10858_v18 }
 0xbb8   : > { %8075 = vmatpush1.bf16.msra.mxu1 %v10853_v3 }
 0xbb9   : > { %8116 = vmatpush1.bf16.msra.mxu0 %v10856_v24  ;;  %8076 = vmatprep.subr.bf16.mxu1 %v10861_v25 }
 0xbba   : > { %8117 = vmatprep.subr.bf16.mxu0 %v10864_v26 }
 0xbbc   : > { %8077 = vmatpush1.bf16.msra.mxu1 %v10859_v29 }
 0xbbd   : > { %8118 = vmatpush1.bf16.msra.mxu0 %v10862_v30  ;;  %8078 = vmatprep.subr.bf16.mxu1 %v10867_v40 }
 0xbbe   : > { %8119 = vmatprep.subr.bf16.mxu0 %v10870_v28 }
 0xbc0   : > { %8079 = vmatpush1.bf16.msra.mxu1 %v10865_v31 }
 0xbc1   : > { %8120 = vmatpush1.bf16.msra.mxu0 %v10868_v32  ;;  %8080 = vmatprep.subr.bf16.mxu1 %v10873_v33 }
 0xbc2   : > { %8121 = vmatprep.subr.bf16.mxu0 %v10876_v52  ;;  %v10910_v52 = vld [vmem:[%s14316_s10 + $0x188] ss:$12 sps:$4 sm:$0xff]  }
 0xbc4   : > { %8081 = vmatpush1.bf16.msra.mxu1 %v10871_v34 }
 0xbc5   : > { %8122 = vmatpush1.bf16.msra.mxu0 %v10874_v35  ;;  %8082 = vmatprep.subr.bf16.mxu1 %v10879_v17  ;;  %v10911_v35 = vld [vmem:[%s14316_s10 + $0xe0] ss:$12 sps:$4 sm:$0xff]  }
 0xbc6   : > { %8123 = vmatprep.subr.bf16.mxu0 %v10882_v37  ;;  %v10912_v17 = vld [vmem:[%s14316_s10 + $0x260] ss:$12 sps:$4 sm:$0xff]  }
 0xbc7   : > { %v10913_v37 = vld [vmem:[%s14316_s10 + $0x20] ss:$12 sps:$4 sm:$0xff]  }
 0xbc8   : > { %8083 = vmatpush1.bf16.msra.mxu1 %v10877_v38  ;;  %v10914_v38 = vld [vmem:[%s14316_s10 + $0x1a0] ss:$12 sps:$4 sm:$0xff]  }
 0xbc9   : > { %8124 = vmatpush1.bf16.msra.mxu0 %v10880_v39  ;;  %8084 = vmatprep.subr.bf16.mxu1 %v10885_v43  ;;  %v10915_v39 = vld [vmem:[%s14316_s10 + $0xf8] ss:$12 sps:$4 sm:$0xff]  }
 0xbca   : > { %8125 = vmatprep.subr.bf16.mxu0 %v10888_v45  ;;  %v10916_v43 = vld [vmem:[%s14316_s10 + $0x278] ss:$12 sps:$4 sm:$0xff]  }
 0xbcb   : > { %v10918_v45 = vld [vmem:[%s14316_s10 + $0x1b8] ss:$12 sps:$4 sm:$0xff]  }
 0xbcc   : > { %8085 = vmatpush1.bf16.msra.mxu1 %v10883_v63  ;;  %v10920_v63 = vld [vmem:[%s14316_s10 + $0x290] ss:$12 sps:$4 sm:$0xff]  }
 0xbcd   : > { %8126 = vmatpush1.bf16.msra.mxu0 %v10886_v47  ;;  %8086 = vmatprep.subr.bf16.mxu1 %v10891_v48  ;;  %v10921_v47 = vld [vmem:[%s14316_s10 + $0x50] ss:$12 sps:$4 sm:$0xff]  }
 0xbce   : > { %8127 = vmatprep.subr.bf16.mxu0 %v10894_v41  ;;  %v10922_v48 = vld [vmem:[%s14316_s10 + $0x1d0] ss:$12 sps:$4 sm:$0xff]   ;;  %v10923_v41 = vld [vmem:[%s14316_s10 + $0x128] ss:$12 sps:$4 sm:$0xff]  }
 0xbd0   : > { %8087 = vmatpush1.bf16.msra.mxu1 %v10889_v50  ;;  %v10924_v50 = vld [vmem:[%s14316_s10 + $0x2a8] ss:$12 sps:$4 sm:$0xff]  }
 0xbd1   : > { %8128 = vmatpush1.bf16.msra.mxu0 %v10892_v53  ;;  %8088 = vmatprep.subr.bf16.mxu1 %v10897_v55  ;;  %v10925_v53 = vld [vmem:[%s14316_s10 + $0x68] ss:$12 sps:$4 sm:$0xff]  }
 0xbd2   : > { %8129 = vmatprep.subr.bf16.mxu0 %v10900_v56  ;;  %v10926_v55 = vld [vmem:[%s14316_s10 + $0x1e8] ss:$12 sps:$4 sm:$0xff]   ;;  %v10927_v56 = vld [vmem:[%s14316_s10 + $0x140] ss:$12 sps:$4 sm:$0xff]  }
 0xbd4   : > { %8089 = vmatpush1.bf16.msra.mxu1 %v10895_v54  ;;  %v10928_v54 = vld [vmem:[%s14316_s10 + $0x2c0] ss:$12 sps:$4 sm:$0xff]  }
 0xbd5   : > { %8130 = vmatpush1.bf16.msra.mxu0 %v10898_v57  ;;  %8090 = vmatprep.subr.bf16.mxu1 %v10903_v8  ;;  %v10929_v57 = vld [vmem:[%s14316_s10 + $0x80] ss:$12 sps:$4 sm:$0xff]  }
 0xbd6   : > { %8131 = vmatprep.subr.bf16.mxu0 %v10906_v58  ;;  %v10930_v8 = vld [vmem:[%s14316_s10 + $0x200] ss:$12 sps:$4 sm:$0xff]   ;;  %v10931_v58 = vld [vmem:[%s14316_s10 + $0x158] ss:$12 sps:$4 sm:$0xff]  }
 0xbd8   : > { %8091 = vmatpush1.bf16.msra.mxu1 %v10901_v61  ;;  %v10932_v61 = vld [vmem:[%s14316_s10 + $0x2d8] ss:$12 sps:$4 sm:$0xff]  }
 0xbd9   : > { %8132 = vmatpush1.bf16.msra.mxu0 %v10904_v49  ;;  %9432 = vmatprep.subr.bf16.mxu1 %v10907_v0  ;;  %v10933_v49 = vld [vmem:[%s14316_s10 + $0x98] ss:$12 sps:$4 sm:$0xff]  }
 0xbda   : > { %9454 = vmatprep.subr.bf16.mxu0 %v10908_v1  ;;  %v10934_v0 = vld [vmem:[%s14316_s10 + $0x218] ss:$12 sps:$4 sm:$0xff]   ;;  %v10935_v1 = vld [vmem:[%s14316_s10 + $0x170] ss:$12 sps:$4 sm:$0xff]  }
 0xbee   : > { %v5846_v10 = vpop.f32.mrb[60].mxu1 }
 0xbef   : > { %v9684_v19 = vadd.f32 %v5846_v10, %v3978_v2  ;;  %v5928_v11 = vpop.f32.mrb[44].mxu0  ;;  %v5848_v12 = vpop.f32.mrb[61].mxu1  ;;  %v10937_v2 = vld [vmem:[%s14316_s10 + $0xb0] ss:$12 sps:$4 sm:$0xff]   ;;  %v10941_v10 = vld [vmem:[%s14316_s10 + $0x308] ss:$12 sps:$4 sm:$0xff]  }
 0xbf0   : > { %v9686_v13 = vadd.f32 %v5928_v11, %v3986_v5  ;;  %v9685_v15 = vadd.f32 %v5848_v12, %v3982_v6  ;;  %v5930_v18 = vpop.f32.mrb[45].mxu0  ;;  %v5850_v3 = vpop.f32.mrb[62].mxu1  ;;  %v10938_v5 = vld [vmem:[%s14316_s10 + $0x230] ss:$12 sps:$4 sm:$0xff]   ;;  %v10939_v6 = vld [vmem:[%s14316_s10 + $0x3c8] ss:$12 sps:$4 sm:$0xff]  }
 0xbf1   : > { %v5943_v24 = vmax.f32 %v9684_v19, 0.0  ;;  %v9687_v25 = vadd.f32 %v5930_v18, %v3990_v9  ;;  %v5932_v26 = vpop.f32.mrb[46].mxu0  ;;  %v5851_v29 = vpop.f32.mrb[63].mxu1  ;;  %v10940_v9 = vld [vmem:[%s14316_s10 + $0x548] ss:$12 sps:$4 sm:$0xff]  }
 0xbf2   : > { %v5945_v30 = vmax.f32 %v9686_v13, 0.0  ;;  %v5944_v40 = vmax.f32 %v9685_v15, 0.0  ;;  %v5933_v28 = vpop.f32.mrb[47].mxu0  ;;  %v10942_v19 = vld [vmem:[%s14316_s10 + $0x488] ss:$12 sps:$4 sm:$0xff]  }
 0xbf3   : > { %v5946_v31 = vmax.f32 %v9687_v25, 0.0  ;;  %v13928_v20 = vpack.c.bf16 %v5943_v24, %v5943_v24  ;;  %v10943_v11 = vld [vmem:[%s14316_s10 + $0x3e0] ss:$12 sps:$4 sm:$0xff]   ;;  %v10950_v18 = vld [vmem:[%s14316_s10 + $0x4b8] ss:$12 sps:$4 sm:$0xff]  }
 0xbf4   : > { %v13923_v32 = vpack.c.bf16 %v5944_v40, %v5944_v40  ;;  %v13935_v34 = vpack.c.bf16 %v5945_v30, %v5945_v30  ;;  %v10944_v12 = vld [vmem:[%s14316_s10 + $0x560] ss:$12 sps:$4 sm:$0xff]   ;;  %v10952_v3 = vld [vmem:[%s14316_s10 + $0x590] ss:$12 sps:$4 sm:$0xff]   ;;  %v10955_v26 = vld [vmem:[%s14316_s10 + $0x428] ss:$12 sps:$4 sm:$0xff]  }
 0xbf5   : > { %v13930_v33 = vpack.c.bf16 %v5946_v31, %v5946_v31  ;;  %v10945_v13 = vld [vmem:[%s14316_s10 + $0x320] ss:$12 sps:$4 sm:$0xff]   ;;  %v10953_v24 = vld [vmem:[%s14316_s10 + $0x350] ss:$12 sps:$4 sm:$0xff]   ;;  %v10956_v29 = vld [vmem:[%s14316_s10 + $0x5a8] ss:$12 sps:$4 sm:$0xff]  }
 0xbf6   : > { %8092 = vmatprep.mubr.bf16.mxu1 %v13923_v32  ;;  %v10946_v15 = vld [vmem:[%s14316_s10 + $0x4a0] ss:$12 sps:$4 sm:$0xff]   ;;  %v10954_v25 = vld [vmem:[%s14316_s10 + $0x4d0] ss:$12 sps:$4 sm:$0xff]   ;;  %v10957_v30 = vld [vmem:[%s14316_s10 + $0x368] ss:$12 sps:$4 sm:$0xff]  }
 0xbf7   : > { %8133 = vmatprep.mubr.bf16.mxu0 %v13930_v33  ;;  %8093 = vmatmul.mubr.bf16.vlgmr.msra.gmra.mrb[72].mxu1 %v13928_v20  ;;  %v10958_v40 = vld [vmem:[%s14316_s10 + $0x4e8] ss:$12 sps:$4 sm:$0xff]   ;;  %v10959_v28 = vld [vmem:[%s14316_s10 + $0x440] ss:$12 sps:$4 sm:$0xff]  }
 0xbf8   : > { %8134 = vmatmul.mubr.bf16.vlgmr.msra.gmra.mrb[56].mxu0 %v13935_v34  ;;  %9433 = vmatpush3.bf16.msra.mxu1 %v10909_v21  ;;  %v10960_v31 = vld [vmem:[%s14316_s10 + $0x5c0] ss:$12 sps:$4 sm:$0xff]  }
 0xbf9   : > { %9455 = vmatpush3.bf16.msra.mxu0 %v10910_v52  ;;  %8174 = vmatprep.mubr.bf16.mxu1 %v13385_v51  ;;  %v10917_v51 = vld [vmem:[%s14316_s10 + $0x38] ss:$12 sps:$4 sm:$0xff]   ;;  %v10961_v21 = vld [vmem:[%s14316_s10 + $0x380] ss:$12 sps:$4 sm:$0xff]  }
 0xbfa   : > { %8214 = vmatprep.mubr.bf16.mxu0 %v13387_v7  ;;  %9434 = vmatprep.subr.bf16.mxu1 %v10911_v35  ;;  %v10919_v7 = vld [vmem:[%s14316_s10 + $0x110] ss:$12 sps:$4 sm:$0xff]   ;;  %v14103_v52 = vld [vmem:[%s14317_s11] sm:$0x7] }
 0xbfb   : > { %9456 = vmatprep.subr.bf16.mxu0 %v10912_v17  ;;  %v10962_v35 = vld [vmem:[%s14316_s10 + $0x500] ss:$12 sps:$4 sm:$0xff]   ;;  %v10963_v17 = vld [vmem:[%s14316_s10 + $0x458] ss:$12 sps:$4 sm:$0xff]  }
 0xbfc   : > { %9435 = vmatpush3.bf16.msra.mxu1 %v10913_v37  ;;  %v10964_v37 = vld [vmem:[%s14316_s10 + $0x5d8] ss:$12 sps:$4 sm:$0xff]  }
 0xbfd   : > { %9457 = vmatpush3.bf16.msra.mxu0 %v10914_v38  ;;  %9436 = vmatprep.subr.bf16.mxu1 %v10915_v39  ;;  %v6348_v38 = vrot.slane %v14103_v52, %v11455_v23  ;;  %v6352_v39 = vrot.slane %v14103_v52, %v11452_v22  ;;  %v10968_v22 = vld [vmem:[%s14316_s10 + $0x5f0] ss:$12 sps:$4 sm:$0xff]  }
 0xbfe   : > { %9458 = vmatprep.subr.bf16.mxu0 %v10916_v43  ;;  %v10965_v43 = vld [vmem:[%s14316_s10 + $0x398] ss:$12 sps:$4 sm:$0xff]  }
 0xc00   : > { %9437 = vmatpush3.bf16.msra.mxu1 %v10917_v51  ;;  %v10966_v51 = vld [vmem:[%s14316_s10 + $0x518] ss:$12 sps:$4 sm:$0xff]  }
 0xc01   : > { %9459 = vmatpush3.bf16.msra.mxu0 %v10918_v45  ;;  %9438 = vmatprep.subr.bf16.mxu1 %v10919_v7  ;;  %v10967_v45 = vld [vmem:[%s14316_s10 + $0x470] ss:$12 sps:$4 sm:$0xff]  }
 0xc02   : > { %9460 = vmatprep.subr.bf16.mxu0 %v10920_v63 }
 0xc04   : > { %9439 = vmatpush3.bf16.msra.mxu1 %v10921_v47 }
 0xc05   : > { %9461 = vmatpush3.bf16.msra.mxu0 %v10922_v48  ;;  %9440 = vmatprep.subr.bf16.mxu1 %v10923_v41 }
 0xc06   : > { %9462 = vmatprep.subr.bf16.mxu0 %v10924_v50 }
 0xc08   : > { %9441 = vmatpush3.bf16.msra.mxu1 %v10925_v53  ;;  %v10969_v53 = vld [vmem:[%s14316_s10 + $0x3b0] ss:$12 sps:$4 sm:$0xff]  }
 0xc09   : > { %9463 = vmatpush3.bf16.msra.mxu0 %v10926_v55  ;;  %9442 = vmatprep.subr.bf16.mxu1 %v10927_v56 }
 0xc0a   : > { %9464 = vmatprep.subr.bf16.mxu0 %v10928_v54 }
 0xc0c   : > { %9443 = vmatpush3.bf16.msra.mxu1 %v10929_v57  ;;  %v10970_v57 = vld [vmem:[%s14316_s10 + $0x530] ss:$12 sps:$4 sm:$0xff]  }
 0xc0d   : > { %9465 = vmatpush3.bf16.msra.mxu0 %v10930_v8  ;;  %9444 = vmatprep.subr.bf16.mxu1 %v10931_v58  ;;  %v10971_v8 = vld [vmem:[%s14316_s10 + $0x6c8] ss:$12 sps:$4 sm:$0xff]  }
 0xc0e   : > { %9466 = vmatprep.subr.bf16.mxu0 %v10932_v61 }
 0xc10   : > { %9445 = vmatpush3.bf16.msra.mxu1 %v10933_v49  ;;  %v10972_v49 = vld [vmem:[%s14316_s10 + $0x848] ss:$12 sps:$4 sm:$0xff]  }
 0xc11   : > { %9467 = vmatpush3.bf16.msra.mxu0 %v10934_v0  ;;  %9446 = vmatprep.subr.bf16.mxu1 %v10935_v1  ;;  %v10973_v0 = vld [vmem:[%s14316_s10 + $0x608] ss:$12 sps:$4 sm:$0xff]  }
 0xc12   : > { %9468 = vmatprep.subr.bf16.mxu0 %v10936_v4  ;;  %v10974_v1 = vld [vmem:[%s14316_s10 + $0x788] ss:$12 sps:$4 sm:$0xff]   ;;  %v10975_v4 = vld [vmem:[%s14316_s10 + $0x6e0] ss:$12 sps:$4 sm:$0xff]  }
 0xc14   : > { %9447 = vmatpush3.bf16.msra.mxu1 %v10937_v2  ;;  %v10976_v2 = vld [vmem:[%s14316_s10 + $0x860] ss:$12 sps:$4 sm:$0xff]  }
 0xc15   : > { %9469 = vmatpush3.bf16.msra.mxu0 %v10938_v5  ;;  %9476 = vmatprep.subr.bf16.mxu1 %v10939_v6  ;;  %v10977_v5 = vld [vmem:[%s14316_s10 + $0x620] ss:$12 sps:$4 sm:$0xff]  }
 0xc16   : > { %9498 = vmatprep.subr.bf16.mxu0 %v10940_v9  ;;  %v10978_v6 = vld [vmem:[%s14316_s10 + $0x7a0] ss:$12 sps:$4 sm:$0xff]   ;;  %v10982_v9 = vld [vmem:[%s14316_s10 + $0x7b8] ss:$12 sps:$4 sm:$0xff]  }
 0xc17   : > { %8175 = vmatmul.mubr.bf16.vlgmr.msra.gmra.mrb[76].mxu1 %v13508_v60  ;;  %v10947_v60 = vld [vmem:[%s14316_s10 + $0x3f8] ss:$12 sps:$4 sm:$0xff]  }
 0xc18   : > { %8215 = vmatmul.mubr.bf16.vlgmr.msra.gmra.mrb[60].mxu0 %v13516_v62  ;;  %9477 = vmatpush3.bf16.msra.mxu1 %v10941_v10  ;;  %v10948_v62 = vld [vmem:[%s14316_s10 + $0x578] ss:$12 sps:$4 sm:$0xff]   ;;  %v10984_v10 = vld [vmem:[%s14316_s10 + $0x890] ss:$12 sps:$4 sm:$0xff]  }
 0xc19   : > { %8254 = vmatprep.mubr.bf16.mxu1 %v13699_v42  ;;  %9499 = vmatpush3.bf16.msra.mxu0 %v10942_v19  ;;  %v10949_v42 = vld [vmem:[%s14316_s10 + $0x338] ss:$12 sps:$4 sm:$0xff]   ;;  %v10985_v19 = vld [vmem:[%s14316_s10 + $0x650] ss:$12 sps:$4 sm:$0xff]  }
 0xc1a   : > { %8294 = vmatprep.mubr.bf16.mxu0 %v13704_v36  ;;  %9478 = vmatprep.subr.bf16.mxu1 %v10943_v11  ;;  %v10951_v36 = vld [vmem:[%s14316_s10 + $0x410] ss:$12 sps:$4 sm:$0xff]  }
 0xc1b   : > { %9500 = vmatprep.subr.bf16.mxu0 %v10944_v12  ;;  %v10986_v11 = vld [vmem:[%s14316_s10 + $0x7d0] ss:$12 sps:$4 sm:$0xff]   ;;  %v10987_v12 = vld [vmem:[%s14316_s10 + $0x728] ss:$12 sps:$4 sm:$0xff]  }
 0xc1c   : > { %9479 = vmatpush3.bf16.msra.mxu1 %v10945_v13  ;;  %v10988_v13 = vld [vmem:[%s14316_s10 + $0x8a8] ss:$12 sps:$4 sm:$0xff]  }
 0xc1d   : > { %9501 = vmatpush3.bf16.msra.mxu0 %v10946_v15  ;;  %9480 = vmatprep.subr.bf16.mxu1 %v10947_v60  ;;  %v10989_v15 = vld [vmem:[%s14316_s10 + $0x668] ss:$12 sps:$4 sm:$0xff]  }
 0xc1e   : > { %9502 = vmatprep.subr.bf16.mxu0 %v10948_v62  ;;  %v10990_v60 = vld [vmem:[%s14316_s10 + $0x7e8] ss:$12 sps:$4 sm:$0xff]   ;;  %v10991_v62 = vld [vmem:[%s14316_s10 + $0x740] ss:$12 sps:$4 sm:$0xff]  }
 0xc20   : > { %9481 = vmatpush3.bf16.msra.mxu1 %v10949_v42  ;;  %v10992_v42 = vld [vmem:[%s14316_s10 + $0x8c0] ss:$12 sps:$4 sm:$0xff]  }
 0xc21   : > { %9503 = vmatpush3.bf16.msra.mxu0 %v10950_v18  ;;  %9482 = vmatprep.subr.bf16.mxu1 %v10951_v36  ;;  %v10993_v18 = vld [vmem:[%s14316_s10 + $0x680] ss:$12 sps:$4 sm:$0xff]  }
 0xc22   : > { %9504 = vmatprep.subr.bf16.mxu0 %v10952_v3  ;;  %v10994_v36 = vld [vmem:[%s14316_s10 + $0x800] ss:$12 sps:$4 sm:$0xff]   ;;  %v10995_v3 = vld [vmem:[%s14316_s10 + $0x758] ss:$12 sps:$4 sm:$0xff]  }
 0xc24   : > { %9483 = vmatpush3.bf16.msra.mxu1 %v10953_v24  ;;  %v10996_v24 = vld [vmem:[%s14316_s10 + $0x8d8] ss:$12 sps:$4 sm:$0xff]  }
 0xc25   : > { %9505 = vmatpush3.bf16.msra.mxu0 %v10954_v25  ;;  %9484 = vmatprep.subr.bf16.mxu1 %v10955_v26  ;;  %v10997_v25 = vld [vmem:[%s14316_s10 + $0x698] ss:$12 sps:$4 sm:$0xff]  }
 0xc26   : > { %9506 = vmatprep.subr.bf16.mxu0 %v10956_v29  ;;  %v10998_v26 = vld [vmem:[%s14316_s10 + $0x818] ss:$12 sps:$4 sm:$0xff]   ;;  %v10999_v29 = vld [vmem:[%s14316_s10 + $0x770] ss:$12 sps:$4 sm:$0xff]  }
 0xc28   : > { %9485 = vmatpush3.bf16.msra.mxu1 %v10957_v30  ;;  %v11000_v30 = vld [vmem:[%s14316_s10 + $0x8f0] ss:$12 sps:$4 sm:$0xff]  }
 0xc29   : > { %9507 = vmatpush3.bf16.msra.mxu0 %v10958_v40  ;;  %9486 = vmatprep.subr.bf16.mxu1 %v10959_v28  ;;  %v11001_v40 = vld [vmem:[%s14316_s10 + $0x6b0] ss:$12 sps:$4 sm:$0xff]  }
 0xc2a   : > { %9508 = vmatprep.subr.bf16.mxu0 %v10960_v31  ;;  %v11002_v28 = vld [vmem:[%s14316_s10 + $0x830] ss:$12 sps:$4 sm:$0xff]  }
 0xc2c   : > { %9487 = vmatpush3.bf16.msra.mxu1 %v10961_v21 }
 0xc2d   : > { %9509 = vmatpush3.bf16.msra.mxu0 %v10962_v35  ;;  %9488 = vmatprep.subr.bf16.mxu1 %v10963_v17 }
 0xc2e   : > { %v7930_v7 = vpop.f32.mrb[64].mxu1  ;;  %9510 = vmatprep.subr.bf16.mxu0 %v10964_v37 }
 0xc2f   : > { %v7931_v23 = vadd.f32 %v7930_v7, %v6348_v38  ;;  %v7971_v63 = vpop.f32.mrb[48].mxu0  ;;  %v7932_v47 = vpop.f32.mrb[65].mxu1 }
 0xc30   : > { %v7933_v48 = vadd.f32 %v7932_v47, %v6352_v39  ;;  %v7973_v41 = vpop.f32.mrb[49].mxu0  ;;  %9489 = vmatpush3.bf16.msra.mxu1 %v10965_v43  ;;  %v7934_v50 = vpop.f32.mrb[66].mxu1 }
 0xc31   : > { %v14133_v55 = vadd.f32 %v7971_v63, %v7931_v23  ;;  %9511 = vmatpush3.bf16.msra.mxu0 %v10966_v51  ;;  %v7975_v56 = vpop.f32.mrb[50].mxu0  ;;  %v7935_v54 = vpop.f32.mrb[67].mxu1  ;;  %9490 = vmatprep.subr.bf16.mxu1 %v10967_v45 }
 0xc32   : > { %v14141_v58 = vadd.f32 %v7973_v41, %v7933_v48  ;;  %v7976_v61 = vpop.f32.mrb[51].mxu0  ;;  %9512 = vmatprep.subr.bf16.mxu0 %v10968_v22 }
 0xc33   : > { %v6356_v61 = vrot.slane %v14103_v52, %v11546_v59 }
 0xc34   : > { %9491 = vmatpush3.bf16.msra.mxu1 %v10969_v53 }
 0xc35   : > { %9513 = vmatpush3.bf16.msra.mxu0 %v10970_v57  ;;  %9520 = vmatprep.subr.bf16.mxu1 %v10971_v8 }
 0xc36   : > { %9542 = vmatprep.subr.bf16.mxu0 %v10972_v49 }
 0xc37   : > { %8255 = vmatmul.mubr.bf16.vlgmr.msra.gmra.mrb[80].mxu1 %v13720_v46  ;;  %v10979_v46 = vld [vmem:[%s14316_s10 + $0x6f8] ss:$12 sps:$4 sm:$0xff]  }
 0xc38   : > { %8295 = vmatmul.mubr.bf16.vlgmr.msra.gmra.mrb[64].mxu0 %v13728_v44  ;;  %9521 = vmatpush3.bf16.msra.mxu1 %v10973_v0  ;;  %v10980_v44 = vld [vmem:[%s14316_s10 + $0x878] ss:$12 sps:$4 sm:$0xff]  }
 0xc39   : > { %8334 = vmatprep.mubr.bf16.mxu1 %v13923_v32  ;;  %9543 = vmatpush3.bf16.msra.mxu0 %v10974_v1  ;;  %v10981_v32 = vld [vmem:[%s14316_s10 + $0x638] ss:$12 sps:$4 sm:$0xff]  }
 0xc3a   : > { %8374 = vmatprep.mubr.bf16.mxu0 %v13930_v33  ;;  %9522 = vmatprep.subr.bf16.mxu1 %v10975_v4  ;;  %v10983_v33 = vld [vmem:[%s14316_s10 + $0x710] ss:$12 sps:$4 sm:$0xff]  }
 0xc3b   : > { %9544 = vmatprep.subr.bf16.mxu0 %v10976_v2 }
 0xc3c   : > { %9523 = vmatpush3.bf16.msra.mxu1 %v10977_v5 }
 0xc3d   : > { %9545 = vmatpush3.bf16.msra.mxu0 %v10978_v6  ;;  %9524 = vmatprep.subr.bf16.mxu1 %v10979_v46 }
 0xc3e   : > { %9546 = vmatprep.subr.bf16.mxu0 %v10980_v44 }
 0xc40   : > { %9525 = vmatpush3.bf16.msra.mxu1 %v10981_v32 }
 0xc41   : > { %9547 = vmatpush3.bf16.msra.mxu0 %v10982_v9  ;;  %9526 = vmatprep.subr.bf16.mxu1 %v10983_v33 }
 0xc42   : > { %9548 = vmatprep.subr.bf16.mxu0 %v10984_v10 }
 0xc44   : > { %9527 = vmatpush3.bf16.msra.mxu1 %v10985_v19 }
 0xc45   : > { %9549 = vmatpush3.bf16.msra.mxu0 %v10986_v11  ;;  %9528 = vmatprep.subr.bf16.mxu1 %v10987_v12 }
 0xc46   : > { %9550 = vmatprep.subr.bf16.mxu0 %v10988_v13 }
 0xc48   : > { %9529 = vmatpush3.bf16.msra.mxu1 %v10989_v15 }
 0xc49   : > { %9551 = vmatpush3.bf16.msra.mxu0 %v10990_v60  ;;  %9530 = vmatprep.subr.bf16.mxu1 %v10991_v62 }
 0xc4a   : > { %9552 = vmatprep.subr.bf16.mxu0 %v10992_v42 }
 0xc4c   : > { %9531 = vmatpush3.bf16.msra.mxu1 %v10993_v18 }
 0xc4d   : > { %9553 = vmatpush3.bf16.msra.mxu0 %v10994_v36  ;;  %9532 = vmatprep.subr.bf16.mxu1 %v10995_v3 }
 0xc4e   : > { %9554 = vmatprep.subr.bf16.mxu0 %v10996_v24 }
 0xc50   : > { %9533 = vmatpush3.bf16.msra.mxu1 %v10997_v25 }
 0xc51   : > { %9555 = vmatpush3.bf16.msra.mxu0 %v10998_v26  ;;  %9534 = vmatprep.subr.bf16.mxu1 %v10999_v29 }
 0xc52   : > { %9556 = vmatprep.subr.bf16.mxu0 %v11000_v30 }
 0xc54   : > { %9535 = vmatpush3.bf16.msra.mxu1 %v11001_v40 }
 0xc55   : > { %9557 = vmatpush3.bf16.msra.mxu0 %v11002_v28 }
 0xc57   : > { %8335 = vmatmul.mubr.bf16.vlgmr.msra.gmra.mrb[84].mxu1 %v13928_v20 }
 0xc58   : > { %8375 = vmatmul.mubr.bf16.vlgmr.msra.gmra.mrb[68].mxu0 %v13935_v34 }
 0xc6e   : > { %v8012_v31 = vpop.f32.mrb[68].mxu1 }
 0xc6f   : > { %v8013_v21 = vadd.f32 %v8012_v31, %v14133_v55  ;;  %v8053_v35 = vpop.f32.mrb[52].mxu0  ;;  %v8014_v17 = vpop.f32.mrb[69].mxu1 }
 0xc70   : > { %v8015_v37 = vadd.f32 %v8014_v17, %v14141_v58  ;;  %v8055_v38 = vpop.f32.mrb[53].mxu0  ;;  %v8016_v39 = vpop.f32.mrb[70].mxu1 }
 0xc71   : > { %v8054_v43 = vadd.f32 %v8053_v35, %v8013_v21  ;;  %v8057_v51 = vpop.f32.mrb[54].mxu0  ;;  %v8017_v45 = vpop.f32.mrb[71].mxu1 }
 0xc72   : > { %v8056_v7 = vadd.f32 %v8055_v38, %v8015_v37  ;;  %v8058_v22 = vpop.f32.mrb[55].mxu0 }
 0xcca   : > { %v8094_v23 = vpop.f32.mrb[72].mxu1 }
 0xccb   : > { %v8095_v20 = vadd.f32 %v8094_v23, %v8054_v43  ;;  %v8135_v34 = vpop.f32.mrb[56].mxu0  ;;  %v8096_v63 = vpop.f32.mrb[73].mxu1 }
 0xccc   : > { %v8097_v47 = vadd.f32 %v8096_v63, %v8056_v7  ;;  %v8137_v48 = vpop.f32.mrb[57].mxu0  ;;  %v8098_v41 = vpop.f32.mrb[74].mxu1 }
 0xccd   : > { %v8136_v50 = vadd.f32 %v8135_v34, %v8095_v20  ;;  %v8139_v53 = vpop.f32.mrb[58].mxu0  ;;  %v8099_v55 = vpop.f32.mrb[75].mxu1 }
 0xcce   : > { %v8138_v56 = vadd.f32 %v8137_v48, %v8097_v47  ;;  %v8140_v54 = vpop.f32.mrb[59].mxu0 }
 0xccf   : > { %v8382_v57 = vadd.f32 %v8136_v50, %v12340_v14 }
 0xcd0   : > { %v8383_v8 = vadd.f32 %v8138_v56, %v12343_v16 }
 0xcd1   : > { %8385 = vst [vmem:[%s14249_s16] sm:$0xff] %v8382_v57 }
 0xcd2   : > { %8386 = vst [vmem:[%s14249_s16 + $0x8] sm:$0xff] %v8383_v8 }
 0xcea   : > { %v9448_v58 = vpop.f32.mrb[76].mxu1 }
 0xceb   : > { %v9470_v49 = vpop.f32.mrb[60].mxu0  ;;  %v9449_v0 = vpop.f32.mrb[77].mxu1 }
 0xcec   : > { %v9450_v1 = vadd.f32 %v9449_v0, %v9448_v58  ;;  %v9471_v4 = vpop.f32.mrb[61].mxu0  ;;  %v9451_v2 = vpop.f32.mrb[78].mxu1 }
 0xced   : > { %v9472_v5 = vadd.f32 %v9471_v4, %v9470_v49  ;;  %v9473_v6 = vpop.f32.mrb[62].mxu0  ;;  %v9452_v14 = vpop.f32.mrb[79].mxu1 }
 0xcee   : > { %v8177_v46 = vadd.f32 %v9450_v1, %v6356_v61  ;;  %v9474_v16 = vpop.f32.mrb[63].mxu0 }
 0xcf0   : > { %v8217_v44 = vadd.f32 %v9472_v5, %v8177_v46 }
 0xd0a   : > { %v9492_v32 = vpop.f32.mrb[80].mxu1 }
 0xd0b   : > { %v9514_v9 = vpop.f32.mrb[64].mxu0  ;;  %v9493_v33 = vpop.f32.mrb[81].mxu1 }
 0xd0c   : > { %v9494_v10 = vadd.f32 %v9493_v33, %v9492_v32  ;;  %v9515_v19 = vpop.f32.mrb[65].mxu0  ;;  %v9495_v11 = vpop.f32.mrb[82].mxu1 }
 0xd0d   : > { %v9516_v12 = vadd.f32 %v9515_v19, %v9514_v9  ;;  %v9517_v13 = vpop.f32.mrb[66].mxu0  ;;  %v9496_v59 = vpop.f32.mrb[83].mxu1 }
 0xd0e   : > { %v8257_v52 = vadd.f32 %v9494_v10, %v8217_v44  ;;  %v9518_v15 = vpop.f32.mrb[67].mxu0 }
 0xd10   : > { %v8297_v60 = vadd.f32 %v9516_v12, %v8257_v52 }
 0xd2a   : > { %v9536_v62 = vpop.f32.mrb[84].mxu1 }
 0xd2b   : > { %v9558_v42 = vpop.f32.mrb[68].mxu0  ;;  %v9537_v18 = vpop.f32.mrb[85].mxu1 }
 0xd2c   : > { %v9538_v36 = vadd.f32 %v9537_v18, %v9536_v62  ;;  %v9559_v3 = vpop.f32.mrb[69].mxu0  ;;  %v9539_v24 = vpop.f32.mrb[86].mxu1 }
 0xd2d   : > { %v9560_v25 = vadd.f32 %v9559_v3, %v9558_v42  ;;  %v9561_v26 = vpop.f32.mrb[70].mxu0  ;;  %v9540_v29 = vpop.f32.mrb[87].mxu1 }
 0xd2e   : > { %v8337_v30 = vadd.f32 %v9538_v36, %v8297_v60  ;;  %v9562_v40 = vpop.f32.mrb[71].mxu0 }
 0xd30   : > { %v8377_v28 = vadd.f32 %v9560_v25, %v8337_v30 }
 0xd32   : > { %v8384_v31 = vadd.f32 %v8377_v28, %v12346_v27 }
 0xd34   : > { %8387 = vst [vmem:[%s14249_s16 + $0x10] sm:$0xff] %v8384_v31 }
 0xd35   : > { %11047 = shalt.err (!%p11044_p3)
}
 0xd36   : > { %s11048_s0 = scalar_lea.hbm %s14261_s28, 384  ;;  %s11052_s16 = scalar_lea.hbm %s14318_s12, 768 }
 0xd37   : > { %p11049_p4 = scmp.ne.s32.totalorder %s14261_s28, %s11048_s0  ;;  %p11053_p9 = scmp.lt.u32.totalorder %s14261_s28, %s14318_s12 }
 0xd38   : > { %p11054_p10 = scmp.lt.u32.totalorder %s11052_s16, %s11048_s0  ;;  %p11056_p12 = scmp.lt.u32.totalorder %s11048_s0, %s14261_s28 }
 0xd39   : > { %p11050_p7 = pnand %p11049_p4, %p11206_p5 }
 0xd3a   : > { %p11055_p11 = por %p11054_p10, %p11053_p9 }
 0xd3b   : > { %p11051_p8 = pneg %p11050_p7 }
 0xd3c   : > { %p11057_p13 = por %p11056_p12, %p11055_p11 }
 0xd3e   : > { %p11058_p0 = pnand %p11057_p13, %p11051_p8 }
 0xd40   : > { %11061 = shalt.err (!%p11058_p0)
}
 0xd41   : > { %9731 = dma.vmem_to_hbm [thread:$0]  (%p11206_p5), %s14263_s18, 384, %s14261_s28, %s8389_s29  }
 0xd42 PF: > { %p9737_p1 = scmp.ge.s32.totalorder %s11096_s24, 2  ;;  %s8415_s26 = sand.u32 1, %s11084_s21  }
 0xd43   : > { %s8416_s30 = scalar_lea.sflag [#allocation3], %s8415_s26 }
 0xd44   : > { %p9734_p2 = pnand %p9737_p1, %p11210_p6 }
 0xd46   : > { %11079 = dma.done.wait (!%p9734_p2), %s8416_s30, 384  }
 0xd47   : > { %11081 = vsyncadd (!%p9734_p2), %s8416_s30, 4294966912  ;;  %s14331_s24 = sld [smem:[#allocation6_spill]]  ;;  %s14332_s25 = sld [smem:[#allocation5_spill]] }
 0xd48   : > { %s14333_s23 = sld [smem:[#allocation7_spill]]  ;;  %s14334_s21 = smov %s11088_s22 }
 0xd4d   : > { %p22_p3 = scmp.ge.s32.totalorder %s14331_s24, 4   ;;  %s14335_s22 = smov %s14332_s25 }
 0xd4f   :  { %24 = sbr.rel (!%p22_p3) target bundleno = 5 (0x5), region = 103 }
 0xd56   :  { %8421 = vsyncpa [#allocation3], 1 }
 0xd57   :  { %8423 = vsyncpa [#allocation3 + $0x1], 1 }

</bundles_post_ra>
